<compile_context>
chip_gen: v5e
topology: v5e:2x2
jax: 0.10.0
libtpu: 0.0.40
codegen_flags: <defaults>
</compile_context>

<pallas_src>
import functools

import jax
import jax.numpy as jnp
from jax.experimental import pallas as pl
from jax.experimental.pallas import tpu as pltpu


# ----------------------------------------------------------------------------
# Fused, item-tiled Pallas kernel
# ----------------------------------------------------------------------------

def adv_fused_kernel(
    # scalar prefetch (SMEM)
    anneal_ref,
    # tensor inputs (VMEM tiles)
    x_ref, u1_ref, u2_ref,
    w1g_ref, b1g_ref, wmug_ref, bmug_ref, wd1g_ref, bd1g_ref, wd2g_ref, bd2g_ref,
    w1d_ref, b1d_ref, wmud_ref, bmud_ref, wlvd_ref, blvd_ref,
    wd1d_ref, bd1d_ref, wd2d_ref, bd2d_ref,
    # output
    out_ref,
    # VMEM scratch (persists across the whole grid)
    row_ones, acc_xg, acc_xd, hdecg_sc, hdecd_sc, zori_sc, lv_sc,
    acc_a1, acc_a2, ssq_a1, ssq_a2, regadd_sc, regdrop_sc,
    m_run, s_run, acc_lx,
    *, tau, alpha, alpha_aug, rg_aug, temperature, gumbel_bias, n_items):
  f32 = jnp.float32
  bf16 = jnp.bfloat16

  p = pl.program_id(0)          # phase: 0 = x-encode sweep, 1 = decode/aug sweep
  t = pl.program_id(1)          # item tile index
  nt = pl.num_programs(1)

  x_bf = x_ref[...]             # (B, TN) bf16, exact for binary {0,1}
  xt = x_bf.astype(f32)
  B, _ = xt.shape

  def mm(a_bf, w_ref, b_ref=None):
    out = jnp.dot(a_bf, w_ref[...], preferred_element_type=f32)   # MXU, f32 acc
    if b_ref is not None:
      out = out + b_ref[...]
    return out

  # ------------------------------ init ------------------------------
  @pl.when((p == 0) & (t == 0))
  def _init():
    for r in (row_ones, acc_xg, acc_xd, acc_a1, acc_a2,
              ssq_a1, ssq_a2, regadd_sc, regdrop_sc, s_run, acc_lx):
      r[...] = jnp.zeros_like(r)
    m_run[...] = jnp.full_like(m_run, -jnp.inf)

  # ---------- phase 0: stream x tiles, accumulate encoder GEMMs ----------
  @pl.when(p == 0)
  def _phase0():
    # For binary x: sum(x) == sum(x^2)  ->  one accumulator serves the L2 norm
    # of x and the per-row interaction count used by the recon term.
    row_ones[...] += jnp.sum(xt, axis=1, keepdims=True)
    acc_xg[...] += mm(x_bf, w1g_ref)
    acc_xd[...] += mm(x_bf, w1d_ref)

  # ---------- mid epilogue (once): finish G forward + D encode of x ----------
  @pl.when((p == 1) & (t == 0))
  def _mid():
    inv_x = jax.lax.rsqrt(row_ones[...] + 1e-12)          # 1/||x||, exact divide
    # Generator G (eval: z = mu); l2norm folded in as row scale of the accumulator.
    h_g = jnp.tanh(inv_x * acc_xg[...] + b1g_ref[...])
    mu_g = mm(h_g.astype(bf16), wmug_ref, bmug_ref)
    hdecg_sc[...] = jnp.tanh(mm(mu_g.astype(bf16), wd1g_ref, bd1g_ref)).astype(bf16)
    # Discriminator D encoder on x.
    h_dx = jnp.tanh(inv_x * acc_xd[...] + b1d_ref[...])
    hdx_bf = h_dx.astype(bf16)
    z_ori = mm(hdx_bf, wmud_ref, bmud_ref)
    zori_sc[...] = z_ori
    lv_sc[...] = mm(hdx_bf, wlvd_ref, blvd_ref)
    # D decoder hidden (needed per item tile in phase 1).
    hdecd_sc[...] = jnp.tanh(mm(z_ori.astype(bf16), wd1d_ref, bd1d_ref)).astype(bf16)

  # ---------- phase 1: Gumbel aug + D encode(aug) + D decode (online LSE) ----------
  @pl.when(p == 1)
  def _phase1():
    is_one = xt > 0.5                                     # x assumed binary {0,1}
    aug_logits = mm(hdecg_sc[...], wd2g_ref, bd2g_ref)    # (B, TN) G decode tile
    inv_tau = 1.0 / tau

    def gumbel_mask(u):
      delta = (1.0 - gumbel_bias) - (1.0 - 2.0 * gumbel_bias) * u
      p_k = jnp.log(delta / (1.0 - delta)) + aug_logits   # single log (feedback)
      return jax.nn.sigmoid(p_k * inv_tau)

    g1 = gumbel_mask(u1_ref[...])                         # phase-1 draw
    g2 = gumbel_mask(u2_ref[...])                         # phase-2 draw
    aug1 = jnp.where(is_one, g1, 1.0 - g1)
    aug2 = jnp.where(is_one, g2, 1.0 - g2)

    # D encoder accumulation for both augmented graphs (no 3x(B,N) concat).
    acc_a1[...] += mm(aug1.astype(bf16), w1d_ref)
    acc_a2[...] += mm(aug2.astype(bf16), w1d_ref)
    ssq_a1[...] += jnp.sum(aug1 * aug1, axis=1, keepdims=True)
    ssq_a2[...] += jnp.sum(aug2 * aug2, axis=1, keepdims=True)

    # Augmenter L1 regularizers (values already in (0,1) -> no abs needed).
    regadd_sc[...] += jnp.sum(aug1 * (1.0 - xt), axis=1, keepdims=True)
    regdrop_sc[...] += jnp.sum((1.0 - aug1) * xt, axis=1, keepdims=True)

    # D decoder logits for this item tile + online log-sum-exp + sum(logits*x).
    logits = mm(hdecd_sc[...], wd2d_ref, bd2d_ref)        # (B, TN)
    m_new = jnp.maximum(m_run[...], jnp.max(logits, axis=1, keepdims=True))
    s_run[...] = (s_run[...] * jnp.exp(m_run[...] - m_new)
                  + jnp.sum(jnp.exp(logits - m_new), axis=1, keepdims=True))
    m_run[...] = m_new
    acc_lx[...] += jnp.sum(logits * xt, axis=1, keepdims=True)

  # ------------------------- final epilogue: losses -------------------------
  @pl.when((p == 1) & (t == nt - 1))
  def _final():
    b1d = b1d_ref[...]
    z_a1 = mm(jnp.tanh(jax.lax.rsqrt(ssq_a1[...] + 1e-12) * acc_a1[...] + b1d
                       ).astype(bf16), wmud_ref, bmud_ref)
    z_a2 = mm(jnp.tanh(jax.lax.rsqrt(ssq_a2[...] + 1e-12) * acc_a2[...] + b1d
                       ).astype(bf16), wmud_ref, bmud_ref)
    z_ori = zori_sc[...]
    lv = lv_sc[...]

    # InfoNCE: transpose-free, reciprocal-free; diagonal via elementwise product.
    r = jax.lax.broadcasted_iota(jnp.int32, (B, B), 0)
    c = jax.lax.broadcasted_iota(jnp.int32, (B, B), 1)
    offdiag = (r != c).astype(f32)
    inv_temp = 1.0 / temperature

    def calc_I(z1, z2):
      z1n = (z1 * jax.lax.rsqrt(jnp.sum(z1 * z1, axis=1, keepdims=True) + 1e-12)
             ).astype(bf16)
      z2n = (z2 * jax.lax.rsqrt(jnp.sum(z2 * z2, axis=1, keepdims=True) + 1e-12)
             ).astype(bf16)
      sim = jnp.exp(jax.lax.dot_general(
          z1n, z2n, (((1,), (1,)), ((), ())),
          preferred_element_type=f32) * inv_temp)                      # (B, B)
      pos = jnp.exp(jnp.sum(z1n.astype(f32) * z2n.astype(f32),
                            axis=1, keepdims=True) * inv_temp)         # diag (B,1)
      sim_off = sim * offdiag
      mean_log_pos = jnp.mean(jnp.log(pos))
      loss_col = mean_log_pos - jnp.mean(
          jnp.log(jnp.sum(sim_off, axis=0, keepdims=True)))
      loss_row = mean_log_pos - jnp.mean(
          jnp.log(jnp.sum(sim_off, axis=1, keepdims=True)))
      return 0.5 * (loss_col + loss_row)

    mi_aug = calc_I(z_ori, z_a1)
    mi_rec = calc_I(z_ori, z_a2)

    ones_total = jnp.sum(row_ones[...])
    cnt1 = jnp.maximum(ones_total, 1.0)
    cnt0 = jnp.maximum(float(B * n_items) - ones_total, 1.0)
    add = jnp.sum(regadd_sc[...]) / cnt0
    drop = jnp.sum(regdrop_sc[...]) / cnt1
    reg_aug = add + drop

    lse = m_run[...] + jnp.log(s_run[...])                              # (B,1)
    recon = -jnp.mean(acc_lx[...] - lse * row_ones[...])
    kl = -0.5 * jnp.mean(jnp.sum(1.0 + lv - z_ori * z_ori - jnp.exp(lv),
                                 axis=1, keepdims=True))

    anneal = anneal_ref[0]
    aug_loss = alpha_aug * mi_aug + rg_aug * reg_aug
    rec_loss = recon + anneal * kl - alpha * mi_rec

    # Lane-dense (1, 128) packed output; 9 selects in the epilogue are negligible.
    vals = (rec_loss, aug_loss, mi_rec, mi_aug, recon, kl, reg_aug, drop, add)
    lane = jax.lax.broadcasted_iota(jnp.int32, (1, 128), 1)
    packed = jnp.zeros((1, 128), f32)
    for i, v in enumerate(vals):
      packed = jnp.where(lane == i, v, packed)
    out_ref[...] = packed


# ----------------------------------------------------------------------------
# Wrapper: padding to lane-dense dims + single pallas_call
# ----------------------------------------------------------------------------

class Args:
  model = "multvae"
  tau_aug = 1.0
  alpha = 0.1
  alpha_aug = 1.0
  rg_aug = 0.5


def _pad_dim(a, axis, mult=128):
  pad = (-a.shape[axis]) % mult
  if pad == 0:
    return a
  widths = [(0, 0)] * a.ndim
  widths[axis] = (0, pad)
  return jnp.pad(a, widths)


def _prep_params(p, need_logvar):
  """Zero-pad hidden/latent dims to multiples of 128 (exact) and cast weights to bf16."""
  bf = jnp.bfloat16
  out = [_pad_dim(p["w1"], 1).astype(bf), _pad_dim(p["b1"], 1),
         _pad_dim(_pad_dim(p["wmu"], 0), 1).astype(bf), _pad_dim(p["bmu"], 1)]
  if need_logvar:
    out += [_pad_dim(_pad_dim(p["wlv"], 0), 1).astype(bf), _pad_dim(p["blv"], 1)]
  out += [_pad_dim(_pad_dim(p["wd1"], 0), 1).astype(bf), _pad_dim(p["bd1"], 1),
          _pad_dim(p["wd2"], 0).astype(bf), p["bd2"]]
  return out


def adv_forward(x, anneal, params_G, params_D, key, arg, tile_n=256):
  B, N = x.shape
  assert N % 128 == 0, "item count must be a multiple of 128 (lane width)"
  tn = tile_n
  while N % tn:
    tn //= 2
  nt = N // tn

  g_par = _prep_params(params_G, need_logvar=False)   # w1,b1,wmu,bmu,wd1,bd1,wd2,bd2
  d_par = _prep_params(params_D, need_logvar=True)    # + wlv,blv
  hp = g_par[0].shape[1]                               # padded hidden
  lp = g_par[2].shape[1]                               # padded latent

  # Host-side uniforms (one fresh draw per phase), replacing in-kernel pltpu.prng_*.
  k1, k2 = jax.random.split(key)
  u1 = jax.random.uniform(k1, (B, N), jnp.float32)
  u2 = jax.random.uniform(k2, (B, N), jnp.float32)

  # ---- index maps (trailing *_ absorbs the scalar-prefetch ref) ----
  def tile_cols(p, t, *_):          # x: walked in both phases
    return (0, t)

  def cols_phase1(p, t, *_):        # only used in phase 1; frozen during phase 0
    return (0, jnp.where(p == 0, 0, t))

  def rows_phase0(p, t, *_):        # only used in phase 0; frozen during phase 1
    return (jnp.where(p == 0, t, nt - 1), 0)

  def rows_both(p, t, *_):          # w1_d: needed in both sweeps
    return (t, 0)

  def whole(p, t, *_):
    return (0, 0)

  in_specs = [
      pl.BlockSpec((B, tn), tile_cols),        # x
      pl.BlockSpec((B, tn), cols_phase1),      # u1
      pl.BlockSpec((B, tn), cols_phase1),      # u2
      # Generator G
      pl.BlockSpec((tn, hp), rows_phase0),     # w1_g
      pl.BlockSpec((1, hp), whole),            # b1_g
      pl.BlockSpec((hp, lp), whole),           # wmu_g
      pl.BlockSpec((1, lp), whole),            # bmu_g
      pl.BlockSpec((lp, hp), whole),           # wd1_g
      pl.BlockSpec((1, hp), whole),            # bd1_g
      pl.BlockSpec((hp, tn), cols_phase1),     # wd2_g
      pl.BlockSpec((1, tn), cols_phase1),      # bd2_g
      # Discriminator D
      pl.BlockSpec((tn, hp), rows_both),       # w1_d
      pl.BlockSpec((1, hp), whole),            # b1_d
      pl.BlockSpec((hp, lp), whole),           # wmu_d
      pl.BlockSpec((1, lp), whole),            # bmu_d
      pl.BlockSpec((hp, lp), whole),           # wlv_d
      pl.BlockSpec((1, lp), whole),            # blv_d
      pl.BlockSpec((lp, hp), whole),           # wd1_d
      pl.BlockSpec((1, hp), whole),            # bd1_d
      pl.BlockSpec((hp, tn), cols_phase1),     # wd2_d
      pl.BlockSpec((1, tn), cols_phase1),      # bd2_d
  ]

  scratch = [
      pltpu.VMEM((B, 1), jnp.float32),      # row_ones (= sum x = sum x^2)
      pltpu.VMEM((B, hp), jnp.float32),     # acc x @ w1_g
      pltpu.VMEM((B, hp), jnp.float32),     # acc x @ w1_d
      pltpu.VMEM((B, hp), jnp.bfloat16),    # G decoder hidden
      pltpu.VMEM((B, hp), jnp.bfloat16),    # D decoder hidden
      pltpu.VMEM((B, lp), jnp.float32),     # z_ori
      pltpu.VMEM((B, lp), jnp.float32),     # logvar(x)
      pltpu.VMEM((B, hp), jnp.float32),     # acc aug1 @ w1_d
      pltpu.VMEM((B, hp), jnp.float32),     # acc aug2 @ w1_d
      pltpu.VMEM((B, 1), jnp.float32),      # sum aug1^2
      pltpu.VMEM((B, 1), jnp.float32),      # sum aug2^2
      pltpu.VMEM((B, 1), jnp.float32),      # reg add accumulator
      pltpu.VMEM((B, 1), jnp.float32),      # reg drop accumulator
      pltpu.VMEM((B, 1), jnp.float32),      # running max (online LSE)
      pltpu.VMEM((B, 1), jnp.float32),      # running sum exp (online LSE)
      pltpu.VMEM((B, 1), jnp.float32),      # sum logits * x
  ]

  kernel = functools.partial(
      adv_fused_kernel, tau=arg.tau_aug, alpha=arg.alpha, alpha_aug=arg.alpha_aug,
      rg_aug=arg.rg_aug, temperature=0.2, gumbel_bias=1e-4, n_items=N)

  grid_spec = pltpu.PrefetchScalarGridSpec(
      num_scalar_prefetch=1,
      grid=(2, nt),
      in_specs=in_specs,
      out_specs=pl.BlockSpec((1, 128), whole),
      scratch_shapes=scratch)

  kwargs = {}
  if jax.devices()[0].platform == "tpu":
    kwargs["compiler_params"] = pltpu.CompilerParams(
        dimension_semantics=("arbitrary", "arbitrary"),
        vmem_limit_bytes=96 * 1024 * 1024)

  out = pl.pallas_call(
      kernel,
      grid_spec=grid_spec,
      out_shape=jax.ShapeDtypeStruct((1, 128), jnp.float32),
      **kwargs,
  )(jnp.asarray(anneal, jnp.float32).reshape((1,)),
    x.astype(jnp.bfloat16), u1, u2, *g_par, *d_par)

  # rec_loss, aug_loss, mi_rec, mi_aug, recon, kl, reg_aug, drop, add
  return tuple(out[0, i] for i in range(9))


# ----------------------------------------------------------------------------
# Deterministic parameter setup + run
# ----------------------------------------------------------------------------

def make_params(key, n_item, hidden, latent):
  ks = jax.random.split(key, 5)
  s = 0.05
  return {
      "w1":  s * jax.random.normal(ks[0], (n_item, hidden), jnp.float32),
      "b1":  jnp.zeros((1, hidden), jnp.float32),
      "wmu": s * jax.random.normal(ks[1], (hidden, latent), jnp.float32),
      "bmu": jnp.zeros((1, latent), jnp.float32),
      "wlv": s * jax.random.normal(ks[2], (hidden, latent), jnp.float32),
      "blv": jnp.zeros((1, latent), jnp.float32),
      "wd1": s * jax.random.normal(ks[3], (latent, hidden), jnp.float32),
      "bd1": jnp.zeros((1, hidden), jnp.float32),
      "wd2": s * jax.random.normal(ks[4], (hidden, n_item), jnp.float32),
      "bd2": jnp.zeros((1, n_item), jnp.float32),
  }


if __name__ == "__main__":
  # Small but TPU-friendly shapes: B=16 (bf16 sublane packing), N multiple of 128
  # with two item tiles, hidden/latent deliberately non-128 to exercise padding.
  B, N_ITEM, HIDDEN, LATENT = 16, 512, 96, 48
  arg = Args()

  root = jax.random.PRNGKey(0)
  kx, kg, kd, ku = jax.random.split(root, 4)

  x = (jax.random.uniform(kx, (B, N_ITEM)) < 0.1).astype(jnp.float32)  # binary
  params_G = make_params(kg, N_ITEM, HIDDEN, LATENT)
  params_D = make_params(kd, N_ITEM, HIDDEN, LATENT)
  anneal = jnp.float32(0.2)

  outs = adv_forward(x, anneal, params_G, params_D, ku, arg)
  outs = jax.block_until_ready(outs)
  assert all(bool(jnp.isfinite(o)) for o in outs)

  print("KERNEL_OK")
</pallas_src>

<mosaic_0001>
module attributes {stable_mosaic.version = 11 : i64} {
  func.func @adv_fused_kernel(%arg0: i32, %arg1: i32, %arg2: memref<1xf32, #tpu.memory_space<smem>>, %arg3: memref<16x256xbf16, #tpu.memory_space<vmem>>, %arg4: memref<16x256xf32, #tpu.memory_space<vmem>>, %arg5: memref<16x256xf32, #tpu.memory_space<vmem>>, %arg6: memref<256x128xbf16, #tpu.memory_space<vmem>>, %arg7: memref<1x128xf32, #tpu.memory_space<vmem>>, %arg8: memref<128x128xbf16, #tpu.memory_space<vmem>>, %arg9: memref<1x128xf32, #tpu.memory_space<vmem>>, %arg10: memref<128x128xbf16, #tpu.memory_space<vmem>>, %arg11: memref<1x128xf32, #tpu.memory_space<vmem>>, %arg12: memref<128x256xbf16, #tpu.memory_space<vmem>>, %arg13: memref<1x256xf32, #tpu.memory_space<vmem>>, %arg14: memref<256x128xbf16, #tpu.memory_space<vmem>>, %arg15: memref<1x128xf32, #tpu.memory_space<vmem>>, %arg16: memref<128x128xbf16, #tpu.memory_space<vmem>>, %arg17: memref<1x128xf32, #tpu.memory_space<vmem>>, %arg18: memref<128x128xbf16, #tpu.memory_space<vmem>>, %arg19: memref<1x128xf32, #tpu.memory_space<vmem>>, %arg20: memref<128x128xbf16, #tpu.memory_space<vmem>>, %arg21: memref<1x128xf32, #tpu.memory_space<vmem>>, %arg22: memref<128x256xbf16, #tpu.memory_space<vmem>>, %arg23: memref<1x256xf32, #tpu.memory_space<vmem>>, %arg24: memref<1x128xf32, #tpu.memory_space<vmem>>, %arg25: memref<16x1xf32, #tpu.memory_space<vmem>>, %arg26: memref<16x128xf32, #tpu.memory_space<vmem>>, %arg27: memref<16x128xf32, #tpu.memory_space<vmem>>, %arg28: memref<16x128xbf16, #tpu.memory_space<vmem>>, %arg29: memref<16x128xbf16, #tpu.memory_space<vmem>>, %arg30: memref<16x128xf32, #tpu.memory_space<vmem>>, %arg31: memref<16x128xf32, #tpu.memory_space<vmem>>, %arg32: memref<16x128xf32, #tpu.memory_space<vmem>>, %arg33: memref<16x128xf32, #tpu.memory_space<vmem>>, %arg34: memref<16x1xf32, #tpu.memory_space<vmem>>, %arg35: memref<16x1xf32, #tpu.memory_space<vmem>>, %arg36: memref<16x1xf32, #tpu.memory_space<vmem>>, %arg37: memref<16x1xf32, #tpu.memory_space<vmem>>, %arg38: memref<16x1xf32, #tpu.memory_space<vmem>>, %arg39: memref<16x1xf32, #tpu.memory_space<vmem>>, %arg40: memref<16x1xf32, #tpu.memory_space<vmem>>) attributes {dimension_semantics = [#tpu.dimension_semantics<arbitrary>, #tpu.dimension_semantics<arbitrary>], iteration_bounds = array<i64: 2, 2>, scalar_prefetch = 1 : i64, scratch_operands = 16 : i64, tpu.core_type = #tpu.core_type<tc>, window_params = [{transform_indices = @transform_0, window_bounds = array<i64: 16, 256>}, {transform_indices = @transform_1, window_bounds = array<i64: 16, 256>}, {transform_indices = @transform_2, window_bounds = array<i64: 16, 256>}, {transform_indices = @transform_3, window_bounds = array<i64: 256, 128>}, {pipeline_mode = #tpu.pipeline_mode<synchronous>, transform_indices = @transform_4, window_bounds = array<i64: 1, 128>}, {pipeline_mode = #tpu.pipeline_mode<synchronous>, transform_indices = @transform_5, window_bounds = array<i64: 128, 128>}, {pipeline_mode = #tpu.pipeline_mode<synchronous>, transform_indices = @transform_6, window_bounds = array<i64: 1, 128>}, {pipeline_mode = #tpu.pipeline_mode<synchronous>, transform_indices = @transform_7, window_bounds = array<i64: 128, 128>}, {pipeline_mode = #tpu.pipeline_mode<synchronous>, transform_indices = @transform_8, window_bounds = array<i64: 1, 128>}, {transform_indices = @transform_9, window_bounds = array<i64: 128, 256>}, {transform_indices = @transform_10, window_bounds = array<i64: 1, 256>}, {transform_indices = @transform_11, window_bounds = array<i64: 256, 128>}, {pipeline_mode = #tpu.pipeline_mode<synchronous>, transform_indices = @transform_12, window_bounds = array<i64: 1, 128>}, {pipeline_mode = #tpu.pipeline_mode<synchronous>, transform_indices = @transform_13, window_bounds = array<i64: 128, 128>}, {pipeline_mode = #tpu.pipeline_mode<synchronous>, transform_indices = @transform_14, window_bounds = array<i64: 1, 128>}, {pipeline_mode = #tpu.pipeline_mode<synchronous>, transform_indices = @transform_15, window_bounds = array<i64: 128, 128>}, {pipeline_mode = #tpu.pipeline_mode<synchronous>, transform_indices = @transform_16, window_bounds = array<i64: 1, 128>}, {pipeline_mode = #tpu.pipeline_mode<synchronous>, transform_indices = @transform_17, window_bounds = array<i64: 128, 128>}, {pipeline_mode = #tpu.pipeline_mode<synchronous>, transform_indices = @transform_18, window_bounds = array<i64: 1, 128>}, {transform_indices = @transform_19, window_bounds = array<i64: 128, 256>}, {transform_indices = @transform_20, window_bounds = array<i64: 1, 256>}, {pipeline_mode = #tpu.pipeline_mode<synchronous>, transform_indices = @transform_21, window_bounds = array<i64: 1, 128>}]} {
    %c0 = arith.constant 0 : index
    %c0_0 = arith.constant 0 : index
    %0 = vector.load %arg3[%c0, %c0_0] : memref<16x256xbf16, #tpu.memory_space<vmem>>, vector<16x256xbf16>
    %1 = arith.extf %0 : vector<16x256xbf16> to vector<16x256xf32>
    %c0_i32 = arith.constant 0 : i32
    %2 = arith.cmpi eq, %arg0, %c0_i32 : i32
    %c0_i32_1 = arith.constant 0 : i32
    %3 = arith.cmpi eq, %arg1, %c0_i32_1 : i32
    %4 = arith.andi %2, %3 : i1
    %5 = arith.extui %4 : i1 to i32
    %c0_i32_2 = arith.constant 0 : i32
    %6 = arith.cmpi ne, %5, %c0_i32_2 : i32
    scf.if %6 {
      %cst = arith.constant 0.000000e+00 : f32
      %23 = vector.broadcast %cst : f32 to vector<16x1xf32>
      %c0_12 = arith.constant 0 : index
      %c0_13 = arith.constant 0 : index
      %24 = vector.load %arg25[%c0_12, %c0_13] : memref<16x1xf32, #tpu.memory_space<vmem>>, vector<16x1xf32>
      tpu.vector_store %arg25[%c0_12, %c0_13], %23 {strides = array<i32>} : memref<16x1xf32, #tpu.memory_space<vmem>>, vector<16x1xf32>,
      %cst_14 = arith.constant 0.000000e+00 : f32
      %25 = vector.broadcast %cst_14 : f32 to vector<16x128xf32>
      %c0_15 = arith.constant 0 : index
      %c0_16 = arith.constant 0 : index
      %26 = vector.load %arg26[%c0_15, %c0_16] : memref<16x128xf32, #tpu.memory_space<vmem>>, vector<16x128xf32>
      tpu.vector_store %arg26[%c0_15, %c0_16], %25 {strides = array<i32>} : memref<16x128xf32, #tpu.memory_space<vmem>>, vector<16x128xf32>,
      %cst_17 = arith.constant 0.000000e+00 : f32
      %27 = vector.broadcast %cst_17 : f32 to vector<16x128xf32>
      %c0_18 = arith.constant 0 : index
      %c0_19 = arith.constant 0 : index
      %28 = vector.load %arg27[%c0_18, %c0_19] : memref<16x128xf32, #tpu.memory_space<vmem>>, vector<16x128xf32>
      tpu.vector_store %arg27[%c0_18, %c0_19], %27 {strides = array<i32>} : memref<16x128xf32, #tpu.memory_space<vmem>>, vector<16x128xf32>,
      %cst_20 = arith.constant 0.000000e+00 : f32
      %29 = vector.broadcast %cst_20 : f32 to vector<16x128xf32>
      %c0_21 = arith.constant 0 : index
      %c0_22 = arith.constant 0 : index
      %30 = vector.load %arg32[%c0_21, %c0_22] : memref<16x128xf32, #tpu.memory_space<vmem>>, vector<16x128xf32>
      tpu.vector_store %arg32[%c0_21, %c0_22], %29 {strides = array<i32>} : memref<16x128xf32, #tpu.memory_space<vmem>>, vector<16x128xf32>,
      %cst_23 = arith.constant 0.000000e+00 : f32
      %31 = vector.broadcast %cst_23 : f32 to vector<16x128xf32>
      %c0_24 = arith.constant 0 : index
      %c0_25 = arith.constant 0 : index
      %32 = vector.load %arg33[%c0_24, %c0_25] : memref<16x128xf32, #tpu.memory_space<vmem>>, vector<16x128xf32>
      tpu.vector_store %arg33[%c0_24, %c0_25], %31 {strides = array<i32>} : memref<16x128xf32, #tpu.memory_space<vmem>>, vector<16x128xf32>,
      %cst_26 = arith.constant 0.000000e+00 : f32
      %33 = vector.broadcast %cst_26 : f32 to vector<16x1xf32>
      %c0_27 = arith.constant 0 : index
      %c0_28 = arith.constant 0 : index
      %34 = vector.load %arg34[%c0_27, %c0_28] : memref<16x1xf32, #tpu.memory_space<vmem>>, vector<16x1xf32>
      tpu.vector_store %arg34[%c0_27, %c0_28], %33 {strides = array<i32>} : memref<16x1xf32, #tpu.memory_space<vmem>>, vector<16x1xf32>,
      %cst_29 = arith.constant 0.000000e+00 : f32
      %35 = vector.broadcast %cst_29 : f32 to vector<16x1xf32>
      %c0_30 = arith.constant 0 : index
      %c0_31 = arith.constant 0 : index
      %36 = vector.load %arg35[%c0_30, %c0_31] : memref<16x1xf32, #tpu.memory_space<vmem>>, vector<16x1xf32>
      tpu.vector_store %arg35[%c0_30, %c0_31], %35 {strides = array<i32>} : memref<16x1xf32, #tpu.memory_space<vmem>>, vector<16x1xf32>,
      %cst_32 = arith.constant 0.000000e+00 : f32
      %37 = vector.broadcast %cst_32 : f32 to vector<16x1xf32>
      %c0_33 = arith.constant 0 : index
      %c0_34 = arith.constant 0 : index
      %38 = vector.load %arg36[%c0_33, %c0_34] : memref<16x1xf32, #tpu.memory_space<vmem>>, vector<16x1xf32>
      tpu.vector_store %arg36[%c0_33, %c0_34], %37 {strides = array<i32>} : memref<16x1xf32, #tpu.memory_space<vmem>>, vector<16x1xf32>,
      %cst_35 = arith.constant 0.000000e+00 : f32
      %39 = vector.broadcast %cst_35 : f32 to vector<16x1xf32>
      %c0_36 = arith.constant 0 : index
      %c0_37 = arith.constant 0 : index
      %40 = vector.load %arg37[%c0_36, %c0_37] : memref<16x1xf32, #tpu.memory_space<vmem>>, vector<16x1xf32>
      tpu.vector_store %arg37[%c0_36, %c0_37], %39 {strides = array<i32>} : memref<16x1xf32, #tpu.memory_space<vmem>>, vector<16x1xf32>,
      %cst_38 = arith.constant 0.000000e+00 : f32
      %41 = vector.broadcast %cst_38 : f32 to vector<16x1xf32>
      %c0_39 = arith.constant 0 : index
      %c0_40 = arith.constant 0 : index
      %42 = vector.load %arg39[%c0_39, %c0_40] : memref<16x1xf32, #tpu.memory_space<vmem>>, vector<16x1xf32>
      tpu.vector_store %arg39[%c0_39, %c0_40], %41 {strides = array<i32>} : memref<16x1xf32, #tpu.memory_space<vmem>>, vector<16x1xf32>,
      %cst_41 = arith.constant 0.000000e+00 : f32
      %43 = vector.broadcast %cst_41 : f32 to vector<16x1xf32>
      %c0_42 = arith.constant 0 : index
      %c0_43 = arith.constant 0 : index
      %44 = vector.load %arg40[%c0_42, %c0_43] : memref<16x1xf32, #tpu.memory_space<vmem>>, vector<16x1xf32>
      tpu.vector_store %arg40[%c0_42, %c0_43], %43 {strides = array<i32>} : memref<16x1xf32, #tpu.memory_space<vmem>>, vector<16x1xf32>,
      %cst_44 = arith.constant 0xFF800000 : f32
      %45 = vector.broadcast %cst_44 : f32 to vector<16x1xf32>
      %c0_45 = arith.constant 0 : index
      %c0_46 = arith.constant 0 : index
      %46 = vector.load %arg38[%c0_45, %c0_46] : memref<16x1xf32, #tpu.memory_space<vmem>>, vector<16x1xf32>
      tpu.vector_store %arg38[%c0_45, %c0_46], %45 {strides = array<i32>} : memref<16x1xf32, #tpu.memory_space<vmem>>, vector<16x1xf32>,
    } else {
    }
    %c0_i32_3 = arith.constant 0 : i32
    %7 = arith.cmpi eq, %arg0, %c0_i32_3 : i32
    %8 = arith.extui %7 : i1 to i32
    %c0_i32_4 = arith.constant 0 : i32
    %9 = arith.cmpi ne, %8, %c0_i32_4 : i32
    scf.if %9 {
      %c0_12 = arith.constant 0 : index
      %c0_13 = arith.constant 0 : index
      %23 = vector.load %arg25[%c0_12, %c0_13] : memref<16x1xf32, #tpu.memory_space<vmem>>, vector<16x1xf32>
      %cst = arith.constant dense<0.000000e+00> : vector<16xf32>
      %24 = vector.multi_reduction <add>, %1, %cst [1] : vector<16x256xf32> to vector<16xf32>
      %25 = vector.shape_cast %24 : vector<16xf32> to vector<16x1xf32>
      %26 = arith.addf %23, %25 : vector<16x1xf32>
      %c0_14 = arith.constant 0 : index
      %c0_15 = arith.constant 0 : index
      %27 = vector.load %arg25[%c0_14, %c0_15] : memref<16x1xf32, #tpu.memory_space<vmem>>, vector<16x1xf32>
      tpu.vector_store %arg25[%c0_14, %c0_15], %26 {strides = array<i32>} : memref<16x1xf32, #tpu.memory_space<vmem>>, vector<16x1xf32>,
      %c0_16 = arith.constant 0 : index
      %c0_17 = arith.constant 0 : index
      %28 = vector.load %arg26[%c0_16, %c0_17] : memref<16x128xf32, #tpu.memory_space<vmem>>, vector<16x128xf32>
      %c0_18 = arith.constant 0 : index
      %c0_19 = arith.constant 0 : index
      %29 = vector.load %arg6[%c0_18, %c0_19] : memref<256x128xbf16, #tpu.memory_space<vmem>>, vector<256x128xbf16>
      %cst_20 = arith.constant dense<0.000000e+00> : vector<16x128xf32>
      %30 = tpu.matmul %0, %29, %cst_20 {dimension_numbers = #tpu.dot_dimension_numbers<[1], [0], [0], [1], [0, 0, 1, 1], [], []>} : vector<16x256xbf16>, vector<256x128xbf16>, vector<16x128xf32> -> vector<16x128xf32>
      %31 = arith.addf %28, %30 : vector<16x128xf32>
      %c0_21 = arith.constant 0 : index
      %c0_22 = arith.constant 0 : index
      %32 = vector.load %arg26[%c0_21, %c0_22] : memref<16x128xf32, #tpu.memory_space<vmem>>, vector<16x128xf32>
      tpu.vector_store %arg26[%c0_21, %c0_22], %31 {strides = array<i32>} : memref<16x128xf32, #tpu.memory_space<vmem>>, vector<16x128xf32>,
      %c0_23 = arith.constant 0 : index
      %c0_24 = arith.constant 0 : index
      %33 = vector.load %arg27[%c0_23, %c0_24] : memref<16x128xf32, #tpu.memory_space<vmem>>, vector<16x128xf32>
      %c0_25 = arith.constant 0 : index
      %c0_26 = arith.constant 0 : index
      %34 = vector.load %arg14[%c0_25, %c0_26] : memref<256x128xbf16, #tpu.memory_space<vmem>>, vector<256x128xbf16>
      %cst_27 = arith.constant dense<0.000000e+00> : vector<16x128xf32>
      %35 = tpu.matmul %0, %34, %cst_27 {dimension_numbers = #tpu.dot_dimension_numbers<[1], [0], [0], [1], [0, 0, 1, 1], [], []>} : vector<16x256xbf16>, vector<256x128xbf16>, vector<16x128xf32> -> vector<16x128xf32>
      %36 = arith.addf %33, %35 : vector<16x128xf32>
      %c0_28 = arith.constant 0 : index
      %c0_29 = arith.constant 0 : index
      %37 = vector.load %arg27[%c0_28, %c0_29] : memref<16x128xf32, #tpu.memory_space<vmem>>, vector<16x128xf32>
      tpu.vector_store %arg27[%c0_28, %c0_29], %36 {strides = array<i32>} : memref<16x128xf32, #tpu.memory_space<vmem>>, vector<16x128xf32>,
    } else {
    }
    %c1_i32 = arith.constant 1 : i32
    %10 = arith.cmpi eq, %arg0, %c1_i32 : i32
    %c0_i32_5 = arith.constant 0 : i32
    %11 = arith.cmpi eq, %arg1, %c0_i32_5 : i32
    %12 = arith.andi %10, %11 : i1
    %13 = arith.extui %12 : i1 to i32
    %c0_i32_6 = arith.constant 0 : i32
    %14 = arith.cmpi ne, %13, %c0_i32_6 : i32
    scf.if %14 {
      %c0_12 = arith.constant 0 : index
      %c0_13 = arith.constant 0 : index
      %23 = vector.load %arg25[%c0_12, %c0_13] : memref<16x1xf32, #tpu.memory_space<vmem>>, vector<16x1xf32>
      %cst = arith.constant 9.99999996E-13 : f32
      %24 = vector.broadcast %cst : f32 to vector<16x1xf32>
      %25 = arith.addf %23, %24 : vector<16x1xf32>
      %26 = math.rsqrt %25 : vector<16x1xf32>
      %c0_14 = arith.constant 0 : index
      %c0_15 = arith.constant 0 : index
      %27 = vector.load %arg26[%c0_14, %c0_15] : memref<16x128xf32, #tpu.memory_space<vmem>>, vector<16x128xf32>
      %28 = vector.broadcast %26 : vector<16x1xf32> to vector<16x128xf32>
      %29 = arith.mulf %28, %27 : vector<16x128xf32>
      %c0_16 = arith.constant 0 : index
      %c0_17 = arith.constant 0 : index
      %30 = vector.load %arg7[%c0_16, %c0_17] : memref<1x128xf32, #tpu.memory_space<vmem>>, vector<1x128xf32>
      %31 = vector.broadcast %30 : vector<1x128xf32> to vector<16x128xf32>
      %32 = arith.addf %29, %31 : vector<16x128xf32>
      %33 = math.tanh %32 : vector<16x128xf32>
      %34 = arith.truncf %33 : vector<16x128xf32> to vector<16x128xbf16>
      %c0_18 = arith.constant 0 : index
      %c0_19 = arith.constant 0 : index
      %35 = vector.load %arg8[%c0_18, %c0_19] : memref<128x128xbf16, #tpu.memory_space<vmem>>, vector<128x128xbf16>
      %cst_20 = arith.constant dense<0.000000e+00> : vector<16x128xf32>
      %36 = tpu.matmul %34, %35, %cst_20 {dimension_numbers = #tpu.dot_dimension_numbers<[1], [0], [0], [1], [0, 0, 1, 1], [], []>} : vector<16x128xbf16>, vector<128x128xbf16>, vector<16x128xf32> -> vector<16x128xf32>
      %c0_21 = arith.constant 0 : index
      %c0_22 = arith.constant 0 : index
      %37 = vector.load %arg9[%c0_21, %c0_22] : memref<1x128xf32, #tpu.memory_space<vmem>>, vector<1x128xf32>
      %38 = vector.broadcast %37 : vector<1x128xf32> to vector<16x128xf32>
      %39 = arith.addf %36, %38 : vector<16x128xf32>
      %40 = arith.truncf %39 : vector<16x128xf32> to vector<16x128xbf16>
      %c0_23 = arith.constant 0 : index
      %c0_24 = arith.constant 0 : index
      %41 = vector.load %arg10[%c0_23, %c0_24] : memref<128x128xbf16, #tpu.memory_space<vmem>>, vector<128x128xbf16>
      %cst_25 = arith.constant dense<0.000000e+00> : vector<16x128xf32>
      %42 = tpu.matmul %40, %41, %cst_25 {dimension_numbers = #tpu.dot_dimension_numbers<[1], [0], [0], [1], [0, 0, 1, 1], [], []>} : vector<16x128xbf16>, vector<128x128xbf16>, vector<16x128xf32> -> vector<16x128xf32>
      %c0_26 = arith.constant 0 : index
      %c0_27 = arith.constant 0 : index
      %43 = vector.load %arg11[%c0_26, %c0_27] : memref<1x128xf32, #tpu.memory_space<vmem>>, vector<1x128xf32>
      %44 = vector.broadcast %43 : vector<1x128xf32> to vector<16x128xf32>
      %45 = arith.addf %42, %44 : vector<16x128xf32>
      %46 = math.tanh %45 : vector<16x128xf32>
      %47 = arith.truncf %46 : vector<16x128xf32> to vector<16x128xbf16>
      %c0_28 = arith.constant 0 : index
      %c0_29 = arith.constant 0 : index
      %48 = vector.load %arg28[%c0_28, %c0_29] : memref<16x128xbf16, #tpu.memory_space<vmem>>, vector<16x128xbf16>
      tpu.vector_store %arg28[%c0_28, %c0_29], %47 {strides = array<i32>} : memref<16x128xbf16, #tpu.memory_space<vmem>>, vector<16x128xbf16>,
      %c0_30 = arith.constant 0 : index
      %c0_31 = arith.constant 0 : index
      %49 = vector.load %arg27[%c0_30, %c0_31] : memref<16x128xf32, #tpu.memory_space<vmem>>, vector<16x128xf32>
      %50 = vector.broadcast %26 : vector<16x1xf32> to vector<16x128xf32>
      %51 = arith.mulf %50, %49 : vector<16x128xf32>
      %c0_32 = arith.constant 0 : index
      %c0_33 = arith.constant 0 : index
      %52 = vector.load %arg15[%c0_32, %c0_33] : memref<1x128xf32, #tpu.memory_space<vmem>>, vector<1x128xf32>
      %53 = vector.broadcast %52 : vector<1x128xf32> to vector<16x128xf32>
      %54 = arith.addf %51, %53 : vector<16x128xf32>
      %55 = math.tanh %54 : vector<16x128xf32>
      %56 = arith.truncf %55 : vector<16x128xf32> to vector<16x128xbf16>
      %c0_34 = arith.constant 0 : index
      %c0_35 = arith.constant 0 : index
      %57 = vector.load %arg16[%c0_34, %c0_35] : memref<128x128xbf16, #tpu.memory_space<vmem>>, vector<128x128xbf16>
      %cst_36 = arith.constant dense<0.000000e+00> : vector<16x128xf32>
      %58 = tpu.matmul %56, %57, %cst_36 {dimension_numbers = #tpu.dot_dimension_numbers<[1], [0], [0], [1], [0, 0, 1, 1], [], []>} : vector<16x128xbf16>, vector<128x128xbf16>, vector<16x128xf32> -> vector<16x128xf32>
      %c0_37 = arith.constant 0 : index
      %c0_38 = arith.constant 0 : index
      %59 = vector.load %arg17[%c0_37, %c0_38] : memref<1x128xf32, #tpu.memory_space<vmem>>, vector<1x128xf32>
      %60 = vector.broadcast %59 : vector<1x128xf32> to vector<16x128xf32>
      %61 = arith.addf %58, %60 : vector<16x128xf32>
      %c0_39 = arith.constant 0 : index
      %c0_40 = arith.constant 0 : index
      %62 = vector.load %arg30[%c0_39, %c0_40] : memref<16x128xf32, #tpu.memory_space<vmem>>, vector<16x128xf32>
      tpu.vector_store %arg30[%c0_39, %c0_40], %61 {strides = array<i32>} : memref<16x128xf32, #tpu.memory_space<vmem>>, vector<16x128xf32>,
      %c0_41 = arith.constant 0 : index
      %c0_42 = arith.constant 0 : index
      %63 = vector.load %arg18[%c0_41, %c0_42] : memref<128x128xbf16, #tpu.memory_space<vmem>>, vector<128x128xbf16>
      %cst_43 = arith.constant dense<0.000000e+00> : vector<16x128xf32>
      %64 = tpu.matmul %56, %63, %cst_43 {dimension_numbers = #tpu.dot_dimension_numbers<[1], [0], [0], [1], [0, 0, 1, 1], [], []>} : vector<16x128xbf16>, vector<128x128xbf16>, vector<16x128xf32> -> vector<16x128xf32>
      %c0_44 = arith.constant 0 : index
      %c0_45 = arith.constant 0 : index
      %65 = vector.load %arg19[%c0_44, %c0_45] : memref<1x128xf32, #tpu.memory_space<vmem>>, vector<1x128xf32>
      %66 = vector.broadcast %65 : vector<1x128xf32> to vector<16x128xf32>
      %67 = arith.addf %64, %66 : vector<16x128xf32>
      %c0_46 = arith.constant 0 : index
      %c0_47 = arith.constant 0 : index
      %68 = vector.load %arg31[%c0_46, %c0_47] : memref<16x128xf32, #tpu.memory_space<vmem>>, vector<16x128xf32>
      tpu.vector_store %arg31[%c0_46, %c0_47], %67 {strides = array<i32>} : memref<16x128xf32, #tpu.memory_space<vmem>>, vector<16x128xf32>,
      %69 = arith.truncf %61 : vector<16x128xf32> to vector<16x128xbf16>
      %c0_48 = arith.constant 0 : index
      %c0_49 = arith.constant 0 : index
      %70 = vector.load %arg20[%c0_48, %c0_49] : memref<128x128xbf16, #tpu.memory_space<vmem>>, vector<128x128xbf16>
      %cst_50 = arith.constant dense<0.000000e+00> : vector<16x128xf32>
      %71 = tpu.matmul %69, %70, %cst_50 {dimension_numbers = #tpu.dot_dimension_numbers<[1], [0], [0], [1], [0, 0, 1, 1], [], []>} : vector<16x128xbf16>, vector<128x128xbf16>, vector<16x128xf32> -> vector<16x128xf32>
      %c0_51 = arith.constant 0 : index
      %c0_52 = arith.constant 0 : index
      %72 = vector.load %arg21[%c0_51, %c0_52] : memref<1x128xf32, #tpu.memory_space<vmem>>, vector<1x128xf32>
      %73 = vector.broadcast %72 : vector<1x128xf32> to vector<16x128xf32>
      %74 = arith.addf %71, %73 : vector<16x128xf32>
      %75 = math.tanh %74 : vector<16x128xf32>
      %76 = arith.truncf %75 : vector<16x128xf32> to vector<16x128xbf16>
      %c0_53 = arith.constant 0 : index
      %c0_54 = arith.constant 0 : index
      %77 = vector.load %arg29[%c0_53, %c0_54] : memref<16x128xbf16, #tpu.memory_space<vmem>>, vector<16x128xbf16>
      tpu.vector_store %arg29[%c0_53, %c0_54], %76 {strides = array<i32>} : memref<16x128xbf16, #tpu.memory_space<vmem>>, vector<16x128xbf16>,
    } else {
    }
    %c1_i32_7 = arith.constant 1 : i32
    %15 = arith.cmpi eq, %arg0, %c1_i32_7 : i32
    %16 = arith.extui %15 : i1 to i32
    %c0_i32_8 = arith.constant 0 : i32
    %17 = arith.cmpi ne, %16, %c0_i32_8 : i32
    scf.if %17 {
      %cst = arith.constant 5.000000e-01 : f32
      %23 = vector.broadcast %cst : f32 to vector<16x256xf32>
      %24 = arith.cmpf ogt, %1, %23 : vector<16x256xf32>
      %c0_12 = arith.constant 0 : index
      %c0_13 = arith.constant 0 : index
      %25 = vector.load %arg28[%c0_12, %c0_13] : memref<16x128xbf16, #tpu.memory_space<vmem>>, vector<16x128xbf16>
      %c0_14 = arith.constant 0 : index
      %c0_15 = arith.constant 0 : index
      %26 = vector.load %arg12[%c0_14, %c0_15] : memref<128x256xbf16, #tpu.memory_space<vmem>>, vector<128x256xbf16>
      %cst_16 = arith.constant dense<0.000000e+00> : vector<16x256xf32>
      %27 = tpu.matmul %25, %26, %cst_16 {dimension_numbers = #tpu.dot_dimension_numbers<[1], [0], [0], [1], [0, 0, 1, 1], [], []>} : vector<16x128xbf16>, vector<128x256xbf16>, vector<16x256xf32> -> vector<16x256xf32>
      %c0_17 = arith.constant 0 : index
      %c0_18 = arith.constant 0 : index
      %28 = vector.load %arg13[%c0_17, %c0_18] : memref<1x256xf32, #tpu.memory_space<vmem>>, vector<1x256xf32>
      %29 = vector.broadcast %28 : vector<1x256xf32> to vector<16x256xf32>
      %30 = arith.addf %27, %29 : vector<16x256xf32>
      %c0_19 = arith.constant 0 : index
      %c0_20 = arith.constant 0 : index
      %31 = vector.load %arg4[%c0_19, %c0_20] : memref<16x256xf32, #tpu.memory_space<vmem>>, vector<16x256xf32>
      %cst_21 = arith.constant 9.998000e-01 : f32
      %32 = vector.broadcast %cst_21 : f32 to vector<16x256xf32>
      %33 = arith.mulf %32, %31 : vector<16x256xf32>
      %cst_22 = arith.constant 0.999899983 : f32
      %34 = vector.broadcast %cst_22 : f32 to vector<16x256xf32>
      %35 = arith.subf %34, %33 : vector<16x256xf32>
      %cst_23 = arith.constant 1.000000e+00 : f32
      %36 = vector.broadcast %cst_23 : f32 to vector<16x256xf32>
      %37 = arith.subf %36, %35 : vector<16x256xf32>
      %38 = arith.divf %35, %37 : vector<16x256xf32>
      %39 = math.log %38 : vector<16x256xf32>
      %40 = arith.addf %39, %30 : vector<16x256xf32>
      %cst_24 = arith.constant 1.000000e+00 : f32
      %41 = vector.broadcast %cst_24 : f32 to vector<16x256xf32>
      %42 = arith.mulf %40, %41 : vector<16x256xf32>
      %43 = arith.negf %42 : vector<16x256xf32>
      %44 = math.exp %43 : vector<16x256xf32>
      %cst_25 = arith.constant 1.000000e+00 : f32
      %45 = vector.broadcast %cst_25 : f32 to vector<16x256xf32>
      %46 = arith.addf %45, %44 : vector<16x256xf32>
      %47 = arith.divf %45, %46 : vector<16x256xf32>
      %c0_26 = arith.constant 0 : index
      %c0_27 = arith.constant 0 : index
      %48 = vector.load %arg5[%c0_26, %c0_27] : memref<16x256xf32, #tpu.memory_space<vmem>>, vector<16x256xf32>
      %cst_28 = arith.constant 9.998000e-01 : f32
      %49 = vector.broadcast %cst_28 : f32 to vector<16x256xf32>
      %50 = arith.mulf %49, %48 : vector<16x256xf32>
      %cst_29 = arith.constant 0.999899983 : f32
      %51 = vector.broadcast %cst_29 : f32 to vector<16x256xf32>
      %52 = arith.subf %51, %50 : vector<16x256xf32>
      %cst_30 = arith.constant 1.000000e+00 : f32
      %53 = vector.broadcast %cst_30 : f32 to vector<16x256xf32>
      %54 = arith.subf %53, %52 : vector<16x256xf32>
      %55 = arith.divf %52, %54 : vector<16x256xf32>
      %56 = math.log %55 : vector<16x256xf32>
      %57 = arith.addf %56, %30 : vector<16x256xf32>
      %cst_31 = arith.constant 1.000000e+00 : f32
      %58 = vector.broadcast %cst_31 : f32 to vector<16x256xf32>
      %59 = arith.mulf %57, %58 : vector<16x256xf32>
      %60 = arith.negf %59 : vector<16x256xf32>
      %61 = math.exp %60 : vector<16x256xf32>
      %cst_32 = arith.constant 1.000000e+00 : f32
      %62 = vector.broadcast %cst_32 : f32 to vector<16x256xf32>
      %63 = arith.addf %62, %61 : vector<16x256xf32>
      %64 = arith.divf %62, %63 : vector<16x256xf32>
      %cst_33 = arith.constant 1.000000e+00 : f32
      %65 = vector.broadcast %cst_33 : f32 to vector<16x256xf32>
      %66 = arith.subf %65, %47 : vector<16x256xf32>
      %67 = arith.select %24, %47, %66 : vector<16x256xi1>, vector<16x256xf32>
      %cst_34 = arith.constant 1.000000e+00 : f32
      %68 = vector.broadcast %cst_34 : f32 to vector<16x256xf32>
      %69 = arith.subf %68, %64 : vector<16x256xf32>
      %70 = arith.select %24, %64, %69 : vector<16x256xi1>, vector<16x256xf32>
      %c0_35 = arith.constant 0 : index
      %c0_36 = arith.constant 0 : index
      %71 = vector.load %arg32[%c0_35, %c0_36] : memref<16x128xf32, #tpu.memory_space<vmem>>, vector<16x128xf32>
      %72 = arith.truncf %67 : vector<16x256xf32> to vector<16x256xbf16>
      %c0_37 = arith.constant 0 : index
      %c0_38 = arith.constant 0 : index
      %73 = vector.load %arg14[%c0_37, %c0_38] : memref<256x128xbf16, #tpu.memory_space<vmem>>, vector<256x128xbf16>
      %cst_39 = arith.constant dense<0.000000e+00> : vector<16x128xf32>
      %74 = tpu.matmul %72, %73, %cst_39 {dimension_numbers = #tpu.dot_dimension_numbers<[1], [0], [0], [1], [0, 0, 1, 1], [], []>} : vector<16x256xbf16>, vector<256x128xbf16>, vector<16x128xf32> -> vector<16x128xf32>
      %75 = arith.addf %71, %74 : vector<16x128xf32>
      %c0_40 = arith.constant 0 : index
      %c0_41 = arith.constant 0 : index
      %76 = vector.load %arg32[%c0_40, %c0_41] : memref<16x128xf32, #tpu.memory_space<vmem>>, vector<16x128xf32>
      tpu.vector_store %arg32[%c0_40, %c0_41], %75 {strides = array<i32>} : memref<16x128xf32, #tpu.memory_space<vmem>>, vector<16x128xf32>,
      %c0_42 = arith.constant 0 : index
      %c0_43 = arith.constant 0 : index
      %77 = vector.load %arg33[%c0_42, %c0_43] : memref<16x128xf32, #tpu.memory_space<vmem>>, vector<16x128xf32>
      %78 = arith.truncf %70 : vector<16x256xf32> to vector<16x256xbf16>
      %c0_44 = arith.constant 0 : index
      %c0_45 = arith.constant 0 : index
      %79 = vector.load %arg14[%c0_44, %c0_45] : memref<256x128xbf16, #tpu.memory_space<vmem>>, vector<256x128xbf16>
      %cst_46 = arith.constant dense<0.000000e+00> : vector<16x128xf32>
      %80 = tpu.matmul %78, %79, %cst_46 {dimension_numbers = #tpu.dot_dimension_numbers<[1], [0], [0], [1], [0, 0, 1, 1], [], []>} : vector<16x256xbf16>, vector<256x128xbf16>, vector<16x128xf32> -> vector<16x128xf32>
      %81 = arith.addf %77, %80 : vector<16x128xf32>
      %c0_47 = arith.constant 0 : index
      %c0_48 = arith.constant 0 : index
      %82 = vector.load %arg33[%c0_47, %c0_48] : memref<16x128xf32, #tpu.memory_space<vmem>>, vector<16x128xf32>
      tpu.vector_store %arg33[%c0_47, %c0_48], %81 {strides = array<i32>} : memref<16x128xf32, #tpu.memory_space<vmem>>, vector<16x128xf32>,
      %c0_49 = arith.constant 0 : index
      %c0_50 = arith.constant 0 : index
      %83 = vector.load %arg34[%c0_49, %c0_50] : memref<16x1xf32, #tpu.memory_space<vmem>>, vector<16x1xf32>
      %84 = arith.mulf %67, %67 : vector<16x256xf32>
      %cst_51 = arith.constant dense<0.000000e+00> : vector<16xf32>
      %85 = vector.multi_reduction <add>, %84, %cst_51 [1] : vector<16x256xf32> to vector<16xf32>
      %86 = vector.shape_cast %85 : vector<16xf32> to vector<16x1xf32>
      %87 = arith.addf %83, %86 : vector<16x1xf32>
      %c0_52 = arith.constant 0 : index
      %c0_53 = arith.constant 0 : index
      %88 = vector.load %arg34[%c0_52, %c0_53] : memref<16x1xf32, #tpu.memory_space<vmem>>, vector<16x1xf32>
      tpu.vector_store %arg34[%c0_52, %c0_53], %87 {strides = array<i32>} : memref<16x1xf32, #tpu.memory_space<vmem>>, vector<16x1xf32>,
      %c0_54 = arith.constant 0 : index
      %c0_55 = arith.constant 0 : index
      %89 = vector.load %arg35[%c0_54, %c0_55] : memref<16x1xf32, #tpu.memory_space<vmem>>, vector<16x1xf32>
      %90 = arith.mulf %70, %70 : vector<16x256xf32>
      %cst_56 = arith.constant dense<0.000000e+00> : vector<16xf32>
      %91 = vector.multi_reduction <add>, %90, %cst_56 [1] : vector<16x256xf32> to vector<16xf32>
      %92 = vector.shape_cast %91 : vector<16xf32> to vector<16x1xf32>
      %93 = arith.addf %89, %92 : vector<16x1xf32>
      %c0_57 = arith.constant 0 : index
      %c0_58 = arith.constant 0 : index
      %94 = vector.load %arg35[%c0_57, %c0_58] : memref<16x1xf32, #tpu.memory_space<vmem>>, vector<16x1xf32>
      tpu.vector_store %arg35[%c0_57, %c0_58], %93 {strides = array<i32>} : memref<16x1xf32, #tpu.memory_space<vmem>>, vector<16x1xf32>,
      %c0_59 = arith.constant 0 : index
      %c0_60 = arith.constant 0 : index
      %95 = vector.load %arg36[%c0_59, %c0_60] : memref<16x1xf32, #tpu.memory_space<vmem>>, vector<16x1xf32>
      %cst_61 = arith.constant 1.000000e+00 : f32
      %96 = vector.broadcast %cst_61 : f32 to vector<16x256xf32>
      %97 = arith.subf %96, %1 : vector<16x256xf32>
      %98 = arith.mulf %67, %97 : vector<16x256xf32>
      %cst_62 = arith.constant dense<0.000000e+00> : vector<16xf32>
      %99 = vector.multi_reduction <add>, %98, %cst_62 [1] : vector<16x256xf32> to vector<16xf32>
      %100 = vector.shape_cast %99 : vector<16xf32> to vector<16x1xf32>
      %101 = arith.addf %95, %100 : vector<16x1xf32>
      %c0_63 = arith.constant 0 : index
      %c0_64 = arith.constant 0 : index
      %102 = vector.load %arg36[%c0_63, %c0_64] : memref<16x1xf32, #tpu.memory_space<vmem>>, vector<16x1xf32>
      tpu.vector_store %arg36[%c0_63, %c0_64], %101 {strides = array<i32>} : memref<16x1xf32, #tpu.memory_space<vmem>>, vector<16x1xf32>,
      %c0_65 = arith.constant 0 : index
      %c0_66 = arith.constant 0 : index
      %103 = vector.load %arg37[%c0_65, %c0_66] : memref<16x1xf32, #tpu.memory_space<vmem>>, vector<16x1xf32>
      %cst_67 = arith.constant 1.000000e+00 : f32
      %104 = vector.broadcast %cst_67 : f32 to vector<16x256xf32>
      %105 = arith.subf %104, %67 : vector<16x256xf32>
      %106 = arith.mulf %105, %1 : vector<16x256xf32>
      %cst_68 = arith.constant dense<0.000000e+00> : vector<16xf32>
      %107 = vector.multi_reduction <add>, %106, %cst_68 [1] : vector<16x256xf32> to vector<16xf32>
      %108 = vector.shape_cast %107 : vector<16xf32> to vector<16x1xf32>
      %109 = arith.addf %103, %108 : vector<16x1xf32>
      %c0_69 = arith.constant 0 : index
      %c0_70 = arith.constant 0 : index
      %110 = vector.load %arg37[%c0_69, %c0_70] : memref<16x1xf32, #tpu.memory_space<vmem>>, vector<16x1xf32>
      tpu.vector_store %arg37[%c0_69, %c0_70], %109 {strides = array<i32>} : memref<16x1xf32, #tpu.memory_space<vmem>>, vector<16x1xf32>,
      %c0_71 = arith.constant 0 : index
      %c0_72 = arith.constant 0 : index
      %111 = vector.load %arg29[%c0_71, %c0_72] : memref<16x128xbf16, #tpu.memory_space<vmem>>, vector<16x128xbf16>
      %c0_73 = arith.constant 0 : index
      %c0_74 = arith.constant 0 : index
      %112 = vector.load %arg22[%c0_73, %c0_74] : memref<128x256xbf16, #tpu.memory_space<vmem>>, vector<128x256xbf16>
      %cst_75 = arith.constant dense<0.000000e+00> : vector<16x256xf32>
      %113 = tpu.matmul %111, %112, %cst_75 {dimension_numbers = #tpu.dot_dimension_numbers<[1], [0], [0], [1], [0, 0, 1, 1], [], []>} : vector<16x128xbf16>, vector<128x256xbf16>, vector<16x256xf32> -> vector<16x256xf32>
      %c0_76 = arith.constant 0 : index
      %c0_77 = arith.constant 0 : index
      %114 = vector.load %arg23[%c0_76, %c0_77] : memref<1x256xf32, #tpu.memory_space<vmem>>, vector<1x256xf32>
      %115 = vector.broadcast %114 : vector<1x256xf32> to vector<16x256xf32>
      %116 = arith.addf %113, %115 : vector<16x256xf32>
      %c0_78 = arith.constant 0 : index
      %c0_79 = arith.constant 0 : index
      %117 = vector.load %arg38[%c0_78, %c0_79] : memref<16x1xf32, #tpu.memory_space<vmem>>, vector<16x1xf32>
      %cst_80 = arith.constant dense<0xFF800000> : vector<16xf32>
      %118 = vector.multi_reduction <maximumf>, %116, %cst_80 [1] : vector<16x256xf32> to vector<16xf32>
      %119 = vector.shape_cast %118 : vector<16xf32> to vector<16x1xf32>
      %120 = arith.maximumf %117, %119 : vector<16x1xf32>
      %c0_81 = arith.constant 0 : index
      %c0_82 = arith.constant 0 : index
      %121 = vector.load %arg39[%c0_81, %c0_82] : memref<16x1xf32, #tpu.memory_space<vmem>>, vector<16x1xf32>
      %c0_83 = arith.constant 0 : index
      %c0_84 = arith.constant 0 : index
      %122 = vector.load %arg38[%c0_83, %c0_84] : memref<16x1xf32, #tpu.memory_space<vmem>>, vector<16x1xf32>
      %123 = arith.subf %122, %120 : vector<16x1xf32>
      %124 = math.exp %123 : vector<16x1xf32>
      %125 = arith.mulf %121, %124 : vector<16x1xf32>
      %126 = vector.broadcast %120 : vector<16x1xf32> to vector<16x256xf32>
      %127 = arith.subf %116, %126 : vector<16x256xf32>
      %128 = math.exp %127 : vector<16x256xf32>
      %cst_85 = arith.constant dense<0.000000e+00> : vector<16xf32>
      %129 = vector.multi_reduction <add>, %128, %cst_85 [1] : vector<16x256xf32> to vector<16xf32>
      %130 = vector.shape_cast %129 : vector<16xf32> to vector<16x1xf32>
      %131 = arith.addf %125, %130 : vector<16x1xf32>
      %c0_86 = arith.constant 0 : index
      %c0_87 = arith.constant 0 : index
      %132 = vector.load %arg39[%c0_86, %c0_87] : memref<16x1xf32, #tpu.memory_space<vmem>>, vector<16x1xf32>
      tpu.vector_store %arg39[%c0_86, %c0_87], %131 {strides = array<i32>} : memref<16x1xf32, #tpu.memory_space<vmem>>, vector<16x1xf32>,
      %c0_88 = arith.constant 0 : index
      %c0_89 = arith.constant 0 : index
      %133 = vector.load %arg38[%c0_88, %c0_89] : memref<16x1xf32, #tpu.memory_space<vmem>>, vector<16x1xf32>
      tpu.vector_store %arg38[%c0_88, %c0_89], %120 {strides = array<i32>} : memref<16x1xf32, #tpu.memory_space<vmem>>, vector<16x1xf32>,
      %c0_90 = arith.constant 0 : index
      %c0_91 = arith.constant 0 : index
      %134 = vector.load %arg40[%c0_90, %c0_91] : memref<16x1xf32, #tpu.memory_space<vmem>>, vector<16x1xf32>
      %135 = arith.mulf %116, %1 : vector<16x256xf32>
      %cst_92 = arith.constant dense<0.000000e+00> : vector<16xf32>
      %136 = vector.multi_reduction <add>, %135, %cst_92 [1] : vector<16x256xf32> to vector<16xf32>
      %137 = vector.shape_cast %136 : vector<16xf32> to vector<16x1xf32>
      %138 = arith.addf %134, %137 : vector<16x1xf32>
      %c0_93 = arith.constant 0 : index
      %c0_94 = arith.constant 0 : index
      %139 = vector.load %arg40[%c0_93, %c0_94] : memref<16x1xf32, #tpu.memory_space<vmem>>, vector<16x1xf32>
      tpu.vector_store %arg40[%c0_93, %c0_94], %138 {strides = array<i32>} : memref<16x1xf32, #tpu.memory_space<vmem>>, vector<16x1xf32>,
    } else {
    }
    %c1_i32_9 = arith.constant 1 : i32
    %18 = arith.cmpi eq, %arg0, %c1_i32_9 : i32
    %c1_i32_10 = arith.constant 1 : i32
    %19 = arith.cmpi eq, %arg1, %c1_i32_10 : i32
    %20 = arith.andi %18, %19 : i1
    %21 = arith.extui %20 : i1 to i32
    %c0_i32_11 = arith.constant 0 : i32
    %22 = arith.cmpi ne, %21, %c0_i32_11 : i32
    scf.if %22 {
      %c0_12 = arith.constant 0 : index
      %c0_13 = arith.constant 0 : index
      %23 = vector.load %arg15[%c0_12, %c0_13] : memref<1x128xf32, #tpu.memory_space<vmem>>, vector<1x128xf32>
      %c0_14 = arith.constant 0 : index
      %c0_15 = arith.constant 0 : index
      %24 = vector.load %arg34[%c0_14, %c0_15] : memref<16x1xf32, #tpu.memory_space<vmem>>, vector<16x1xf32>
      %cst = arith.constant 9.99999996E-13 : f32
      %25 = vector.broadcast %cst : f32 to vector<16x1xf32>
      %26 = arith.addf %24, %25 : vector<16x1xf32>
      %27 = math.rsqrt %26 : vector<16x1xf32>
      %c0_16 = arith.constant 0 : index
      %c0_17 = arith.constant 0 : index
      %28 = vector.load %arg32[%c0_16, %c0_17] : memref<16x128xf32, #tpu.memory_space<vmem>>, vector<16x128xf32>
      %29 = vector.broadcast %27 : vector<16x1xf32> to vector<16x128xf32>
      %30 = arith.mulf %29, %28 : vector<16x128xf32>
      %31 = vector.broadcast %23 : vector<1x128xf32> to vector<16x128xf32>
      %32 = arith.addf %30, %31 : vector<16x128xf32>
      %33 = math.tanh %32 : vector<16x128xf32>
      %34 = arith.truncf %33 : vector<16x128xf32> to vector<16x128xbf16>
      %c0_18 = arith.constant 0 : index
      %c0_19 = arith.constant 0 : index
      %35 = vector.load %arg16[%c0_18, %c0_19] : memref<128x128xbf16, #tpu.memory_space<vmem>>, vector<128x128xbf16>
      %cst_20 = arith.constant dense<0.000000e+00> : vector<16x128xf32>
      %36 = tpu.matmul %34, %35, %cst_20 {dimension_numbers = #tpu.dot_dimension_numbers<[1], [0], [0], [1], [0, 0, 1, 1], [], []>} : vector<16x128xbf16>, vector<128x128xbf16>, vector<16x128xf32> -> vector<16x128xf32>
      %c0_21 = arith.constant 0 : index
      %c0_22 = arith.constant 0 : index
      %37 = vector.load %arg17[%c0_21, %c0_22] : memref<1x128xf32, #tpu.memory_space<vmem>>, vector<1x128xf32>
      %38 = vector.broadcast %37 : vector<1x128xf32> to vector<16x128xf32>
      %39 = arith.addf %36, %38 : vector<16x128xf32>
      %c0_23 = arith.constant 0 : index
      %c0_24 = arith.constant 0 : index
      %40 = vector.load %arg35[%c0_23, %c0_24] : memref<16x1xf32, #tpu.memory_space<vmem>>, vector<16x1xf32>
      %cst_25 = arith.constant 9.99999996E-13 : f32
      %41 = vector.broadcast %cst_25 : f32 to vector<16x1xf32>
      %42 = arith.addf %40, %41 : vector<16x1xf32>
      %43 = math.rsqrt %42 : vector<16x1xf32>
      %c0_26 = arith.constant 0 : index
      %c0_27 = arith.constant 0 : index
      %44 = vector.load %arg33[%c0_26, %c0_27] : memref<16x128xf32, #tpu.memory_space<vmem>>, vector<16x128xf32>
      %45 = vector.broadcast %43 : vector<16x1xf32> to vector<16x128xf32>
      %46 = arith.mulf %45, %44 : vector<16x128xf32>
      %47 = vector.broadcast %23 : vector<1x128xf32> to vector<16x128xf32>
      %48 = arith.addf %46, %47 : vector<16x128xf32>
      %49 = math.tanh %48 : vector<16x128xf32>
      %50 = arith.truncf %49 : vector<16x128xf32> to vector<16x128xbf16>
      %c0_28 = arith.constant 0 : index
      %c0_29 = arith.constant 0 : index
      %51 = vector.load %arg16[%c0_28, %c0_29] : memref<128x128xbf16, #tpu.memory_space<vmem>>, vector<128x128xbf16>
      %cst_30 = arith.constant dense<0.000000e+00> : vector<16x128xf32>
      %52 = tpu.matmul %50, %51, %cst_30 {dimension_numbers = #tpu.dot_dimension_numbers<[1], [0], [0], [1], [0, 0, 1, 1], [], []>} : vector<16x128xbf16>, vector<128x128xbf16>, vector<16x128xf32> -> vector<16x128xf32>
      %c0_31 = arith.constant 0 : index
      %c0_32 = arith.constant 0 : index
      %53 = vector.load %arg17[%c0_31, %c0_32] : memref<1x128xf32, #tpu.memory_space<vmem>>, vector<1x128xf32>
      %54 = vector.broadcast %53 : vector<1x128xf32> to vector<16x128xf32>
      %55 = arith.addf %52, %54 : vector<16x128xf32>
      %c0_33 = arith.constant 0 : index
      %c0_34 = arith.constant 0 : index
      %56 = vector.load %arg30[%c0_33, %c0_34] : memref<16x128xf32, #tpu.memory_space<vmem>>, vector<16x128xf32>
      %c0_35 = arith.constant 0 : index
      %c0_36 = arith.constant 0 : index
      %57 = vector.load %arg31[%c0_35, %c0_36] : memref<16x128xf32, #tpu.memory_space<vmem>>, vector<16x128xf32>
      %58 = tpu.iota {dimensions = array<i32: 0>} : vector<16x16xi32>
      %59 = tpu.iota {dimensions = array<i32: 1>} : vector<16x16xi32>
      %60 = arith.cmpi ne, %58, %59 : vector<16x16xi32>
      %61 = arith.extui %60 : vector<16x16xi1> to vector<16x16xi32>
      %62 = arith.sitofp %61 : vector<16x16xi32> to vector<16x16xf32>
      %63 = arith.mulf %56, %56 : vector<16x128xf32>
      %cst_37 = arith.constant dense<0.000000e+00> : vector<16xf32>
      %64 = vector.multi_reduction <add>, %63, %cst_37 [1] : vector<16x128xf32> to vector<16xf32>
      %65 = vector.shape_cast %64 : vector<16xf32> to vector<16x1xf32>
      %cst_38 = arith.constant 9.99999996E-13 : f32
      %66 = vector.broadcast %cst_38 : f32 to vector<16x1xf32>
      %67 = arith.addf %65, %66 : vector<16x1xf32>
      %68 = math.rsqrt %67 : vector<16x1xf32>
      %69 = vector.broadcast %68 : vector<16x1xf32> to vector<16x128xf32>
      %70 = arith.mulf %56, %69 : vector<16x128xf32>
      %71 = arith.truncf %70 : vector<16x128xf32> to vector<16x128xbf16>
      %72 = arith.mulf %39, %39 : vector<16x128xf32>
      %cst_39 = arith.constant dense<0.000000e+00> : vector<16xf32>
      %73 = vector.multi_reduction <add>, %72, %cst_39 [1] : vector<16x128xf32> to vector<16xf32>
      %74 = vector.shape_cast %73 : vector<16xf32> to vector<16x1xf32>
      %cst_40 = arith.constant 9.99999996E-13 : f32
      %75 = vector.broadcast %cst_40 : f32 to vector<16x1xf32>
      %76 = arith.addf %74, %75 : vector<16x1xf32>
      %77 = math.rsqrt %76 : vector<16x1xf32>
      %78 = vector.broadcast %77 : vector<16x1xf32> to vector<16x128xf32>
      %79 = arith.mulf %39, %78 : vector<16x128xf32>
      %80 = arith.truncf %79 : vector<16x128xf32> to vector<16x128xbf16>
      %cst_41 = arith.constant dense<0.000000e+00> : vector<16x16xf32>
      %81 = tpu.matmul %71, %80, %cst_41 {dimension_numbers = #tpu.dot_dimension_numbers<[1], [1], [0], [0], [0, 0, 1, 0], [], []>} : vector<16x128xbf16>, vector<16x128xbf16>, vector<16x16xf32> -> vector<16x16xf32>
      %cst_42 = arith.constant 5.000000e+00 : f32
      %82 = vector.broadcast %cst_42 : f32 to vector<16x16xf32>
      %83 = arith.mulf %81, %82 : vector<16x16xf32>
      %84 = math.exp %83 : vector<16x16xf32>
      %85 = arith.extf %71 : vector<16x128xbf16> to vector<16x128xf32>
      %86 = arith.extf %80 : vector<16x128xbf16> to vector<16x128xf32>
      %87 = arith.mulf %85, %86 : vector<16x128xf32>
      %cst_43 = arith.constant dense<0.000000e+00> : vector<16xf32>
      %88 = vector.multi_reduction <add>, %87, %cst_43 [1] : vector<16x128xf32> to vector<16xf32>
      %89 = vector.shape_cast %88 : vector<16xf32> to vector<16x1xf32>
      %cst_44 = arith.constant 5.000000e+00 : f32
      %90 = vector.broadcast %cst_44 : f32 to vector<16x1xf32>
      %91 = arith.mulf %89, %90 : vector<16x1xf32>
      %92 = math.exp %91 : vector<16x1xf32>
      %93 = arith.mulf %84, %62 : vector<16x16xf32>
      %94 = math.log %92 : vector<16x1xf32>
      %95 = vector.shape_cast %94 : vector<16x1xf32> to vector<1x16x1xf32>
      %cst_45 = arith.constant dense<0.000000e+00> : vector<1xf32>
      %96 = vector.multi_reduction <add>, %95, %cst_45 [1, 2] : vector<1x16x1xf32> to vector<1xf32>
      %97 = vector.shape_cast %96 : vector<1xf32> to vector<1x1x1xf32>
      %98 = vector.extract %97[0, 0, 0] : f32 from vector<1x1x1xf32>
      %cst_46 = arith.constant 1.600000e+01 : f32
      %99 = arith.divf %98, %cst_46 : f32
      %cst_47 = arith.constant dense<0.000000e+00> : vector<16xf32>
      %100 = vector.multi_reduction <add>, %93, %cst_47 [0] : vector<16x16xf32> to vector<16xf32>
      %101 = vector.shape_cast %100 : vector<16xf32> to vector<1x16xf32>
      %102 = math.log %101 : vector<1x16xf32>
      %103 = vector.shape_cast %102 : vector<1x16xf32> to vector<1x1x16xf32>
      %cst_48 = arith.constant dense<0.000000e+00> : vector<1xf32>
      %104 = vector.multi_reduction <add>, %103, %cst_48 [1, 2] : vector<1x1x16xf32> to vector<1xf32>
      %105 = vector.shape_cast %104 : vector<1xf32> to vector<1x1x1xf32>
      %106 = vector.extract %105[0, 0, 0] : f32 from vector<1x1x1xf32>
      %cst_49 = arith.constant 1.600000e+01 : f32
      %107 = arith.divf %106, %cst_49 : f32
      %108 = arith.subf %99, %107 : f32
      %cst_50 = arith.constant dense<0.000000e+00> : vector<16xf32>
      %109 = vector.multi_reduction <add>, %93, %cst_50 [1] : vector<16x16xf32> to vector<16xf32>
      %110 = vector.shape_cast %109 : vector<16xf32> to vector<16x1xf32>
      %111 = math.log %110 : vector<16x1xf32>
      %112 = vector.shape_cast %111 : vector<16x1xf32> to vector<1x16x1xf32>
      %cst_51 = arith.constant dense<0.000000e+00> : vector<1xf32>
      %113 = vector.multi_reduction <add>, %112, %cst_51 [1, 2] : vector<1x16x1xf32> to vector<1xf32>
      %114 = vector.shape_cast %113 : vector<1xf32> to vector<1x1x1xf32>
      %115 = vector.extract %114[0, 0, 0] : f32 from vector<1x1x1xf32>
      %cst_52 = arith.constant 1.600000e+01 : f32
      %116 = arith.divf %115, %cst_52 : f32
      %117 = arith.subf %99, %116 : f32
      %118 = arith.addf %108, %117 : f32
      %cst_53 = arith.constant 5.000000e-01 : f32
      %119 = arith.mulf %cst_53, %118 : f32
      %120 = arith.mulf %56, %56 : vector<16x128xf32>
      %cst_54 = arith.constant dense<0.000000e+00> : vector<16xf32>
      %121 = vector.multi_reduction <add>, %120, %cst_54 [1] : vector<16x128xf32> to vector<16xf32>
      %122 = vector.shape_cast %121 : vector<16xf32> to vector<16x1xf32>
      %cst_55 = arith.constant 9.99999996E-13 : f32
      %123 = vector.broadcast %cst_55 : f32 to vector<16x1xf32>
      %124 = arith.addf %122, %123 : vector<16x1xf32>
      %125 = math.rsqrt %124 : vector<16x1xf32>
      %126 = vector.broadcast %125 : vector<16x1xf32> to vector<16x128xf32>
      %127 = arith.mulf %56, %126 : vector<16x128xf32>
      %128 = arith.truncf %127 : vector<16x128xf32> to vector<16x128xbf16>
      %129 = arith.mulf %55, %55 : vector<16x128xf32>
      %cst_56 = arith.constant dense<0.000000e+00> : vector<16xf32>
      %130 = vector.multi_reduction <add>, %129, %cst_56 [1] : vector<16x128xf32> to vector<16xf32>
      %131 = vector.shape_cast %130 : vector<16xf32> to vector<16x1xf32>
      %cst_57 = arith.constant 9.99999996E-13 : f32
      %132 = vector.broadcast %cst_57 : f32 to vector<16x1xf32>
      %133 = arith.addf %131, %132 : vector<16x1xf32>
      %134 = math.rsqrt %133 : vector<16x1xf32>
      %135 = vector.broadcast %134 : vector<16x1xf32> to vector<16x128xf32>
      %136 = arith.mulf %55, %135 : vector<16x128xf32>
      %137 = arith.truncf %136 : vector<16x128xf32> to vector<16x128xbf16>
      %cst_58 = arith.constant dense<0.000000e+00> : vector<16x16xf32>
      %138 = tpu.matmul %128, %137, %cst_58 {dimension_numbers = #tpu.dot_dimension_numbers<[1], [1], [0], [0], [0, 0, 1, 0], [], []>} : vector<16x128xbf16>, vector<16x128xbf16>, vector<16x16xf32> -> vector<16x16xf32>
      %cst_59 = arith.constant 5.000000e+00 : f32
      %139 = vector.broadcast %cst_59 : f32 to vector<16x16xf32>
      %140 = arith.mulf %138, %139 : vector<16x16xf32>
      %141 = math.exp %140 : vector<16x16xf32>
      %142 = arith.extf %128 : vector<16x128xbf16> to vector<16x128xf32>
      %143 = arith.extf %137 : vector<16x128xbf16> to vector<16x128xf32>
      %144 = arith.mulf %142, %143 : vector<16x128xf32>
      %cst_60 = arith.constant dense<0.000000e+00> : vector<16xf32>
      %145 = vector.multi_reduction <add>, %144, %cst_60 [1] : vector<16x128xf32> to vector<16xf32>
      %146 = vector.shape_cast %145 : vector<16xf32> to vector<16x1xf32>
      %cst_61 = arith.constant 5.000000e+00 : f32
      %147 = vector.broadcast %cst_61 : f32 to vector<16x1xf32>
      %148 = arith.mulf %146, %147 : vector<16x1xf32>
      %149 = math.exp %148 : vector<16x1xf32>
      %150 = arith.mulf %141, %62 : vector<16x16xf32>
      %151 = math.log %149 : vector<16x1xf32>
      %152 = vector.shape_cast %151 : vector<16x1xf32> to vector<1x16x1xf32>
      %cst_62 = arith.constant dense<0.000000e+00> : vector<1xf32>
      %153 = vector.multi_reduction <add>, %152, %cst_62 [1, 2] : vector<1x16x1xf32> to vector<1xf32>
      %154 = vector.shape_cast %153 : vector<1xf32> to vector<1x1x1xf32>
      %155 = vector.extract %154[0, 0, 0] : f32 from vector<1x1x1xf32>
      %cst_63 = arith.constant 1.600000e+01 : f32
      %156 = arith.divf %155, %cst_63 : f32
      %cst_64 = arith.constant dense<0.000000e+00> : vector<16xf32>
      %157 = vector.multi_reduction <add>, %150, %cst_64 [0] : vector<16x16xf32> to vector<16xf32>
      %158 = vector.shape_cast %157 : vector<16xf32> to vector<1x16xf32>
      %159 = math.log %158 : vector<1x16xf32>
      %160 = vector.shape_cast %159 : vector<1x16xf32> to vector<1x1x16xf32>
      %cst_65 = arith.constant dense<0.000000e+00> : vector<1xf32>
      %161 = vector.multi_reduction <add>, %160, %cst_65 [1, 2] : vector<1x1x16xf32> to vector<1xf32>
      %162 = vector.shape_cast %161 : vector<1xf32> to vector<1x1x1xf32>
      %163 = vector.extract %162[0, 0, 0] : f32 from vector<1x1x1xf32>
      %cst_66 = arith.constant 1.600000e+01 : f32
      %164 = arith.divf %163, %cst_66 : f32
      %165 = arith.subf %156, %164 : f32
      %cst_67 = arith.constant dense<0.000000e+00> : vector<16xf32>
      %166 = vector.multi_reduction <add>, %150, %cst_67 [1] : vector<16x16xf32> to vector<16xf32>
      %167 = vector.shape_cast %166 : vector<16xf32> to vector<16x1xf32>
      %168 = math.log %167 : vector<16x1xf32>
      %169 = vector.shape_cast %168 : vector<16x1xf32> to vector<1x16x1xf32>
      %cst_68 = arith.constant dense<0.000000e+00> : vector<1xf32>
      %170 = vector.multi_reduction <add>, %169, %cst_68 [1, 2] : vector<1x16x1xf32> to vector<1xf32>
      %171 = vector.shape_cast %170 : vector<1xf32> to vector<1x1x1xf32>
      %172 = vector.extract %171[0, 0, 0] : f32 from vector<1x1x1xf32>
      %cst_69 = arith.constant 1.600000e+01 : f32
      %173 = arith.divf %172, %cst_69 : f32
      %174 = arith.subf %156, %173 : f32
      %175 = arith.addf %165, %174 : f32
      %cst_70 = arith.constant 5.000000e-01 : f32
      %176 = arith.mulf %cst_70, %175 : f32
      %c0_71 = arith.constant 0 : index
      %c0_72 = arith.constant 0 : index
      %177 = vector.load %arg25[%c0_71, %c0_72] : memref<16x1xf32, #tpu.memory_space<vmem>>, vector<16x1xf32>
      %178 = vector.shape_cast %177 : vector<16x1xf32> to vector<1x16x1xf32>
      %cst_73 = arith.constant dense<0.000000e+00> : vector<1xf32>
      %179 = vector.multi_reduction <add>, %178, %cst_73 [1, 2] : vector<1x16x1xf32> to vector<1xf32>
      %180 = vector.shape_cast %179 : vector<1xf32> to vector<1x1x1xf32>
      %181 = vector.extract %180[0, 0, 0] : f32 from vector<1x1x1xf32>
      %cst_74 = arith.constant 1.000000e+00 : f32
      %182 = arith.maximumf %181, %cst_74 : f32
      %cst_75 = arith.constant 8.192000e+03 : f32
      %183 = arith.subf %cst_75, %181 : f32
      %cst_76 = arith.constant 1.000000e+00 : f32
      %184 = arith.maximumf %183, %cst_76 : f32
      %c0_77 = arith.constant 0 : index
      %c0_78 = arith.constant 0 : index
      %185 = vector.load %arg36[%c0_77, %c0_78] : memref<16x1xf32, #tpu.memory_space<vmem>>, vector<16x1xf32>
      %186 = vector.shape_cast %185 : vector<16x1xf32> to vector<1x16x1xf32>
      %cst_79 = arith.constant dense<0.000000e+00> : vector<1xf32>
      %187 = vector.multi_reduction <add>, %186, %cst_79 [1, 2] : vector<1x16x1xf32> to vector<1xf32>
      %188 = vector.shape_cast %187 : vector<1xf32> to vector<1x1x1xf32>
      %189 = vector.extract %188[0, 0, 0] : f32 from vector<1x1x1xf32>
      %190 = arith.divf %189, %184 : f32
      %c0_80 = arith.constant 0 : index
      %c0_81 = arith.constant 0 : index
      %191 = vector.load %arg37[%c0_80, %c0_81] : memref<16x1xf32, #tpu.memory_space<vmem>>, vector<16x1xf32>
      %192 = vector.shape_cast %191 : vector<16x1xf32> to vector<1x16x1xf32>
      %cst_82 = arith.constant dense<0.000000e+00> : vector<1xf32>
      %193 = vector.multi_reduction <add>, %192, %cst_82 [1, 2] : vector<1x16x1xf32> to vector<1xf32>
      %194 = vector.shape_cast %193 : vector<1xf32> to vector<1x1x1xf32>
      %195 = vector.extract %194[0, 0, 0] : f32 from vector<1x1x1xf32>
      %196 = arith.divf %195, %182 : f32
      %197 = arith.addf %190, %196 : f32
      %c0_83 = arith.constant 0 : index
      %c0_84 = arith.constant 0 : index
      %198 = vector.load %arg38[%c0_83, %c0_84] : memref<16x1xf32, #tpu.memory_space<vmem>>, vector<16x1xf32>
      %c0_85 = arith.constant 0 : index
      %c0_86 = arith.constant 0 : index
      %199 = vector.load %arg39[%c0_85, %c0_86] : memref<16x1xf32, #tpu.memory_space<vmem>>, vector<16x1xf32>
      %200 = math.log %199 : vector<16x1xf32>
      %201 = arith.addf %198, %200 : vector<16x1xf32>
      %c0_87 = arith.constant 0 : index
      %c0_88 = arith.constant 0 : index
      %202 = vector.load %arg40[%c0_87, %c0_88] : memref<16x1xf32, #tpu.memory_space<vmem>>, vector<16x1xf32>
      %c0_89 = arith.constant 0 : index
      %c0_90 = arith.constant 0 : index
      %203 = vector.load %arg25[%c0_89, %c0_90] : memref<16x1xf32, #tpu.memory_space<vmem>>, vector<16x1xf32>
      %204 = arith.mulf %201, %203 : vector<16x1xf32>
      %205 = arith.subf %202, %204 : vector<16x1xf32>
      %206 = vector.shape_cast %205 : vector<16x1xf32> to vector<1x16x1xf32>
      %cst_91 = arith.constant dense<0.000000e+00> : vector<1xf32>
      %207 = vector.multi_reduction <add>, %206, %cst_91 [1, 2] : vector<1x16x1xf32> to vector<1xf32>
      %208 = vector.shape_cast %207 : vector<1xf32> to vector<1x1x1xf32>
      %209 = vector.extract %208[0, 0, 0] : f32 from vector<1x1x1xf32>
      %cst_92 = arith.constant 1.600000e+01 : f32
      %210 = arith.divf %209, %cst_92 : f32
      %cst_93 = arith.constant 0.000000e+00 : f32
      %211 = arith.subf %cst_93, %210 : f32
      %cst_94 = arith.constant 1.000000e+00 : f32
      %212 = vector.broadcast %cst_94 : f32 to vector<16x128xf32>
      %213 = arith.addf %212, %57 : vector<16x128xf32>
      %214 = arith.mulf %56, %56 : vector<16x128xf32>
      %215 = arith.subf %213, %214 : vector<16x128xf32>
      %216 = math.exp %57 : vector<16x128xf32>
      %217 = arith.subf %215, %216 : vector<16x128xf32>
      %cst_95 = arith.constant dense<0.000000e+00> : vector<16xf32>
      %218 = vector.multi_reduction <add>, %217, %cst_95 [1] : vector<16x128xf32> to vector<16xf32>
      %219 = vector.shape_cast %218 : vector<16xf32> to vector<16x1xf32>
      %220 = vector.shape_cast %219 : vector<16x1xf32> to vector<1x16x1xf32>
      %cst_96 = arith.constant dense<0.000000e+00> : vector<1xf32>
      %221 = vector.multi_reduction <add>, %220, %cst_96 [1, 2] : vector<1x16x1xf32> to vector<1xf32>
      %222 = vector.shape_cast %221 : vector<1xf32> to vector<1x1x1xf32>
      %223 = vector.extract %222[0, 0, 0] : f32 from vector<1x1x1xf32>
      %cst_97 = arith.constant 1.600000e+01 : f32
      %224 = arith.divf %223, %cst_97 : f32
      %cst_98 = arith.constant -5.000000e-01 : f32
      %225 = arith.mulf %cst_98, %224 : f32
      %c0_99 = arith.constant 0 : index
      %226 = memref.load %arg2[%c0_99] : memref<1xf32, #tpu.memory_space<smem>>
      %cst_100 = arith.constant 1.000000e+00 : f32
      %227 = arith.mulf %cst_100, %119 : f32
      %cst_101 = arith.constant 5.000000e-01 : f32
      %228 = arith.mulf %cst_101, %197 : f32
      %229 = arith.addf %227, %228 : f32
      %230 = arith.mulf %226, %225 : f32
      %231 = arith.addf %211, %230 : f32
      %cst_102 = arith.constant 1.000000e-01 : f32
      %232 = arith.mulf %cst_102, %176 : f32
      %233 = arith.subf %231, %232 : f32
      %234 = tpu.iota {dimensions = array<i32: 1>} : vector<1x128xi32>
      %cst_103 = arith.constant 0.000000e+00 : f32
      %235 = vector.broadcast %cst_103 : f32 to vector<1x128xf32>
      %c0_i32_104 = arith.constant 0 : i32
      %236 = vector.broadcast %c0_i32_104 : i32 to vector<1x128xi32>
      %237 = arith.cmpi eq, %234, %236 : vector<1x128xi32>
      %238 = vector.broadcast %233 : f32 to vector<1x128xf32>
      %239 = arith.select %237, %238, %235 : vector<1x128xi1>, vector<1x128xf32>
      %c1_i32_105 = arith.constant 1 : i32
      %240 = vector.broadcast %c1_i32_105 : i32 to vector<1x128xi32>
      %241 = arith.cmpi eq, %234, %240 : vector<1x128xi32>
      %242 = vector.broadcast %229 : f32 to vector<1x128xf32>
      %243 = arith.select %241, %242, %239 : vector<1x128xi1>, vector<1x128xf32>
      %c2_i32 = arith.constant 2 : i32
      %244 = vector.broadcast %c2_i32 : i32 to vector<1x128xi32>
      %245 = arith.cmpi eq, %234, %244 : vector<1x128xi32>
      %246 = vector.broadcast %176 : f32 to vector<1x128xf32>
      %247 = arith.select %245, %246, %243 : vector<1x128xi1>, vector<1x128xf32>
      %c3_i32 = arith.constant 3 : i32
      %248 = vector.broadcast %c3_i32 : i32 to vector<1x128xi32>
      %249 = arith.cmpi eq, %234, %248 : vector<1x128xi32>
      %250 = vector.broadcast %119 : f32 to vector<1x128xf32>
      %251 = arith.select %249, %250, %247 : vector<1x128xi1>, vector<1x128xf32>
      %c4_i32 = arith.constant 4 : i32
      %252 = vector.broadcast %c4_i32 : i32 to vector<1x128xi32>
      %253 = arith.cmpi eq, %234, %252 : vector<1x128xi32>
      %254 = vector.broadcast %211 : f32 to vector<1x128xf32>
      %255 = arith.select %253, %254, %251 : vector<1x128xi1>, vector<1x128xf32>
      %c5_i32 = arith.constant 5 : i32
      %256 = vector.broadcast %c5_i32 : i32 to vector<1x128xi32>
      %257 = arith.cmpi eq, %234, %256 : vector<1x128xi32>
      %258 = vector.broadcast %225 : f32 to vector<1x128xf32>
      %259 = arith.select %257, %258, %255 : vector<1x128xi1>, vector<1x128xf32>
      %c6_i32 = arith.constant 6 : i32
      %260 = vector.broadcast %c6_i32 : i32 to vector<1x128xi32>
      %261 = arith.cmpi eq, %234, %260 : vector<1x128xi32>
      %262 = vector.broadcast %197 : f32 to vector<1x128xf32>
      %263 = arith.select %261, %262, %259 : vector<1x128xi1>, vector<1x128xf32>
      %c7_i32 = arith.constant 7 : i32
      %264 = vector.broadcast %c7_i32 : i32 to vector<1x128xi32>
      %265 = arith.cmpi eq, %234, %264 : vector<1x128xi32>
      %266 = vector.broadcast %196 : f32 to vector<1x128xf32>
      %267 = arith.select %265, %266, %263 : vector<1x128xi1>, vector<1x128xf32>
      %c8_i32 = arith.constant 8 : i32
      %268 = vector.broadcast %c8_i32 : i32 to vector<1x128xi32>
      %269 = arith.cmpi eq, %234, %268 : vector<1x128xi32>
      %270 = vector.broadcast %190 : f32 to vector<1x128xf32>
      %271 = arith.select %269, %270, %267 : vector<1x128xi1>, vector<1x128xf32>
      %c0_106 = arith.constant 0 : index
      %c0_107 = arith.constant 0 : index
      %272 = vector.load %arg24[%c0_106, %c0_107] : memref<1x128xf32, #tpu.memory_space<vmem>>, vector<1x128xf32>
      tpu.vector_store %arg24[%c0_106, %c0_107], %271 {strides = array<i32>} : memref<1x128xf32, #tpu.memory_space<vmem>>, vector<1x128xf32>,
    } else {
    }
    return
  }
  func.func @transform_0(%arg0: i32, %arg1: i32, %arg2: memref<1xf32, #tpu.memory_space<smem>>) -> (i32, i32) {
    %c0_i32 = arith.constant 0 : i32
    %c0_i32_0 = arith.constant 0 : i32
    return %c0_i32, %arg1 : i32, i32
  }
  func.func @transform_1(%arg0: i32, %arg1: i32, %arg2: memref<1xf32, #tpu.memory_space<smem>>) -> (i32, i32) {
    %c0_i32 = arith.constant 0 : i32
    %0 = arith.cmpi eq, %arg0, %c0_i32 : i32
    %c0_i32_0 = arith.constant 0 : i32
    %1 = arith.select %0, %c0_i32_0, %arg1 : i32
    %c0_i32_1 = arith.constant 0 : i32
    %c0_i32_2 = arith.constant 0 : i32
    return %c0_i32_1, %1 : i32, i32
  }
  func.func @transform_2(%arg0: i32, %arg1: i32, %arg2: memref<1xf32, #tpu.memory_space<smem>>) -> (i32, i32) {
    %c0_i32 = arith.constant 0 : i32
    %0 = arith.cmpi eq, %arg0, %c0_i32 : i32
    %c0_i32_0 = arith.constant 0 : i32
    %1 = arith.select %0, %c0_i32_0, %arg1 : i32
    %c0_i32_1 = arith.constant 0 : i32
    %c0_i32_2 = arith.constant 0 : i32
    return %c0_i32_1, %1 : i32, i32
  }
  func.func @transform_3(%arg0: i32, %arg1: i32, %arg2: memref<1xf32, #tpu.memory_space<smem>>) -> (i32, i32) {
    %c0_i32 = arith.constant 0 : i32
    %0 = arith.cmpi eq, %arg0, %c0_i32 : i32
    %c1_i32 = arith.constant 1 : i32
    %1 = arith.select %0, %arg1, %c1_i32 : i32
    %c0_i32_0 = arith.constant 0 : i32
    %c0_i32_1 = arith.constant 0 : i32
    return %1, %c0_i32_0 : i32, i32
  }
  func.func @transform_4(%arg0: i32, %arg1: i32, %arg2: memref<1xf32, #tpu.memory_space<smem>>) -> (i32, i32) {
    %c0_i32 = arith.constant 0 : i32
    %c0_i32_0 = arith.constant 0 : i32
    %c0_i32_1 = arith.constant 0 : i32
    return %c0_i32, %c0_i32_0 : i32, i32
  }
  func.func @transform_5(%arg0: i32, %arg1: i32, %arg2: memref<1xf32, #tpu.memory_space<smem>>) -> (i32, i32) {
    %c0_i32 = arith.constant 0 : i32
    %c0_i32_0 = arith.constant 0 : i32
    %c0_i32_1 = arith.constant 0 : i32
    return %c0_i32, %c0_i32_0 : i32, i32
  }
  func.func @transform_6(%arg0: i32, %arg1: i32, %arg2: memref<1xf32, #tpu.memory_space<smem>>) -> (i32, i32) {
    %c0_i32 = arith.constant 0 : i32
    %c0_i32_0 = arith.constant 0 : i32
    %c0_i32_1 = arith.constant 0 : i32
    return %c0_i32, %c0_i32_0 : i32, i32
  }
  func.func @transform_7(%arg0: i32, %arg1: i32, %arg2: memref<1xf32, #tpu.memory_space<smem>>) -> (i32, i32) {
    %c0_i32 = arith.constant 0 : i32
    %c0_i32_0 = arith.constant 0 : i32
    %c0_i32_1 = arith.constant 0 : i32
    return %c0_i32, %c0_i32_0 : i32, i32
  }
  func.func @transform_8(%arg0: i32, %arg1: i32, %arg2: memref<1xf32, #tpu.memory_space<smem>>) -> (i32, i32) {
    %c0_i32 = arith.constant 0 : i32
    %c0_i32_0 = arith.constant 0 : i32
    %c0_i32_1 = arith.constant 0 : i32
    return %c0_i32, %c0_i32_0 : i32, i32
  }
  func.func @transform_9(%arg0: i32, %arg1: i32, %arg2: memref<1xf32, #tpu.memory_space<smem>>) -> (i32, i32) {
    %c0_i32 = arith.constant 0 : i32
    %0 = arith.cmpi eq, %arg0, %c0_i32 : i32
    %c0_i32_0 = arith.constant 0 : i32
    %1 = arith.select %0, %c0_i32_0, %arg1 : i32
    %c0_i32_1 = arith.constant 0 : i32
    %c0_i32_2 = arith.constant 0 : i32
    return %c0_i32_1, %1 : i32, i32
  }
  func.func @transform_10(%arg0: i32, %arg1: i32, %arg2: memref<1xf32, #tpu.memory_space<smem>>) -> (i32, i32) {
    %c0_i32 = arith.constant 0 : i32
    %0 = arith.cmpi eq, %arg0, %c0_i32 : i32
    %c0_i32_0 = arith.constant 0 : i32
    %1 = arith.select %0, %c0_i32_0, %arg1 : i32
    %c0_i32_1 = arith.constant 0 : i32
    %c0_i32_2 = arith.constant 0 : i32
    return %c0_i32_1, %1 : i32, i32
  }
  func.func @transform_11(%arg0: i32, %arg1: i32, %arg2: memref<1xf32, #tpu.memory_space<smem>>) -> (i32, i32) {
    %c0_i32 = arith.constant 0 : i32
    %c0_i32_0 = arith.constant 0 : i32
    return %arg1, %c0_i32 : i32, i32
  }
  func.func @transform_12(%arg0: i32, %arg1: i32, %arg2: memref<1xf32, #tpu.memory_space<smem>>) -> (i32, i32) {
    %c0_i32 = arith.constant 0 : i32
    %c0_i32_0 = arith.constant 0 : i32
    %c0_i32_1 = arith.constant 0 : i32
    return %c0_i32, %c0_i32_0 : i32, i32
  }
  func.func @transform_13(%arg0: i32, %arg1: i32, %arg2: memref<1xf32, #tpu.memory_space<smem>>) -> (i32, i32) {
    %c0_i32 = arith.constant 0 : i32
    %c0_i32_0 = arith.constant 0 : i32
    %c0_i32_1 = arith.constant 0 : i32
    return %c0_i32, %c0_i32_0 : i32, i32
  }
  func.func @transform_14(%arg0: i32, %arg1: i32, %arg2: memref<1xf32, #tpu.memory_space<smem>>) -> (i32, i32) {
    %c0_i32 = arith.constant 0 : i32
    %c0_i32_0 = arith.constant 0 : i32
    %c0_i32_1 = arith.constant 0 : i32
    return %c0_i32, %c0_i32_0 : i32, i32
  }
  func.func @transform_15(%arg0: i32, %arg1: i32, %arg2: memref<1xf32, #tpu.memory_space<smem>>) -> (i32, i32) {
    %c0_i32 = arith.constant 0 : i32
    %c0_i32_0 = arith.constant 0 : i32
    %c0_i32_1 = arith.constant 0 : i32
    return %c0_i32, %c0_i32_0 : i32, i32
  }
  func.func @transform_16(%arg0: i32, %arg1: i32, %arg2: memref<1xf32, #tpu.memory_space<smem>>) -> (i32, i32) {
    %c0_i32 = arith.constant 0 : i32
    %c0_i32_0 = arith.constant 0 : i32
    %c0_i32_1 = arith.constant 0 : i32
    return %c0_i32, %c0_i32_0 : i32, i32
  }
  func.func @transform_17(%arg0: i32, %arg1: i32, %arg2: memref<1xf32, #tpu.memory_space<smem>>) -> (i32, i32) {
    %c0_i32 = arith.constant 0 : i32
    %c0_i32_0 = arith.constant 0 : i32
    %c0_i32_1 = arith.constant 0 : i32
    return %c0_i32, %c0_i32_0 : i32, i32
  }
  func.func @transform_18(%arg0: i32, %arg1: i32, %arg2: memref<1xf32, #tpu.memory_space<smem>>) -> (i32, i32) {
    %c0_i32 = arith.constant 0 : i32
    %c0_i32_0 = arith.constant 0 : i32
    %c0_i32_1 = arith.constant 0 : i32
    return %c0_i32, %c0_i32_0 : i32, i32
  }
  func.func @transform_19(%arg0: i32, %arg1: i32, %arg2: memref<1xf32, #tpu.memory_space<smem>>) -> (i32, i32) {
    %c0_i32 = arith.constant 0 : i32
    %0 = arith.cmpi eq, %arg0, %c0_i32 : i32
    %c0_i32_0 = arith.constant 0 : i32
    %1 = arith.select %0, %c0_i32_0, %arg1 : i32
    %c0_i32_1 = arith.constant 0 : i32
    %c0_i32_2 = arith.constant 0 : i32
    return %c0_i32_1, %1 : i32, i32
  }
  func.func @transform_20(%arg0: i32, %arg1: i32, %arg2: memref<1xf32, #tpu.memory_space<smem>>) -> (i32, i32) {
    %c0_i32 = arith.constant 0 : i32
    %0 = arith.cmpi eq, %arg0, %c0_i32 : i32
    %c0_i32_0 = arith.constant 0 : i32
    %1 = arith.select %0, %c0_i32_0, %arg1 : i32
    %c0_i32_1 = arith.constant 0 : i32
    %c0_i32_2 = arith.constant 0 : i32
    return %c0_i32_1, %1 : i32, i32
  }
  func.func @transform_21(%arg0: i32, %arg1: i32, %arg2: memref<1xf32, #tpu.memory_space<smem>>) -> (i32, i32) {
    %c0_i32 = arith.constant 0 : i32
    %c0_i32_0 = arith.constant 0 : i32
    %c0_i32_1 = arith.constant 0 : i32
    return %c0_i32, %c0_i32_0 : i32, i32
  }
}

</mosaic_0001>

<bundles_post_ra>
// kernel: tpu_custom_call.1
= control target key start
LH: loop header
LB: loop body
LE: loop exit
PB: predicated region body
PF: predicated region fallthrough
CT: control target
= control target key end

     0   :  { %s7545_s0 = inlined_call_operand.<no memory space> [shape: f32[1], index: 0, kind: input, shape index: {}]   ;;  %s7546_s1 = inlined_call_operand.hbm [shape: bf16[16,512], index: 1, kind: input, shape index: {}]   ;;  %s7547_s2 = inlined_call_operand.hbm [shape: f32[16,512], index: 2, kind: input, shape index: {}]   ;;  %s7548_s3 = inlined_call_operand.hbm [shape: f32[16,512], index: 3, kind: input, shape index: {}]   ;;  %s7549_s4 = inlined_call_operand.hbm [shape: bf16[512,128], index: 4, kind: input, shape index: {}]   ;;  %s7550_s5 = inlined_call_operand.hbm [shape: f32[1,128], index: 5, kind: input, shape index: {}]   ;;  %s7551_s6 = inlined_call_operand.hbm [shape: bf16[128,128], index: 6, kind: input, shape index: {}]   ;;  %s7552_s7 = inlined_call_operand.hbm [shape: f32[1,128], index: 7, kind: input, shape index: {}]   ;;  %s7553_s8 = inlined_call_operand.hbm [shape: bf16[128,128], index: 8, kind: input, shape index: {}]   ;;  %s7554_s9 = inlined_call_operand.vmem [shape: f32[1,128], index: 9, kind: input, shape index: {}]   ;;  %s7555_s10 = inlined_call_operand.hbm [shape: bf16[128,512], index: 10, kind: input, shape index: {}]   ;;  %s7556_s11 = inlined_call_operand.vmem [shape: f32[1,512], index: 11, kind: input, shape index: {}]   ;;  %s7557_s12 = inlined_call_operand.hbm [shape: bf16[512,128], index: 12, kind: input, shape index: {}]   ;;  %s7558_s13 = inlined_call_operand.vmem [shape: f32[1,128], index: 13, kind: input, shape index: {}]   ;;  %s7559_s14 = inlined_call_operand.hbm [shape: bf16[128,128], index: 14, kind: input, shape index: {}]   ;;  %s7560_s15 = inlined_call_operand.vmem [shape: f32[1,128], index: 15, kind: input, shape index: {}]   ;;  %s7561_s16 = inlined_call_operand.hbm [shape: bf16[128,128], index: 16, kind: input, shape index: {}]   ;;  %s7562_s17 = inlined_call_operand.vmem [shape: f32[1,128], index: 17, kind: input, shape index: {}]   ;;  %s7563_s18 = inlined_call_operand.hbm [shape: bf16[128,128], index: 18, kind: input, shape index: {}]   ;;  %s7564_s19 = inlined_call_operand.vmem [shape: f32[1,128], index: 19, kind: input, shape index: {}]   ;;  %s7565_s20 = inlined_call_operand.hbm [shape: bf16[128,512], index: 20, kind: input, shape index: {}]   ;;  %s7566_s21 = inlined_call_operand.vmem [shape: f32[1,512], index: 21, kind: input, shape index: {}]   ;;  %s7567_s22 = inlined_call_operand.hbm [shape: f32[1,128], index: 22, kind: output, shape index: {}]  }
   0x1   :  { %7611 = sst [smem:[#allocation76_spill]] %s7545_s0 }
   0x2   :  { %7612 = sst [smem:[#allocation77_spill]] %s7546_s1 }
   0x3   :  { %7613 = sst [smem:[#allocation78_spill]] %s7547_s2 }
   0x4   :  { %7614 = sst [smem:[#allocation79_spill]] %s7548_s3 }
   0x5   :  { %7615 = sst [smem:[#allocation80_spill]] %s7549_s4 }
   0x6   :  { %7616 = sst [smem:[#allocation81_spill]] %s7550_s5 }
   0x7   :  { %7617 = sst [smem:[#allocation82_spill]] %s7551_s6 }
   0x8   :  { %7618 = sst [smem:[#allocation83_spill]] %s7552_s7 }
   0x9   :  { %7619 = sst [smem:[#allocation84_spill]] %s7553_s8 }
   0xa   :  { %7620 = sst [smem:[#allocation85_spill]] %s7554_s9 }
   0xb   :  { %7621 = sst [smem:[#allocation86_spill]] %s7555_s10 }
   0xc   :  { %7622 = sst [smem:[#allocation87_spill]] %s7556_s11 }
   0xd   :  { %7623 = sst [smem:[#allocation88_spill]] %s7557_s12 }
   0xe   :  { %7624 = sst [smem:[#allocation89_spill]] %s7558_s13 }
   0xf   :  { %7625 = sst [smem:[#allocation90_spill]] %s7559_s14 }
  0x10   :  { %7626 = sst [smem:[#allocation91_spill]] %s7560_s15 }
  0x11   :  { %7627 = sst [smem:[#allocation92_spill]] %s7561_s16 }
  0x12   :  { %7628 = sst [smem:[#allocation93_spill]] %s7562_s17 }
  0x13   :  { %7629 = sst [smem:[#allocation94_spill]] %s7563_s18 }
  0x14   :  { %7630 = sst [smem:[#allocation95_spill]] %s7564_s19 }
  0x15   :  { %7631 = sst [smem:[#allocation96_spill]] %s7565_s20 }
  0x16   :  { %7632 = sst [smem:[#allocation97_spill]] %s7566_s21 }
  0x17   :  { %7633 = sst [smem:[#allocation98_spill]] %s7567_s22 }
  0x18   :  { %s7634_s29 = sld [smem:[#allocation76_spill]] }
  0x1e   :  { %27 = sst [smem:[#allocation19]] %s7634_s29 }
  0x1f   :  { %28 = vsyncpa [#allocation21], 0 }
  0x20   :  { %30 = vsyncpa [#allocation21 + $0x1], 0 }
  0x21   :  { %31 = vsyncpa [#allocation24], 0 }
  0x22   :  { %33 = vsyncpa [#allocation24 + $0x1], 0 }
  0x23   :  { %34 = vsyncpa [#allocation27], 0 }
  0x24   :  { %36 = vsyncpa [#allocation27 + $0x1], 0 }
  0x25   :  { %37 = vsyncpa [#allocation30], 0 }
  0x26   :  { %38 = vsyncpa [#allocation33], 0 }
  0x27   :  { %39 = vsyncpa [#allocation40], 0 }
  0x28   :  { %41 = vsyncpa [#allocation40 + $0x1], 0 }
  0x29   :  { %42 = vsyncpa [#allocation22], 0  ;;  %s6201_s30 = smov 0   ;;  %s6203_s4 = smov 0  }
  0x2a   :  { %s6205_s0 = smov 0   ;;  %s6207_s23 = smov 0  }
  0x2b   :  { %s6209_s1 = smov 0   ;;  %s6211_s5 = smov 0  }
  0x2c   :  { %s6213_s24 = smov 0   ;;  %s6215_s6 = smov 0  }
  0x2d   :  { %s6217_s25 = smov 0   ;;  %s6219_s26 = smov 0  }
  0x2e   :  { %s6221_s2 = smov 0   ;;  %s6223_s27 = smov 0  }
  0x2f   :  { %s6225_s3 = smov 0   ;;  %s6227_s28 = smov 0  }
  0x30 LB: > { %7635 = sst [smem:[#allocation55_spill]] %s6006_s30  ;;  %s6272_s29 = sadd.s32 4294967295, %s6058_s28   ;;  %s6058_s28 = sphi %s6227_s28, %s48_s28   ;;  %s6054_s3 = sphi %s6225_s3, %s7786_s3   ;;  %s6050_s27 = sphi %s6223_s27, %s7790_s27   ;;  %s6046_s2 = sphi %s6221_s2, %s7784_s2   ;;  %s6042_s26 = sphi %s6219_s26, %s7789_s26   ;;  %s6038_s25 = sphi %s6217_s25, %s7783_s25   ;;  %s6034_s6 = sphi %s6215_s6, %s7782_s6   ;;  %s6030_s24 = sphi %s6213_s24, %s7781_s24   ;;  %s6026_s5 = sphi %s6211_s5, %s7780_s5   ;;  %s6022_s1 = sphi %s6209_s1, %s7779_s1   ;;  %s6018_s23 = sphi %s6207_s23, %s7788_s23   ;;  %s6014_s0 = sphi %s6205_s0, %s7787_s0   ;;  %s6010_s4 = sphi %s6203_s4, %s7777_s4   ;;  %s6006_s30 = sphi %s6201_s30, %s7776_s30  }
  0x31   : > { %7636 = sst [smem:[#allocation56_spill]] %s6010_s4  ;;  %p4170_p0 = scmp.ge.s32.totalorder %s6058_s28, 1 }
  0x32   : > { %7637 = sst [smem:[#allocation57_spill]] %s6014_s0  ;;  %p81_p1 = scmp.eq.s32.totalorder %s6272_s29, 0 }
  0x33   : > { %7638 = sst [smem:[#allocation58_spill]] %s6022_s1  ;;  %p600_p2 = scmp.lt.s32.totalorder %s6058_s28, 5 }
  0x34   : > { %7639 = sst [smem:[#allocation59_spill]] %s6026_s5  ;;  %s6060_s13 = smov [#allocation28]  }
  0x35   : > { %7640 = sst [smem:[#allocation60_spill]] %s6034_s6  ;;  %p6280_p3 = pnand %p4170_p0, %p600_p2 }
  0x36   : > { %7641 = sst [smem:[#allocation61_spill]] %s6038_s25  ;;  %s614_s21 = sshll.u32 %s6060_s13, 4  ;;  %s615_s21 = int_to_ptr.vmem [resolvable:$true] %s614_s21 }
  0x37   : > { %7642 = sst [smem:[#allocation62_spill]] %s6042_s26  ;;  %p5064_p4 = pneg %p6280_p3 }
  0x38   : > { %7643 = sst [smem:[#allocation63_spill]] %s6046_s2  ;;  %s6061_s13 = smov [#allocation29]  }
  0x39   : > { %7644 = sst [smem:[#allocation64_spill]] %s6054_s3  ;;  %p6291_p5 = pnand %p5064_p4, %p81_p1 }
  0x3a   : > { %s7645_s9 = sld [smem:[#allocation81_spill]]  ;;  %s625_s2 = sshll.u32 %s6061_s13, 4  ;;  %s626_s2 = int_to_ptr.vmem [resolvable:$true] %s625_s2 }
  0x3b   : > { %s7646_s15 = scalar_select %p6280_p3, 1, 0 }
  0x3c   : > { %s7571_s11 = smov 64   ;;  %s7573_s19 = smov 4  }
  0x3d   : > { %7647 = sst [smem:[#allocation65_spill]] %s7646_s15  ;;  %p75_p6 = scmp.eq.s32.totalorder %s6058_s28, 0 }
  0x3e   : > { %p90_p7 = scmp.eq.s32.totalorder %s6054_s3, 0  ;;  %p104_p8 = scmp.ne.s32.totalorder %s6026_s5, %s6022_s1 }
  0x3f   : > { %p110_p9 = scmp.ne.s32.totalorder %s6022_s1, %s6018_s23  ;;  %p7600_p12 = scmp.lt.s32.totalorder %s6058_s28, 4 }
  0x40   : > { %s612_s17 = sshll.u32 %s7645_s9, 4  ;;  %s7648_s9 = sld [smem:[#allocation82_spill]]  ;;  %s613_s17 = int_to_ptr.hbm [resolvable:$true] %s612_s17 }
  0x41   : > { %5067 = dma.hbm_to_vmem [thread:$0]  (!%p6291_p5), %s613_s17, 16, %s615_s21, [#allocation27]  }
  0x42   : > { %s6313_s13 = scalar_select %p90_p7, 0, %s6050_s27 }
  0x43   : > { %p6317_p10 = por %p104_p8, %p75_p6  ;;  %p6323_p11 = por %p110_p9, %p81_p1 }
  0x44   : > { %7650 = sst [smem:[#allocation66_spill]] %s6313_s13  ;;  %s6332_s23 = sand.u32 1, %s6026_s5  }
  0x45   : > { %s7652_s21 = scalar_select %p6323_p11, 1, 0 }
  0x46   : > { %s623_s22 = sshll.u32 %s7648_s9, 4  ;;  %7655 = sst [smem:[#allocation69_spill]] %s6332_s23  ;;  %s624_s22 = int_to_ptr.hbm [resolvable:$true] %s623_s22 }
  0x47   : > { %5070 = dma.hbm_to_vmem [thread:$0]  (!%p6291_p5), %s624_s22, 1024, %s626_s2, [#allocation30], %s7571_s11, %s7571_s11, %s7573_s19  }
  0x48   : > { %7653 = sst [smem:[#allocation67_spill]] %s7652_s21  ;;  %s6329_s2 = sand.u32 1, %s6058_s28  }
  0x49   : > { %7654 = sst [smem:[#allocation68_spill]] %s6329_s2  ;;  %s4826_s22 = sshll.u32 %s6313_s13, 4 }
  0x4a   : > { %s4182_s15 = sshll.u32 %s6332_s23, 5  ;;  %s7656_s19 = sld [smem:[#allocation78_spill]] }
  0x4b   : > { %s748_s12 = scalar_lea.vmem [#allocation23], %s4182_s15  ;;  %p6343_p13 = pnand %p7600_p12, %p6317_p10 }
  0x4c   : > { %s758_s10 = sshll.u32 %s748_s12, 4  ;;  %s6348_s5 = scalar_lea.sflag [#allocation24], %s6329_s2  ;;  %s759_s10 = int_to_ptr.vmem [resolvable:$true] %s758_s10 }
  0x4d   : > { %s7588_s23 = smov 512   ;;  %s7590_s13 = smov 256  }
  0x4e   : > { %s7589_s11 = smov 16   ;;  %s772_s17 = scalar_lea.vmem [#allocation25], %s4182_s15 }
  0x4f   : > { %s782_s18 = sshll.u32 %s772_s17, 4  ;;  %s7659_s7 = sld [smem:[#allocation83_spill]]  ;;  %s6359_s18 = int_to_ptr.vmem [resolvable:$true] %s782_s18 }
  0x50   : > { %s755_s1 = scalar_lea.hbm %s7656_s19, %s4826_s22  ;;  %s7658_s19 = sld [smem:[#allocation79_spill]] }
  0x51   : > { %s756_s20 = sshll.u32 %s755_s1, 4  ;;  %s6067_s16 = smov [#allocation31]   ;;  %s757_s20 = int_to_ptr.hbm [resolvable:$true] %s756_s20 }
  0x52   : > { %5092 = dma.hbm_to_vmem [thread:$0]  (!%p6343_p13), %s757_s20, 512, %s759_s10, %s6348_s5, %s7588_s23, %s7590_s13, %s7589_s11  }
  0x53   : > { %s640_s10 = sshll.u32 %s6067_s16, 4  ;;  %s7660_s8 = sld [smem:[#allocation84_spill]]  ;;  %s641_s10 = int_to_ptr.vmem [resolvable:$true] %s640_s10 }
  0x54   : > { %s7661_s14 = sld [smem:[#allocation90_spill]]  ;;  %s6068_s1 = smov [#allocation32]  }
  0x55   : > { %s638_s0 = sshll.u32 %s7659_s7, 4  ;;  %s651_s16 = sshll.u32 %s6068_s1, 4  ;;  %s639_s0 = int_to_ptr.hbm [resolvable:$true] %s638_s0  ;;  %s652_s16 = int_to_ptr.vmem [resolvable:$true] %s651_s16 }
  0x56   : > { %s779_s9 = scalar_lea.hbm %s7658_s19, %s4826_s22  ;;  %s7662_s19 = smov 4  }
  0x57   : > { %s780_s30 = sshll.u32 %s779_s9, 4  ;;  %s7663_s9 = smov 64   ;;  %s6361_s30 = int_to_ptr.hbm [resolvable:$true] %s780_s30 }
  0x58   : > { %5073 = dma.hbm_to_vmem [thread:$0]  (!%p6291_p5), %s639_s0, 16, %s641_s10, [#allocation30]  }
  0x59   : > { %s649_s15 = sshll.u32 %s7660_s8, 4  ;;  %s6069_s17 = smov [#allocation36]   ;;  %s650_s15 = int_to_ptr.hbm [resolvable:$true] %s649_s15 }
  0x5a   : > { %s669_s22 = sshll.u32 %s7661_s14, 4  ;;  %s671_s0 = sshll.u32 %s6069_s17, 4  ;;  %s670_s22 = int_to_ptr.hbm [resolvable:$true] %s669_s22  ;;  %s672_s0 = int_to_ptr.vmem [resolvable:$true] %s671_s0 }
  0x5b   : > { %5076 = dma.hbm_to_vmem [thread:$0]  (!%p6291_p5), %s650_s15, 1024, %s652_s16, [#allocation33], %s7663_s9, %s7663_s9, %s7662_s19  }
  0x5c   : > { %5079 = dma.hbm_to_vmem [thread:$0]  (!%p6291_p5), %s670_s22, 1024, %s672_s0, [#allocation27], %s7663_s9, %s7663_s9, %s7662_s19  }
  0x5d   : > { %s57_s10 = sadd.s32 1, %s6050_s27  ;;  %s67_s20 = sadd.s32 1, %s6038_s25 }
  0x5e   : > { %p6386_p0 = scmp.ge.s32.totalorder %s57_s10, 2  ;;  %p74_p2 = scmp.ne.s32.totalorder %s6038_s25, %s6034_s6 }
  0x5f   : > { %p80_p4 = scmp.ne.s32.totalorder %s6034_s6, %s6030_s24  ;;  %s7592_s22 = sand.u32 1, %s6038_s25  }
  0x60   : > { %s7792_s10 = smov (%p6386_p0, %s57_s10), 0  ;;  %p6400_p8 = por %p75_p6, %p74_p2 }
  0x61   : > { %7665 = sst [smem:[#allocation70_spill]] %s7792_s10  ;;  %p6406_p9 = por %p81_p1, %p80_p4 }
  0x62   : > { %s64_s3 = ssub.s32 %s6050_s27, %s7792_s10  ;;  %s4179_s24 = sshll.u32 %s7592_s22, 4 }
  0x63   : > { %s7667_s4 = scalar_select %p6406_p9, 1, 0 }
  0x64   : > { %p65_p10 = scmp.eq.s32.totalorder %s64_s3, 0  ;;  %s4825_s1 = sshll.u32 %s6050_s27, 3 }
  0x65   : > { %7668 = sst [smem:[#allocation71_spill]] %s7667_s4  ;;  %s726_s13 = scalar_lea.vmem [#allocation20], %s4179_s24 }
  0x66   : > { %s6417_s16 = scalar_select %p65_p10, %s6038_s25, %s67_s20  }
  0x67   : > { %s7670_s23 = sld [smem:[#allocation77_spill]]  ;;  %s734_s7 = sshll.u32 %s726_s13, 4  ;;  %s735_s7 = int_to_ptr.vmem [resolvable:$true] %s734_s7 }
  0x68   : > { %7669 = sst [smem:[#allocation72_spill]] %s6417_s16  ;;  %p6426_p2 = pnand %p7600_p12, %p6400_p8 }
  0x69   : > { %s7673_s20 = sld [smem:[#allocation92_spill]]  ;;  %s7601_s17 = scalar_lea.sflag [#allocation21], %s6329_s2 }
  0x6a   : > { %s7671_s3 = scalar_select %p6426_p2, 1, 0 }
  0x6b   : > { %s7602_s24 = smov 128   ;;  %s7675_s13 = sld [smem:[#allocation64_spill]] }
  0x6c   : > { %7672 = sst [smem:[#allocation73_spill]] %s7671_s3  ;;  %s7676_s15 = smov 256  }
  0x6d   : > { %s731_s11 = scalar_lea.hbm %s7670_s23, %s4825_s1  ;;  %s7674_s23 = sld [smem:[#allocation57_spill]] }
  0x6e   : > { %s732_s8 = sshll.u32 %s731_s11, 4  ;;  %s7604_s11 = smov 8   ;;  %s733_s8 = int_to_ptr.hbm [resolvable:$true] %s732_s8 }
  0x6f   : > { %s686_s16 = sshll.u32 %s7673_s20, 4  ;;  %s7677_s14 = smov 16   ;;  %s687_s16 = int_to_ptr.hbm [resolvable:$true] %s686_s16 }
  0x70   : > { %5089 = dma.hbm_to_vmem [thread:$0]  (!%p6426_p2), %s733_s8, 256, %s735_s7, %s7601_s17, %s7676_s15, %s7602_s24, %s7604_s11  }
  0x71   : > { %s7678_s22 = smov 512   ;;  %s7679_s1 = sld [smem:[#allocation56_spill]] }
  0x72   : > { %5095 = dma.hbm_to_vmem [thread:$0]  (!%p6343_p13), %s6361_s30, 512, %s6359_s18, %s6348_s5, %s7678_s22, %s7676_s15, %s7677_s14  }
  0x73   : > { %s7680_s0 = sld [smem:[#allocation55_spill]]  ;;  %s6072_s20 = smov [#allocation37]  }
  0x74   : > { %s688_s4 = sshll.u32 %s6072_s20, 4  ;;  %s7681_s25 = sld [smem:[#allocation94_spill]]  ;;  %s689_s4 = int_to_ptr.vmem [resolvable:$true] %s688_s4 }
  0x75   : > { %5082 = dma.hbm_to_vmem [thread:$0]  (!%p6291_p5), %s687_s16, 1024, %s689_s4, [#allocation30], %s7663_s9, %s7663_s9, %s7662_s19  }
  0x76   : > { %s6073_s7 = smov [#allocation38]   ;;  %s7682_s18 = sld [smem:[#allocation66_spill]] }
  0x77   : > { %s705_s8 = sshll.u32 %s6073_s7, 4  ;;  %s157_s30 = sadd.s32 1, %s7674_s23  ;;  %s706_s8 = int_to_ptr.vmem [resolvable:$true] %s705_s8 }
  0x78   : > { %s7683_s6 = sadd.s32 1, %s7675_s13  ;;  %p164_p8 = scmp.ne.s32.totalorder %s7674_s23, %s7679_s1 }
  0x79   : > { %s7794_s6 = smov (!%p6386_p0, %s7683_s6), %s7675_s13  ;;  %s7684_s4 = sld [smem:[#allocation59_spill]] }
  0x7a   : > { %s703_s2 = sshll.u32 %s7681_s25, 4  ;;  %p62_p4 = scmp.ge.s32.totalorder %s7794_s6, 2  ;;  %s704_s2 = int_to_ptr.hbm [resolvable:$true] %s703_s2 }
  0x7b   : > { %5085 = dma.hbm_to_vmem [thread:$0]  (!%p6291_p5), %s704_s2, 1024, %s706_s8, [#allocation33], %s7663_s9, %s7663_s9, %s7662_s19  }
  0x7c   : > { %s151_s25 = scalar_select %p90_p7, %s6050_s27, 1 }
  0x7d   : > { %p170_p10 = scmp.ne.s32.totalorder %s7679_s1, %s7680_s0  ;;  %s7796_s6 = smov (%p62_p4, %s7794_s6), 0 }
  0x7e   : > { %7685 = sst [smem:[#allocation74_spill]] %s7796_s6  ;;  %p6479_p12 = por %p164_p8, %p75_p6 }
  0x7f   : > { %p6485_p5 = por %p170_p10, %p81_p1  ;;  %p92_p7 = scmp.eq.s32.totalorder %s7796_s6, 0 }
  0x80   : > { %s794_s12 = sand.u32 1, %s7674_s23   ;;  %s4828_s3 = sshll.u32 %s151_s25, 7 }
  0x81   : > { %s7687_s2 = scalar_select %p6485_p5, 1, 0 }
  0x82   : > { %s4188_s16 = sshll.u32 %s794_s12, 7  ;;  %s7689_s13 = sld [smem:[#allocation69_spill]] }
  0x83   : > { %7688 = sst [smem:[#allocation55_spill]] %s7687_s2  ;;  %s7692_s11 = sadd.s32 1, %s7684_s4 }
  0x84   : > { %s93_s14 = scalar_select %p92_p7, 0, %s7792_s10 }
  0x85   : > { %s153_s22 = scalar_select %p92_p7, %s7792_s10, 1 }
  0x86   : > { %s94_s1 = ssub.s32 %s7682_s18, %s93_s14  ;;  %s7690_s0 = sld [smem:[#allocation68_spill]] }
  0x87   : > { %p95_p6 = scmp.eq.s32.totalorder %s94_s1, 0  ;;  %s154_s20 = ssub.s32 %s151_s25, %s153_s22 }
  0x88   : > { %p155_p0 = scmp.eq.s32.totalorder %s154_s20, 0  ;;  %s7691_s17 = sld [smem:[#allocation80_spill]] }
  0x89   : > { %s7798_s4 = smov (!%p95_p6, %s7684_s4), %s7692_s11  ;;  %s796_s6 = scalar_lea.vmem [#allocation26], %s4188_s16 }
  0x8a   : > { %7693 = sst [smem:[#allocation75_spill]] %s7798_s4  ;;  %s7800_s23 = smov (!%p155_p0, %s7674_s23), %s157_s30 }
  0x8b   : > { %s7694_s2 = sld [smem:[#allocation61_spill]]  ;;  %s806_s10 = sshll.u32 %s796_s6, 4  ;;  %s807_s10 = int_to_ptr.vmem [resolvable:$true] %s806_s10 }
  0x8c   : > { %p7695_p4 = scmp.lt.s32.totalorder %s6058_s28, 4  ;;  %s4191_s25 = sshll.u32 %s7689_s13, 7 }
  0x8d   : > { %s4829_s14 = sshll.u32 %s7682_s18, 3  ;;  %s7696_s11 = sld [smem:[#allocation86_spill]] }
  0x8e   : > { %s803_s24 = scalar_lea.hbm %s7691_s17, %s4828_s3  ;;  %p5096_p8 = pnand %p7695_p4, %p6479_p12 }
  0x8f   : > { %s804_s12 = sshll.u32 %s803_s24, 4  ;;  %s793_s30 = scalar_lea.sflag [#allocation27], %s7690_s0  ;;  %s805_s12 = int_to_ptr.hbm [resolvable:$true] %s804_s12 }
  0x90   : > { %5098 = dma.hbm_to_vmem [thread:$0]  (!%p5096_p8), %s805_s12, 2048, %s807_s10, %s793_s30, %s7663_s9, %s7663_s9, %s7662_s19  }
  0x91   : > { %s820_s16 = scalar_lea.vmem [#allocation34], %s4191_s25  ;;  %s7698_s26 = smov 8  }
  0x92   : > { %s830_s1 = sshll.u32 %s820_s16, 4  ;;  %s7699_s20 = smov 128   ;;  %s831_s1 = int_to_ptr.vmem [resolvable:$true] %s830_s1 }
  0x93   : > { %s827_s22 = scalar_lea.hbm %s7696_s11, %s4829_s14  ;;  %s7700_s18 = scalar_lea.sflag [#allocation21], %s7690_s0 }
  0x94   : > { %s828_s6 = sshll.u32 %s827_s22, 4  ;;  %s7701_s7 = sand.u32 1, %s7694_s2   ;;  %s829_s6 = int_to_ptr.hbm [resolvable:$true] %s828_s6 }
  0x95   : > { %5101 = dma.hbm_to_vmem [thread:$0]  (!%p6343_p13), %s829_s6, 2048, %s831_s1, %s7700_s18, %s7676_s15, %s7699_s20, %s7698_s26  }
  0x96   : > { %s4194_s8 = sshll.u32 %s7701_s7, 7  ;;  %s4830_s17 = sshll.u32 %s6050_s27, 7 }
  0x97   : > { %s7702_s4 = sld [smem:[#allocation88_spill]]  ;;  %s856_s22 = scalar_lea.vmem [#allocation35], %s4194_s8 }
  0x98   : > { %s864_s30 = sshll.u32 %s856_s22, 4  ;;  %s7703_s6 = sld [smem:[#allocation96_spill]]  ;;  %s865_s30 = int_to_ptr.vmem [resolvable:$true] %s864_s30 }
  0x99   : > { %s878_s1 = scalar_lea.vmem [#allocation39], %s4191_s25 }
  0x9a   : > { %s888_s18 = sshll.u32 %s878_s1, 4  ;;  %s889_s18 = int_to_ptr.vmem [resolvable:$true] %s888_s18 }
  0x9d   : > { %s861_s10 = scalar_lea.hbm %s7702_s4, %s4830_s17  ;;  %s875_s4 = scalar_lea.sflag [#allocation40], %s7689_s13 }
  0x9e   : > { %s862_s12 = sshll.u32 %s861_s10, 4  ;;  %s885_s16 = scalar_lea.hbm %s7703_s6, %s4829_s14  ;;  %s863_s12 = int_to_ptr.hbm [resolvable:$true] %s862_s12 }
  0x9f   : > { %5104 = dma.hbm_to_vmem [thread:$0]  (!%p6426_p2), %s863_s12, 2048, %s865_s30, %s6348_s5, %s7663_s9, %s7663_s9, %s7662_s19  }
  0xa0   : > { %s886_s7 = sshll.u32 %s885_s16, 4  ;;  %912 = sbr.rel (%p6280_p3) target bundleno = 2764 (0xacc), region = 104  ;;  %s887_s7 = int_to_ptr.hbm [resolvable:$true] %s886_s7 }
  0xa1   : > { %5107 = dma.hbm_to_vmem [thread:$0]  (!%p6343_p13), %s887_s7, 2048, %s889_s18, %s875_s4, %s7676_s15, %s7699_s20, %s7698_s26  }
  0xa2   : > { %s7705_s5 = sld [smem:[#allocation60_spill]] (!%p6280_p3)  ;;  %s914_s9 = sand.u32 (!%p6280_p3), 1, %s6272_s29  }
  0xa3   : > { %s915_s25 = scalar_lea.sflag (!%p6280_p3), [#allocation21], %s914_s9 }
  0xa8   : > { %s916_s8 = sand.u32 1, %s7705_s5  }
  0xa9   : > { %s4201_s14 = sshll.u32 %s916_s8, 4 }
  0xaa   : > { %s6550_s17 = scalar_lea.vmem [#allocation20], %s4201_s14 }
  0xab   : > { %5953 = dma.done.wait (%p6406_p9), %s915_s25, 256  }
  0xac   : > { %5955 = vsyncadd (%p6406_p9), %s915_s25, 4294967040  ;;  %s7707_s21 = sld [smem:[#allocation58_spill]]  ;;  %s925_s20 = scalar_lea.sflag [#allocation24], %s914_s9 }
  0xb2   : > { %s6557_s15 = sand.u32 1, %s7707_s21  }
  0xb3   : > { %s4202_s26 = sshll.u32 %s6557_s15, 5 }
  0xb4   : > { %s6560_s3 = scalar_lea.vmem [#allocation23], %s4202_s26 }
  0xb5   : > { %5957 = dma.done.wait (%p6323_p11), %s925_s20, 1024  }
  0xb6   : > { %5959 = vsyncadd (%p6323_p11), %s925_s20, 4294966272  ;;  %s7709_s11 = sld [smem:[#allocation56_spill]]  ;;  %s6567_s30 = scalar_lea.vmem [#allocation25], %s4202_s26 }
  0xb7   : > { %s945_s0 = scalar_lea.sflag [#allocation27], %s914_s9 }
  0xbc   : > { %s946_s12 = sand.u32 1, %s7709_s11  }
  0xbd   : > { %s4204_s22 = sshll.u32 %s946_s12, 7 }
  0xbe   : > { %s6569_s2 = scalar_lea.vmem [#allocation26], %s4204_s22 }
  0xbf   : > { %5961 = dma.done.wait (%p6485_p5), %s945_s0, 2048  }
  0xc0   : > { %5963 = vsyncadd (%p6485_p5), %s945_s0, 4294965248 }
  0xc1   : > { %5965 = dma.done.wait (%p81_p1), [#allocation27], 16  }
  0xc2   : > { %5967 = vsyncadd (%p81_p1), [#allocation27], 4294967280 }
  0xc3   : > { %5969 = dma.done.wait (%p81_p1), [#allocation30], 1040  }
  0xc4   : > { %5971 = vsyncadd (%p81_p1), [#allocation30], 4294966256 }
  0xc5   : > { %5973 = dma.done.wait (%p81_p1), [#allocation33], 1024  }
  0xc6   : > { %5975 = vsyncadd (%p81_p1), [#allocation33], 4294966272  ;;  %s4209_s6 = sshll.u32 %s6557_s15, 7 }
  0xc7   : > { %s6588_s16 = scalar_lea.vmem [#allocation34], %s4209_s6 }
  0xc8   : > { %5977 = dma.done.wait (%p6323_p11), %s915_s25, 2048  }
  0xc9   : > { %5979 = vsyncadd (%p6323_p11), %s915_s25, 4294965248  ;;  %s4210_s1 = sshll.u32 %s916_s8, 7 }
  0xca   : > { %s6594_s18 = scalar_lea.vmem [#allocation35], %s4210_s1 }
  0xcb   : > { %5981 = dma.done.wait (%p6406_p9), %s925_s20, 2048  }
  0xcc   : > { %5983 = vsyncadd (%p6406_p9), %s925_s20, 4294965248 }
  0xcd   : > { %5985 = dma.done.wait (%p81_p1), [#allocation27], 1024  }
  0xce   : > { %5987 = vsyncadd (%p81_p1), [#allocation27], 4294966272 }
  0xcf   : > { %5989 = dma.done.wait (%p81_p1), [#allocation30], 1024  }
  0xd0   : > { %5991 = vsyncadd (%p81_p1), [#allocation30], 4294966272 }
  0xd1   : > { %5993 = dma.done.wait (%p81_p1), [#allocation33], 1024  }
  0xd2   : > { %5995 = vsyncadd (%p81_p1), [#allocation33], 4294966272  ;;  %s1010_s7 = scalar_lea.sflag [#allocation40], %s6557_s15  ;;  %s6613_s4 = scalar_lea.vmem [#allocation39], %s4209_s6 }
  0xd3   : > { %5997 = dma.done.wait (%p6323_p11), %s1010_s7, 2048  }
  0xd4   : > { %5999 = vsyncadd (%p6323_p11), %s1010_s7, 4294965248  ;;  %s7711_s24 = sld [smem:[#allocation63_spill]]  ;;  %v1146_v0 = vld [vmem:[%s6550_s17] sm:$0xff]  ;;  %v1147_v3 = vld [vmem:[%s6550_s17 + $0x8] sm:$0xff] }
  0xd5   : > { %s7712_s5 = sld [smem:[#allocation62_spill]]  ;;  %v6630_v1 = vld [vmem:[%s6550_s17 + $0x4] sm:$0xf]  ;;  %v6633_v2 = vld [vmem:[%s6550_s17] sm:$0xf]  ;;  %v6644_v6 = vunpack.c.l.bf16 %v1146_v0  ;;  %v6646_v7 = vunpack.c.h.bf16 %v1146_v0  ;;  %v6648_v8 = vunpack.c.l.bf16 %v1147_v3  ;;  %v6650_v9 = vunpack.c.h.bf16 %v1147_v3 }
  0xd6   : > { %v6639_v4 = vld [vmem:[%s6550_s17 + $0x8] sm:$0xf0]  ;;  %v6642_v5 = vld [vmem:[%s6550_s17 + $0x4] sm:$0xf0]  ;;  %s7714_s21 = sld [smem:[#allocation87_spill]] }
  0xd7   : > { %s7715_s20 = sld [smem:[#allocation97_spill]] }
  0xda   : > { %p1123_p1 = scmp.eq.s32.totalorder %s7711_s24, 0 }
  0xdb   : > { %p1153_p3 = scmp.eq.s32.totalorder %s7712_s5, 0 }
  0xdc   : > { %s1124_s19 = scalar_select %p1123_p1, 0, %s7712_s5 }
  0xdd   : > { %p6624_p12 = pnand %p1153_p3, %p1123_p1 }
  0xde   : > { %s4215_s8 = sshll.u32 %s1124_s19, 1 }
  0xdf   : > { %p1126_p11 = scmp.lt.s32.totalorder %s4215_s8, 3  ;;  %1157 = sbr.rel (%p6624_p12) target bundleno = 253 (0xfd), region = 164 }
  0xe1   : > { %s7802_s8 = smov (!%p1126_p11, %s4215_s8), 3 }
  0xe2   : > { %s1128_s13 = scalar_lea.vmem %s7714_s21, %s7802_s8  ;;  %s1141_s11 = scalar_lea.vmem %s7715_s20, %s7802_s8 }
  0xe4   : > { %vm1158_vm0 = vcmask 7168   ;;  %v6074_v10 = vmov 0.0   ;;  %v6075_v11 = vmov -inf  }
  0xe5   : > { %1159 = vst.msk [vmem:[#allocation2] sm:$0xff] %vm1158_vm0, %v6074_v10 }
  0xe6   : > { %1160 = vst.msk [vmem:[#allocation2 + $0x8] sm:$0xff] %vm1158_vm0, %v6074_v10 }
  0xe7   : > { %1161 = vst [vmem:[#allocation3] sm:$0xff] %v6074_v10 }
  0xe8   : > { %1162 = vst [vmem:[#allocation3 + $0x8] sm:$0xff] %v6074_v10 }
  0xe9   : > { %1163 = vst [vmem:[#allocation4 + $0x8] sm:$0xff] %v6074_v10 }
  0xea   : > { %1164 = vst [vmem:[#allocation4] sm:$0xff] %v6074_v10 }
  0xeb   : > { %1165 = vst [vmem:[#allocation9] sm:$0xff] %v6074_v10 }
  0xec   : > { %1166 = vst [vmem:[#allocation9 + $0x8] sm:$0xff] %v6074_v10 }
  0xed   : > { %1167 = vst [vmem:[#allocation10 + $0x8] sm:$0xff] %v6074_v10 }
  0xee   : > { %1168 = vst [vmem:[#allocation10] sm:$0xff] %v6074_v10 }
  0xef   : > { %1169 = vst.msk [vmem:[#allocation11] sm:$0xff] %vm1158_vm0, %v6074_v10 }
  0xf0   : > { %1170 = vst.msk [vmem:[#allocation11 + $0x8] sm:$0xff] %vm1158_vm0, %v6074_v10 }
  0xf1   : > { %1171 = vst.msk [vmem:[#allocation12] sm:$0xff] %vm1158_vm0, %v6074_v10 }
  0xf2   : > { %1172 = vst.msk [vmem:[#allocation12 + $0x8] sm:$0xff] %vm1158_vm0, %v6074_v10 }
  0xf3   : > { %1173 = vst.msk [vmem:[#allocation13] sm:$0xff] %vm1158_vm0, %v6074_v10 }
  0xf4   : > { %1174 = vst.msk [vmem:[#allocation13 + $0x8] sm:$0xff] %vm1158_vm0, %v6074_v10 }
  0xf5   : > { %1175 = vst.msk [vmem:[#allocation14] sm:$0xff] %vm1158_vm0, %v6074_v10 }
  0xf6   : > { %1176 = vst.msk [vmem:[#allocation14 + $0x8] sm:$0xff] %vm1158_vm0, %v6074_v10 }
  0xf7   : > { %1177 = vst.msk [vmem:[#allocation16] sm:$0xff] %vm1158_vm0, %v6074_v10 }
  0xf8   : > { %1178 = vst.msk [vmem:[#allocation16 + $0x8] sm:$0xff] %vm1158_vm0, %v6074_v10 }
  0xf9   : > { %1179 = vst.msk [vmem:[#allocation17] sm:$0xff] %vm1158_vm0, %v6074_v10 }
  0xfa   : > { %1180 = vst.msk [vmem:[#allocation17 + $0x8] sm:$0xff] %vm1158_vm0, %v6074_v10 }
  0xfb   : > { %1181 = vst.msk [vmem:[#allocation15] sm:$0xff] %vm1158_vm0, %v6075_v11 }
  0xfc   : > { %1182 = vst.msk [vmem:[#allocation15 + $0x8] sm:$0xff] %vm1158_vm0, %v6075_v11 }
  0xfd PF: > { %s7716_s17 = sld [smem:[#allocation63_spill]] }
 0x103   : > { %p4217_p13 = scmp.ne.s32.totalorder %s7716_s17, 0 }
 0x105   : > { %1185 = sbr.rel (%p4217_p13) target bundleno = 446 (0x1be), region = 168 }
 0x10a   : > { %v4841_v12 = vld [vmem:[%s6569_s2 + $0x38] sm:$0xff]  ;;  %v4840_v16 = vld [vmem:[%s6569_s2 + $0x30] sm:$0xff]  ;;  %v1188_v18 = vadd.f32 %v6646_v7, %v6644_v6  ;;  %v4839_v21 = vld [vmem:[%s6569_s2 + $0x28] sm:$0xff]  ;;  %v1191_v25 = vadd.f32 %v6650_v9, %v6648_v8  ;;  %v4221_v46 = vor.u32 %v6642_v5, %v6633_v2  ;;  %v4225_v47 = vor.u32 %v6630_v1, %v6639_v4 }
 0x10b   : > { %v4849_v13 = vld [vmem:[%s6569_s2 + $0x78] sm:$0xff]  ;;  %1339 = vmatpush.bf16.msra.mxu0 %v4841_v12  ;;  %v4848_v17 = vld [vmem:[%s6569_s2 + $0x70] sm:$0xff]  ;;  %v4847_v22 = vld [vmem:[%s6569_s2 + $0x68] sm:$0xff]  ;;  %vm1196_vm1 = vcmask 7168  }
 0x10c   : > { %v4857_v14 = vld [vmem:[%s6594_s18 + $0x38] sm:$0xff]  ;;  %1353 = vmatpush.bf16.msra.mxu1 %v4849_v13  ;;  %v4856_v19 = vld [vmem:[%s6594_s18 + $0x30] sm:$0xff]  ;;  %1189 = vadd.xlane.f32.xlu0 %v1188_v18  ;;  %v4855_v23 = vld [vmem:[%s6594_s18 + $0x28] sm:$0xff] }
 0x10d   : > { %v4865_v15 = vld [vmem:[%s6594_s18 + $0x78] sm:$0xff]  ;;  %1501 = vmatpush.bf16.msra.mxu2 %v4857_v14  ;;  %v4864_v20 = vld [vmem:[%s6594_s18 + $0x70] sm:$0xff]  ;;  %v4863_v24 = vld [vmem:[%s6594_s18 + $0x68] sm:$0xff] }
 0x10e   : > { %1515 = vmatpush.bf16.msra.mxu3 %v4865_v15  ;;  %v4838_v26 = vld [vmem:[%s6569_s2 + $0x20] sm:$0xff]  ;;  %v4837_v30 = vld [vmem:[%s6569_s2 + $0x18] sm:$0xff]  ;;  %v4836_v34 = vld [vmem:[%s6569_s2 + $0x10] sm:$0xff] }
 0x10f   : > { %1340 = vmatpush.bf16.msra.mxu0 %v4840_v16  ;;  %v4846_v27 = vld [vmem:[%s6569_s2 + $0x60] sm:$0xff]  ;;  %v4845_v31 = vld [vmem:[%s6569_s2 + $0x58] sm:$0xff]  ;;  %v4844_v35 = vld [vmem:[%s6569_s2 + $0x50] sm:$0xff] }
 0x110   : > { %1354 = vmatpush.bf16.msra.mxu1 %v4848_v17  ;;  %v4854_v28 = vld [vmem:[%s6594_s18 + $0x20] sm:$0xff]  ;;  %v4853_v32 = vld [vmem:[%s6594_s18 + $0x18] sm:$0xff]  ;;  %v4852_v36 = vld [vmem:[%s6594_s18 + $0x10] sm:$0xff] }
 0x111   : > { %1502 = vmatpush.bf16.msra.mxu2 %v4856_v19  ;;  %v4862_v29 = vld [vmem:[%s6594_s18 + $0x60] sm:$0xff]  ;;  %v4861_v33 = vld [vmem:[%s6594_s18 + $0x58] sm:$0xff]  ;;  %v4860_v37 = vld [vmem:[%s6594_s18 + $0x50] sm:$0xff] }
 0x112   : > { %1516 = vmatpush.bf16.msra.mxu3 %v4864_v20  ;;  %v4835_v38 = vld [vmem:[%s6569_s2 + $0x8] sm:$0xff]  ;;  %v4834_v42 = vld [vmem:[%s6569_s2] sm:$0xff]  ;;  %v1186_v49 = vld [vmem:[#allocation2] sm:$0xff] }
 0x113   : > { %1341 = vmatpush.bf16.msra.mxu0 %v4839_v21  ;;  %v4843_v39 = vld [vmem:[%s6569_s2 + $0x48] sm:$0xff]  ;;  %v4842_v43 = vld [vmem:[%s6569_s2 + $0x40] sm:$0xff]  ;;  %v1187_v52 = vld [vmem:[#allocation2 + $0x8] sm:$0xff] }
 0x114   : > { %1355 = vmatpush.bf16.msra.mxu1 %v4847_v22  ;;  %1192 = vadd.xlane.f32.xlu0 %v1191_v25  ;;  %v4851_v40 = vld [vmem:[%s6594_s18 + $0x8] sm:$0xff]  ;;  %v4850_v44 = vld [vmem:[%s6594_s18] sm:$0xff]  ;;  %v1371_v60 = vld [vmem:[#allocation4 + $0x8] sm:$0xff] }
 0x115   : > { %1503 = vmatpush.bf16.msra.mxu2 %v4855_v23  ;;  %v4859_v41 = vld [vmem:[%s6594_s18 + $0x48] sm:$0xff]  ;;  %v4858_v45 = vld [vmem:[%s6594_s18 + $0x40] sm:$0xff] }
 0x116   : > { %1517 = vmatpush.bf16.msra.mxu3 %v4863_v24  ;;  %v1199_v55 = vld [vmem:[#allocation3] sm:$0xff]  ;;  %v1200_v0 = vld [vmem:[#allocation3 + $0x8] sm:$0xff]  ;;  %v1372_v10 = vld [vmem:[#allocation4] sm:$0xff] }
 0x117   : > { %1342 = vmatpush.bf16.msra.mxu0 %v4838_v26 }
 0x118   : > { %1356 = vmatpush.bf16.msra.mxu1 %v4846_v27 }
 0x119   : > { %1504 = vmatpush.bf16.msra.mxu2 %v4854_v28 }
 0x11a   : > { %1518 = vmatpush.bf16.msra.mxu3 %v4862_v29 }
 0x11b   : > { %1343 = vmatpush.bf16.msra.mxu0 %v4837_v30 }
 0x11c   : > { %1357 = vmatpush.bf16.msra.mxu1 %v4845_v31 }
 0x11d   : > { %1505 = vmatpush.bf16.msra.mxu2 %v4853_v32 }
 0x11e   : > { %1519 = vmatpush.bf16.msra.mxu3 %v4861_v33 }
 0x11f   : > { %1344 = vmatpush.bf16.msra.mxu0 %v4836_v34 }
 0x120   : > { %1358 = vmatpush.bf16.msra.mxu1 %v4844_v35 }
 0x121   : > { %1506 = vmatpush.bf16.msra.mxu2 %v4852_v36 }
 0x122   : > { %1520 = vmatpush.bf16.msra.mxu3 %v4860_v37 }
 0x123   : > { %1345 = vmatpush.bf16.msra.mxu0 %v4835_v38 }
 0x124   : > { %1359 = vmatpush.bf16.msra.mxu1 %v4843_v39 }
 0x125   : > { %1507 = vmatpush.bf16.msra.mxu2 %v4851_v40 }
 0x126   : > { %1521 = vmatpush.bf16.msra.mxu3 %v4859_v41 }
 0x127   : > { %1346 = vmatpush.bf16.msra.mxu0 %v4834_v42 }
 0x128   : > { %1360 = vmatpush.bf16.msra.mxu1 %v4842_v43 }
 0x129   : > { %1508 = vmatpush.bf16.msra.mxu2 %v4850_v44 }
 0x12a   : > { %1522 = vmatpush.bf16.msra.mxu3 %v4858_v45  ;;  %1347 = vmatmul.bf16.vlgmr.msra.gmra.mxu0 %v4221_v46 }
 0x12b   : > { %1361 = vmatmul.bf16.vlgmr.msra.gmra.mxu1 %v4225_v47 }
 0x12c   : > { %1509 = vmatmul.bf16.vlgmr.msra.gmra.mxu2 %v4221_v46 }
 0x12d   : > { %1523 = vmatmul.bf16.vlgmr.msra.gmra.mxu3 %v4225_v47 }
 0x17f   : > { %v1190_v48 = vpop.xlane.xlu0 %1189 }
 0x180   : > { %v1194_v50 = vadd.f32 %v1190_v48, %v1186_v49 }
 0x182   : > { %1197 = vst.msk [vmem:[#allocation2] sm:$0xff] %vm1196_vm1, %v1194_v50 }
 0x187   : > { %v1193_v51 = vpop.xlane.xlu0 %1192 }
 0x188   : > { %v1195_v53 = vadd.f32 %v1193_v51, %v1187_v52 }
 0x18a   : > { %1198 = vst.msk [vmem:[#allocation2 + $0x8] sm:$0xff] %vm1196_vm1, %v1195_v53 }
 0x1a7   : > { %v1348_v54 = vpop.f32.mrf.mxu0 }
 0x1a8   : > { %v1362_v56 = vpop.f32.mrf.mxu1 }
 0x1a9   : > { %v1363_v57 = vadd.f32 %v1362_v56, %v1348_v54 }
 0x1ab   : > { %v1367_v58 = vadd.f32 %v1363_v57, %v1199_v55 }
 0x1ad   : > { %1369 = vst [vmem:[#allocation3] sm:$0xff] %v1367_v58 }
 0x1af   : > { %v1510_v59 = vpop.f32.mrf.mxu2  ;;  %v1350_v63 = vpop.f32.mrf.mxu0 }
 0x1b0   : > { %v1524_v61 = vpop.f32.mrf.mxu3  ;;  %v1364_v1 = vpop.f32.mrf.mxu1 }
 0x1b1   : > { %v1525_v62 = vadd.f32 %v1524_v61, %v1510_v59  ;;  %v1365_v2 = vadd.f32 %v1364_v1, %v1350_v63 }
 0x1b3   : > { %v1529_v3 = vadd.f32 %v1525_v62, %v1371_v60  ;;  %v1368_v4 = vadd.f32 %v1365_v2, %v1200_v0 }
 0x1b5   : > { %1531 = vst [vmem:[#allocation4 + $0x8] sm:$0xff] %v1529_v3 }
 0x1b6   : > { %1370 = vst [vmem:[#allocation3 + $0x8] sm:$0xff] %v1368_v4 }
 0x1b7   : > { %v1512_v5 = vpop.f32.mrf.mxu2 }
 0x1b8   : > { %v1526_v11 = vpop.f32.mrf.mxu3 }
 0x1b9   : > { %v1527_v12 = vadd.f32 %v1526_v11, %v1512_v5 }
 0x1bb   : > { %v1530_v13 = vadd.f32 %v1527_v12, %v1372_v10 }
 0x1bd   : > { %1532 = vst [vmem:[#allocation4] sm:$0xff] %v1530_v13 }
 0x1be PF: > { %s7717_s10 = sld [smem:[#allocation63_spill]] }
 0x1c4   : > { %p1533_p9 = scmp.eq.s32.totalorder %s7717_s10, 1 }
 0x1c6   : > { %p1534_p2 = pnand %p1533_p9, %p1153_p3 }
 0x1c7   : > { %s7719_s2 = sld [smem:[#allocation89_spill]] (!%p1534_p2) }
 0x1c8   : > { %1537 = sbr.rel (%p1534_p2) target bundleno = 909 (0x38d), region = 172  ;;  %s7720_s7 = sld [smem:[#allocation91_spill]] (!%p1534_p2) }
 0x1c9   : > { %s7721_s19 = sld [smem:[#allocation93_spill]] (!%p1534_p2) }
 0x1ca   : > { %s7722_s25 = sld [smem:[#allocation85_spill]] (!%p1534_p2) }
 0x1cb   : > { %s7723_s26 = sld [smem:[#allocation95_spill]] (!%p1534_p2) }
 0x1cd   : > { %v1538_v14 = vld [vmem:[#allocation2] sm:$0xff]  ;;  %v1539_v15 = vld [vmem:[#allocation2 + $0x8] sm:$0xff]  ;;  %v6076_v17 = vmov 0   ;;  %v4870_v42 = vld [vmem:[#allocation29 + $0x20] sm:$0xff] }
 0x1ce   : > { %v4873_v16 = vld [vmem:[#allocation29 + $0x38] sm:$0xff]  ;;  %5260 = vset.pattern.permute.xlu0 %v6076_v17  ;;  %v1540_v18 = vadd.f32 1e-12, %v1538_v14  ;;  %v1541_v19 = vadd.f32 1e-12, %v1539_v15  ;;  %v4872_v22 = vld [vmem:[#allocation29 + $0x30] sm:$0xff] }
 0x1cf   : > { %v4889_v20 = vld [vmem:[#allocation36 + $0x38] sm:$0xff]  ;;  %1653 = vmatpush.bf16.msra.mxu0 %v4873_v16  ;;  %v4888_v23 = vld [vmem:[#allocation36 + $0x30] sm:$0xff]  ;;  %v4871_v25 = vld [vmem:[#allocation29 + $0x28] sm:$0xff] }
 0x1d0   : > { %v4897_v21 = vld [vmem:[#allocation37 + $0x38] sm:$0xff]  ;;  %5268 = vrsqrt.f32 %v1540_v18  ;;  %1837 = vmatpush.bf16.msra.mxu2 %v4889_v20  ;;  %v4896_v24 = vld [vmem:[#allocation37 + $0x30] sm:$0xff]  ;;  %v4887_v26 = vld [vmem:[#allocation36 + $0x28] sm:$0xff]  ;;  %vm1548_vm2 = vweird.f32 %v1540_v18  ;;  %vm1558_vm5 = vweird.f32 %v1541_v19 }
 0x1d1   : > { %1921 = vmatpush.bf16.msra.mxu3 %v4897_v21  ;;  %5270 = vrsqrt.f32 %v1541_v19  ;;  %v4895_v27 = vld [vmem:[#allocation37 + $0x28] sm:$0xff]  ;;  %v4886_v43 = vld [vmem:[#allocation36 + $0x20] sm:$0xff]  ;;  %v4869_v45 = vld [vmem:[#allocation29 + $0x18] sm:$0xff] }
 0x1d2   : > { %v4894_v44 = vld [vmem:[#allocation37 + $0x20] sm:$0xff]  ;;  %v4885_v46 = vld [vmem:[#allocation36 + $0x18] sm:$0xff]  ;;  %v4868_v48 = vld [vmem:[#allocation29 + $0x10] sm:$0xff] }
 0x1d3   : > { %1654 = vmatpush.bf16.msra.mxu0 %v4872_v22  ;;  %v4893_v47 = vld [vmem:[#allocation37 + $0x18] sm:$0xff]  ;;  %v4884_v49 = vld [vmem:[#allocation36 + $0x10] sm:$0xff]  ;;  %v4867_v51 = vld [vmem:[#allocation29 + $0x8] sm:$0xff] }
 0x1d4   : > { %1838 = vmatpush.bf16.msra.mxu2 %v4888_v23  ;;  %v4892_v50 = vld [vmem:[#allocation37 + $0x10] sm:$0xff]  ;;  %v4883_v52 = vld [vmem:[#allocation36 + $0x8] sm:$0xff]  ;;  %v4866_v54 = vld [vmem:[#allocation29] sm:$0xff] }
 0x1d5   : > { %1922 = vmatpush.bf16.msra.mxu3 %v4896_v24  ;;  %v4891_v53 = vld [vmem:[#allocation37 + $0x8] sm:$0xff]  ;;  %v4882_v55 = vld [vmem:[#allocation36] sm:$0xff]  ;;  %v4881_v57 = vld [vmem:[#allocation32 + $0x38] sm:$0xff] }
 0x1d6   : > { %v5269_v28 = vpop.eup %5268  ;;  %v4890_v56 = vld [vmem:[#allocation37] sm:$0xff]  ;;  %v4905_v58 = vld [vmem:[#allocation38 + $0x38] sm:$0xff]  ;;  %1736 = vmatpush.bf16.msra.mxu1 %v4881_v57  ;;  %v4880_v59 = vld [vmem:[#allocation32 + $0x30] sm:$0xff] }
 0x1d7   : > { %v5271_v29 = vpop.eup %5270  ;;  %v1543_v30 = vmul.f32 %v5269_v28, %v1540_v18  ;;  %1655 = vmatpush.bf16.msra.mxu0 %v4871_v25  ;;  %vm1549_vm3 = vweird.f32 %v5269_v28  ;;  %v4904_v60 = vld [vmem:[#allocation38 + $0x30] sm:$0xff]  ;;  %v4879_v61 = vld [vmem:[#allocation32 + $0x28] sm:$0xff]  ;;  %v1562_v63 = vld [vmem:[#allocation3] sm:$0xff] }
 0x1d8   : > { %v1553_v31 = vmul.f32 %v5271_v29, %v1541_v19  ;;  %1839 = vmatpush.bf16.msra.mxu2 %v4887_v26  ;;  %vm1550_vm4 = vmor %vm1548_vm2, %vm1549_vm3  ;;  %vm1559_vm6 = vweird.f32 %v5271_v29  ;;  %v4903_v62 = vld [vmem:[#allocation38 + $0x28] sm:$0xff]  ;;  %v1756_v1 = vld [vmem:[#allocation4 + $0x8] sm:$0xff] }
 0x1d9   : > { %1923 = vmatpush.bf16.msra.mxu3 %v4895_v27  ;;  %v1544_v32 = vmul.f32 %v5269_v28, %v1543_v30  ;;  %vm1560_vm7 = vmor %vm1558_vm5, %vm1559_vm6  ;;  %v4878_v2 = vld [vmem:[#allocation32 + $0x20] sm:$0xff]  ;;  %v5261_v3 = vld [vmem:[#allocation28] ss:$0 sm:$0xff] }
 0x1da   : > { %v1554_v33 = vmul.f32 %v5271_v29, %v1553_v31  ;;  %1737 = vmatpush.bf16.msra.mxu1 %v4880_v59  ;;  %v5262_v5 = vld [vmem:[%s7719_s2] ss:$0 sm:$0xff]  ;;  %v4877_v11 = vld [vmem:[#allocation32 + $0x18] sm:$0xff]  ;;  %v1563_v12 = vld [vmem:[#allocation3 + $0x8] sm:$0xff] }
 0x1db   : > { %v1545_v34 = vmul.f32 0.5, %v1544_v32  ;;  %1656 = vmatpush.bf16.msra.mxu0 %v4870_v42  ;;  %v1757_v13 = vld [vmem:[#allocation4] sm:$0xff]  ;;  %v4902_v27 = vld [vmem:[#allocation38 + $0x20] sm:$0xff] }
 0x1dc   : > { %v1555_v35 = vmul.f32 0.5, %v1554_v33  ;;  %1840 = vmatpush.bf16.msra.mxu2 %v4886_v43  ;;  %v4875_v30 = vld [vmem:[#allocation32 + $0x8] sm:$0xff]  ;;  %v4900_v31 = vld [vmem:[#allocation38 + $0x10] sm:$0xff]  ;;  %v4874_v32 = vld [vmem:[#allocation32] sm:$0xff] }
 0x1dd   : > { %v1546_v36 = vsub.f32 1.5, %v1545_v34  ;;  %1924 = vmatpush.bf16.msra.mxu3 %v4894_v44  ;;  %v4899_v33 = vld [vmem:[#allocation38 + $0x8] sm:$0xff]  ;;  %v4898_v34 = vld [vmem:[#allocation38] sm:$0xff] }
 0x1de   : > { %v1556_v38 = vsub.f32 1.5, %v1555_v35  ;;  %1738 = vmatpush.bf16.msra.mxu1 %v4879_v61  ;;  %v5267_v57 = vld [vmem:[%s7723_s26] ss:$0 sm:$0xff] }
 0x1df   : > { %v1547_v37 = vmul.f32 %v5269_v28, %v1546_v36  ;;  %1657 = vmatpush.bf16.msra.mxu0 %v4869_v45  ;;  %v5264_v36 = vld [vmem:[%s7720_s7] ss:$0 sm:$0xff] }
 0x1e0   : > { %v1557_v40 = vmul.f32 %v5271_v29, %v1556_v38  ;;  %1841 = vmatpush.bf16.msra.mxu2 %v4885_v46  ;;  %v5263_v38 = vld [vmem:[#allocation31] ss:$0 sm:$0xff] }
 0x1e1   : > { %v1551_v39 = vsel %vm1550_vm4, %v5269_v28, %v1547_v37  ;;  %1925 = vmatpush.bf16.msra.mxu3 %v4893_v47  ;;  %v4876_v28 = vld [vmem:[#allocation32 + $0x10] sm:$0xff]  ;;  %v5265_v37 = vld [vmem:[%s7721_s19] ss:$0 sm:$0xff] }
 0x1e2   : > { %1566 = vperm.xlu0 %5260, %v1551_v39   ;;  %v1561_v41 = vsel %vm1560_vm7, %v5271_v29, %v1557_v40  ;;  %1739 = vmatpush.bf16.msra.mxu1 %v4878_v2  ;;  %v4901_v29 = vld [vmem:[#allocation38 + $0x18] sm:$0xff] }
 0x1e3   : > { %1658 = vmatpush.bf16.msra.mxu0 %v4868_v48 }
 0x1e4   : > { %1842 = vmatpush.bf16.msra.mxu2 %v4884_v49 }
 0x1e5   : > { %1926 = vmatpush.bf16.msra.mxu3 %v4892_v50 }
 0x1e6   : > { %1740 = vmatpush.bf16.msra.mxu1 %v4877_v11 }
 0x1e7   : > { %1659 = vmatpush.bf16.msra.mxu0 %v4867_v51 }
 0x1e8   : > { %1843 = vmatpush.bf16.msra.mxu2 %v4883_v52 }
 0x1e9   : > { %1927 = vmatpush.bf16.msra.mxu3 %v4891_v53  ;;  %v5266_v53 = vld [vmem:[%s7722_s25] ss:$0 sm:$0xff] }
 0x1ea   : > { %1571 = vperm.xlu0 %5260, %v1561_v41   ;;  %1741 = vmatpush.bf16.msra.mxu1 %v4876_v28 }
 0x1eb   : > { %1660 = vmatpush.bf16.msra.mxu0 %v4866_v54 }
 0x1ec   : > { %1844 = vmatpush.bf16.msra.mxu2 %v4882_v55 }
 0x1ed   : > { %1928 = vmatpush.bf16.msra.mxu3 %v4890_v56 }
 0x1ee   : > { %1742 = vmatpush.bf16.msra.mxu1 %v4875_v30 }
 0x1ef   : > { %2006 = vmatpush.bf16.msrb.mxu0 %v4905_v58 }
 0x1f2   : > { %1743 = vmatpush.bf16.msra.mxu1 %v4874_v32 }
 0x1f3   : > { %2007 = vmatpush.bf16.msrb.mxu0 %v4904_v60 }
 0x1f7   : > { %2008 = vmatpush.bf16.msrb.mxu0 %v4903_v62 }
 0x1fb   : > { %2009 = vmatpush.bf16.msrb.mxu0 %v4902_v27 }
 0x1ff   : > { %2010 = vmatpush.bf16.msrb.mxu0 %v4901_v29 }
 0x203   : > { %2011 = vmatpush.bf16.msrb.mxu0 %v4900_v31 }
 0x207   : > { %2012 = vmatpush.bf16.msrb.mxu0 %v4899_v33 }
 0x20b   : > { %2013 = vmatpush.bf16.msrb.mxu0 %v4898_v34 }
 0x254   : > { %v1567_v0 = vpop.permute.xlu0 %1566 }
 0x255   : > { %v1574_v4 = vmul.f32 %v1567_v0, %v1562_v63  ;;  %v1758_v10 = vmul.f32 %v1756_v1, %v1567_v0 }
 0x257   : > { %v1580_v14 = vadd.f32 %v5261_v3, %v1574_v4  ;;  %v1764_v15 = vadd.f32 %v5262_v5, %v1758_v10 }
 0x259   : > { %5272 = vtanh.f32 %v1580_v14 }
 0x25a   : > { %5274 = vtanh.f32 %v1764_v15 }
 0x25c   : > { %v1572_v16 = vpop.permute.xlu0 %1571 }
 0x25d   : > { %v1575_v17 = vmul.f32 %v1572_v16, %v1563_v12  ;;  %v1759_v18 = vmul.f32 %v1757_v13, %v1572_v16 }
 0x25f   : > { %v1581_v19 = vadd.f32 %v5261_v3, %v1575_v17  ;;  %v1765_v20 = vadd.f32 %v5262_v5, %v1759_v18  ;;  %v5273_v21 = vpop.eup %5272 }
 0x260   : > { %v5275_v22 = vpop.eup %5274 }
 0x261   : > { %5276 = vtanh.f32 %v1581_v19 }
 0x262   : > { %5278 = vtanh.f32 %v1765_v20 }
 0x267   : > { %v5277_v23 = vpop.eup %5276 }
 0x268   : > { %v5279_v24 = vpop.eup %5278  ;;  %v1584_v25 = vpack.c.bf16 %v5277_v23, %v5273_v21 }
 0x269   : > { %v1768_v26 = vpack.c.bf16 %v5279_v24, %v5275_v22 }
 0x26a   : > { %1661 = vmatmul.bf16.vlgmr.msra.gmra.mxu0 %v1584_v25 }
 0x26b   : > { %1845 = vmatmul.bf16.vlgmr.msra.gmra.mxu2 %v1768_v26  ;;  %1929 = vmatmul.bf16.vlgmr.msra.gmra.mxu3 %v1768_v26 }
 0x2e7   : > { %v1662_v35 = vpop.f32.mrf.mxu0 }
 0x2e8   : > { %v1663_v44 = vadd.f32 %v5263_v38, %v1662_v35 }
 0x2ee   : > { %v1846_v39 = vpop.f32.mrf.mxu2  ;;  %v1930_v40 = vpop.f32.mrf.mxu3 }
 0x2ef   : > { %v1847_v41 = vadd.f32 %v5264_v36, %v1846_v39  ;;  %v1931_v42 = vadd.f32 %v5265_v37, %v1930_v40  ;;  %v1664_v43 = vpop.f32.mrf.mxu0 }
 0x2f0   : > { %v1665_v45 = vadd.f32 %v5263_v38, %v1664_v43 }
 0x2f1   : > { %1851 = vst [vmem:[#allocation7 + $0x8] sm:$0xff] %v1847_v41 }
 0x2f2   : > { %1935 = vst [vmem:[#allocation8] sm:$0xff] %v1931_v42  ;;  %v1667_v46 = vpack.c.bf16 %v1665_v45, %v1663_v44 }
 0x2f4   : > { %1744 = vmatmul.bf16.vlgmr.msra.gmra.mxu1 %v1667_v46 }
 0x2f6   : > { %v1848_v47 = vpop.f32.mrf.mxu2  ;;  %v1932_v48 = vpop.f32.mrf.mxu3 }
 0x2f7   : > { %v1849_v49 = vadd.f32 %v5264_v36, %v1848_v47  ;;  %v1933_v50 = vadd.f32 %v5265_v37, %v1932_v48 }
 0x2f9   : > { %1852 = vst [vmem:[#allocation7] sm:$0xff] %v1849_v49  ;;  %v1937_v51 = vpack.c.bf16 %v1849_v49, %v1847_v41 }
 0x2fa   : > { %1936 = vst [vmem:[#allocation8 + $0x8] sm:$0xff] %v1933_v50 }
 0x2fb   : > { %2014 = vmatmul.bf16.vlgmr.msrb.gmra.mxu0 %v1937_v51 }
 0x371   : > { %v1745_v52 = vpop.f32.mrf.mxu1 }
 0x372   : > { %v1746_v54 = vadd.f32 %v5266_v53, %v1745_v52 }
 0x374   : > { %5280 = vtanh.f32 %v1746_v54 }
 0x378   : > { %v2015_v55 = vpop.f32.mrf.mxu0 }
 0x379   : > { %v1747_v56 = vpop.f32.mrf.mxu1  ;;  %v2016_v59 = vadd.f32 %v5267_v57, %v2015_v55 }
 0x37a   : > { %v1748_v58 = vadd.f32 %v5266_v53, %v1747_v56  ;;  %v5281_v61 = vpop.eup %5280 }
 0x37c   : > { %5282 = vtanh.f32 %v1748_v58 }
 0x37d   : > { %5284 = vtanh.f32 %v2016_v59 }
 0x380   : > { %v2017_v60 = vpop.f32.mrf.mxu0 }
 0x381   : > { %v2018_v62 = vadd.f32 %v5267_v57, %v2017_v60 }
 0x382   : > { %v5283_v63 = vpop.eup %5282 }
 0x383   : > { %v4983_v0 = vpack.c.bf16 %v5283_v63, %v5281_v61  ;;  %5286 = vtanh.f32 %v2018_v62  ;;  %v5285_v1 = vpop.eup %5284 }
 0x385   : > { %4984 = vst [vmem:[#allocation5] sm:$0xff] %v4983_v0  }
 0x389   : > { %v5287_v2 = vpop.eup %5286 }
 0x38a   : > { %v4988_v3 = vpack.c.bf16 %v5287_v2, %v5285_v1 }
 0x38c   : > { %4989 = vst [vmem:[#allocation6] sm:$0xff] %v4988_v3  }
 0x38d PF: > { %s7724_s20 = sld [smem:[#allocation63_spill]] }
 0x393   : > { %p4514_p10 = scmp.ne.s32.totalorder %s7724_s20, 1 }
 0x395   : > { %2028 = sbr.rel (%p4514_p10) target bundleno = 1667 (0x683), region = 176 }
 0x39a   : > { %v4577_v4 = vld [vmem:[%s6588_s16 + $0x70] sm:$0xf]  ;;  %v4922_v5 = vld [vmem:[%s6588_s16 + $0x74] sm:$0xf0]  ;;  %v4921_v10 = vld [vmem:[%s6588_s16 + $0x74] sm:$0xf] }
 0x39b   : > { %v4578_v11 = vor.u32 %v4922_v5, %v4577_v4  ;;  %v4579_v12 = vld [vmem:[%s6588_s16 + $0x78] sm:$0xf0]  ;;  %v4569_v13 = vld [vmem:[%s6588_s16 + $0x60] sm:$0xf]  ;;  %v4920_v14 = vld [vmem:[%s6588_s16 + $0x64] sm:$0xf0] }
 0x39c   : > { %v4582_v15 = vor.u32 %v4921_v10, %v4579_v12  ;;  %v4919_v16 = vld [vmem:[%s6588_s16 + $0x64] sm:$0xf]  ;;  %v4571_v17 = vld [vmem:[%s6588_s16 + $0x68] sm:$0xf0]  ;;  %v4570_v18 = vor.u32 %v4920_v14, %v4569_v13  ;;  %v4561_v20 = vld [vmem:[%s6588_s16 + $0x50] sm:$0xf] }
 0x39d   : > { %2143 = vmatpush.bf16.msra.mxu0 %v4578_v11  ;;  %v4574_v19 = vor.u32 %v4919_v16, %v4571_v17  ;;  %v4918_v21 = vld [vmem:[%s6588_s16 + $0x54] sm:$0xf0]  ;;  %v4917_v22 = vld [vmem:[%s6588_s16 + $0x54] sm:$0xf]  ;;  %v4563_v23 = vld [vmem:[%s6588_s16 + $0x58] sm:$0xf0] }
 0x39e   : > { %2157 = vmatpush.bf16.msra.mxu1 %v4582_v15  ;;  %v4562_v24 = vor.u32 %v4918_v21, %v4561_v20  ;;  %v4566_v25 = vor.u32 %v4917_v22, %v4563_v23  ;;  %v4553_v26 = vld [vmem:[%s6588_s16 + $0x40] sm:$0xf]  ;;  %v4916_v27 = vld [vmem:[%s6588_s16 + $0x44] sm:$0xf0]  ;;  %v4915_v28 = vld [vmem:[%s6588_s16 + $0x44] sm:$0xf] }
 0x39f   : > { %v4555_v29 = vld [vmem:[%s6588_s16 + $0x48] sm:$0xf0]  ;;  %v4554_v30 = vor.u32 %v4916_v27, %v4553_v26  ;;  %v4545_v32 = vld [vmem:[%s6588_s16 + $0x30] sm:$0xf]  ;;  %v4914_v33 = vld [vmem:[%s6588_s16 + $0x34] sm:$0xf0] }
 0x3a0   : > { %v4558_v31 = vor.u32 %v4915_v28, %v4555_v29  ;;  %v4913_v34 = vld [vmem:[%s6588_s16 + $0x34] sm:$0xf]  ;;  %v4547_v35 = vld [vmem:[%s6588_s16 + $0x38] sm:$0xf0]  ;;  %v4546_v36 = vor.u32 %v4914_v33, %v4545_v32  ;;  %v4537_v38 = vld [vmem:[%s6588_s16 + $0x20] sm:$0xf] }
 0x3a1   : > { %2144 = vmatpush.bf16.msra.mxu0 %v4570_v18  ;;  %v4550_v37 = vor.u32 %v4913_v34, %v4547_v35  ;;  %v4912_v39 = vld [vmem:[%s6588_s16 + $0x24] sm:$0xf0]  ;;  %v4911_v40 = vld [vmem:[%s6588_s16 + $0x24] sm:$0xf]  ;;  %v4539_v41 = vld [vmem:[%s6588_s16 + $0x28] sm:$0xf0] }
 0x3a2   : > { %2158 = vmatpush.bf16.msra.mxu1 %v4574_v19  ;;  %v4538_v42 = vor.u32 %v4912_v39, %v4537_v38  ;;  %v4542_v43 = vor.u32 %v4911_v40, %v4539_v41  ;;  %v4529_v44 = vld [vmem:[%s6588_s16 + $0x10] sm:$0xf]  ;;  %v4910_v45 = vld [vmem:[%s6588_s16 + $0x14] sm:$0xf0]  ;;  %v4909_v46 = vld [vmem:[%s6588_s16 + $0x14] sm:$0xf] }
 0x3a3   : > { %v4531_v47 = vld [vmem:[%s6588_s16 + $0x18] sm:$0xf0]  ;;  %v4530_v48 = vor.u32 %v4910_v45, %v4529_v44  ;;  %v4521_v50 = vld [vmem:[%s6588_s16] sm:$0xf]  ;;  %v4908_v51 = vld [vmem:[%s6588_s16 + $0x4] sm:$0xf0] }
 0x3a4   : > { %v4534_v49 = vor.u32 %v4909_v46, %v4531_v47  ;;  %v4907_v52 = vld [vmem:[%s6588_s16 + $0x4] sm:$0xf]  ;;  %v4523_v53 = vld [vmem:[%s6588_s16 + $0x8] sm:$0xf0]  ;;  %v4522_v54 = vor.u32 %v4908_v51, %v4521_v50  ;;  %v4906_v56 = vld [vmem:[#allocation5] sm:$0xff] }
 0x3a5   : > { %2145 = vmatpush.bf16.msra.mxu0 %v4562_v24  ;;  %v4526_v55 = vor.u32 %v4907_v52, %v4523_v53  ;;  %v2171_v57 = vld [vmem:[%s6560_s3] sm:$0xff]  ;;  %v2172_v59 = vld [vmem:[%s6560_s3 + $0x8] sm:$0xff]  ;;  %v2173_v12 = vld [vmem:[%s6560_s3 + $0x10] sm:$0xff] }
 0x3a6   : > { %2159 = vmatpush.bf16.msra.mxu1 %v4566_v25  ;;  %v2335_v58 = vld [vmem:[%s6567_s30] sm:$0xff]  ;;  %v6775_v60 = vmul.f32 0.9998, %v2171_v57  ;;  %v6779_v62 = vmul.f32 0.9998, %v2172_v59  ;;  %v2336_v63 = vld [vmem:[%s6567_s30 + $0x8] sm:$0xff] }
 0x3a7   : > { %v6777_v61 = vmul.f32 0.9998, %v2335_v58  ;;  %v6784_v2 = vmul.f32 0.9998, %v2336_v63  ;;  %v2337_v13 = vld [vmem:[%s6567_s30 + $0x10] sm:$0xff]  ;;  %v2174_v21 = vld [vmem:[%s6560_s3 + $0x18] sm:$0xff] }
 0x3a8   : > { %v2179_v0 = vsub.f32 0.9999, %v6775_v60  ;;  %v2180_v3 = vsub.f32 0.9999, %v6779_v62  ;;  %v6807_v15 = vmul.f32 0.9998, %v2173_v12 }
 0x3a9   : > { %2146 = vmatpush.bf16.msra.mxu0 %v4554_v30  ;;  %v2343_v1 = vsub.f32 0.9999, %v6777_v61  ;;  %v2344_v5 = vsub.f32 0.9999, %v6784_v2  ;;  %v6809_v16 = vmul.f32 0.9998, %v2337_v13 }
 0x3aa   : > { %2160 = vmatpush.bf16.msra.mxu1 %v4558_v31  ;;  %v6789_v4 = vsub.f32 1.0, %v2179_v0  ;;  %v6798_v11 = vsub.f32 1.0, %v2180_v3  ;;  %v2181_v17 = vsub.f32 0.9999, %v6807_v15  ;;  %v6834_v26 = vmul.f32 0.9998, %v2174_v21 }
 0x3ab   : > { %v6794_v10 = vsub.f32 1.0, %v2343_v1  ;;  %v6805_v14 = vsub.f32 1.0, %v2344_v5  ;;  %v2345_v18 = vsub.f32 0.9999, %v6809_v16  ;;  %v2338_v31 = vld [vmem:[%s6567_s30 + $0x18] sm:$0xff] }
 0x3ac   : > { %5290 = vrcp.f32 %v6789_v4  ;;  %v6820_v20 = vsub.f32 1.0, %v2181_v17  ;;  %v2182_v33 = vsub.f32 0.9999, %v6834_v26  ;;  %vm2192_vm8 = vweird.f32 %v6789_v4  ;;  %v4930_v63 = vld [vmem:[%s6594_s18 + $0x38] sm:$0xff]  ;;  %v7042_v26 = vld [vmem:[%s1128_s13] sm:$0x3] }
 0x3ad   : > { %2147 = vmatpush.bf16.msra.mxu0 %v4546_v36  ;;  %5292 = vrcp.f32 %v6794_v10  ;;  %v6831_v25 = vsub.f32 1.0, %v2345_v18  ;;  %v2198_v44 = vand.u32 2147483648, %v6789_v4  ;;  %v2362_v45 = vand.u32 2147483648, %v6794_v10  ;;  %2647 = vmatpush.bf16.msra.mxu2 %v4930_v63  ;;  %v4934_v16 = vld [vmem:[%s6594_s18 + $0x58] sm:$0xff] }
 0x3ae   : > { %2161 = vmatpush.bf16.msra.mxu1 %v4550_v37  ;;  %5294 = vrcp.f32 %v6798_v11  ;;  %v6849_v37 = vmul.f32 0.9998, %v2338_v31  ;;  %v6854_v40 = vsub.f32 1.0, %v2182_v33  ;;  %vm2356_vm10 = vweird.f32 %v6794_v10 }
 0x3af   : > { %5296 = vrcp.f32 %v6805_v14  ;;  %vm2207_vm13 = vweird.f32 %v6798_v11  ;;  %v2211_v59 = vand.u32 2147483647, %v6798_v11  ;;  %vm2371_vm0 = vweird.f32 %v6805_v14 }
 0x3b0   : > { %5298 = vrcp.f32 %v6820_v20  ;;  %v2346_v47 = vsub.f32 0.9999, %v6849_v37  ;;  %v2199_v12 = vor.u32 1.1754944e-38, %v2198_v44  ;;  %v2377_v21 = vand.u32 2147483648, %v6805_v14 }
 0x3b1   : > { %2148 = vmatpush.bf16.msra.mxu0 %v4538_v42  ;;  %5300 = vrcp.f32 %v6831_v25  ;;  %v2363_v31 = vor.u32 1.1754944e-38, %v2362_v45  ;;  %vm6931_vm6 = vcmp.eq.f32.partialorder %v2211_v59, 8.507059e+37  ;;  %vm2222_vm7 = vweird.f32 %v6820_v20 }
 0x3b2   : > { %2162 = vmatpush.bf16.msra.mxu1 %v4542_v43  ;;  %v6816_v19 = vpop.eup %5290  ;;  %5302 = vrcp.f32 %v6854_v40  ;;  %v2226_v45 = vand.u32 2147483647, %v6820_v20  ;;  %v2243_v63 = vand.u32 2147483648, %v6854_v40 }
 0x3b3   : > { %v6823_v22 = vpop.eup %5292  ;;  %v2188_v24 = vmul.f32 %v6816_v19, %v6789_v4  ;;  %vm2193_vm9 = vweird.f32 %v6816_v19 }
 0x3b4   : > { %v6825_v23 = vpop.eup %5294  ;;  %v2352_v28 = vmul.f32 %v6823_v22, %v6794_v10  ;;  %vm2357_vm11 = vweird.f32 %v6823_v22  ;;  %vm6871_vm12 = vmor %vm2192_vm8, %vm2193_vm9  ;;  %v2244_v62 = vor.u32 1.1754944e-38, %v2243_v63 }
 0x3b5   : > { %2149 = vmatpush.bf16.msra.mxu0 %v4530_v48  ;;  %v6836_v27 = vpop.eup %5296  ;;  %v2203_v29 = vmul.f32 %v6825_v23, %v6798_v11  ;;  %v2189_v30 = vsub.f32 1.0, %v2188_v24  ;;  %vm2208_vm14 = vweird.f32 %v6825_v23  ;;  %vm6883_vm15 = vmor %vm2356_vm10, %vm2357_vm11  ;;  %vm2386_vm10 = vweird.f32 %v6831_v25 }
 0x3b6   : > { %2163 = vmatpush.bf16.msra.mxu1 %v4534_v49  ;;  %v2367_v32 = vmul.f32 %v6836_v27, %v6805_v14  ;;  %v2353_v34 = vsub.f32 1.0, %v2352_v28  ;;  %v6847_v35 = vpop.eup %5298  ;;  %v2196_v49 = vand.u32 2147483647, %v6789_v4  ;;  %vm2372_vm1 = vweird.f32 %v6836_v27  ;;  %v4938_v4 = vld [vmem:[%s6594_s18 + $0x78] sm:$0xff]  ;;  %vm6900_vm2 = vmor %vm2207_vm13, %vm2208_vm14  ;;  %v4936_v28 = vld [vmem:[%s6594_s18 + $0x68] sm:$0xff] }
 0x3b7   : > { %v2204_v36 = vsub.f32 1.0, %v2203_v29  ;;  %v2190_v38 = vmul.f32 %v6816_v19, %v2189_v30  ;;  %v6856_v41 = vpop.eup %5300  ;;  %v2218_v43 = vmul.f32 %v6847_v35, %v6820_v20  ;;  %v2375_v29 = vand.u32 2147483647, %v6805_v14  ;;  %2661 = vmatpush.bf16.msra.mxu3 %v4938_v4  ;;  %vm6923_vm5 = vmor %vm2371_vm0, %vm2372_vm1  ;;  %v4927_v30 = vld [vmem:[%s6594_s18 + $0x20] sm:$0xff] }
 0x3b8   : > { %v2368_v39 = vsub.f32 1.0, %v2367_v32  ;;  %v2354_v42 = vmul.f32 %v6823_v22, %v2353_v34  ;;  %v2382_v52 = vmul.f32 %v6856_v41, %v6831_v25  ;;  %vm6905_vm3 = vcmp.eq.f32.partialorder %v2196_v49, 8.507059e+37  ;;  %v5303_v49 = vpop.eup %5302 }
 0x3b9   : > { %2150 = vmatpush.bf16.msra.mxu0 %v4522_v54  ;;  %v2205_v46 = vmul.f32 %v6825_v23, %v2204_v36  ;;  %v2191_v48 = vadd.f32 %v6816_v19, %v2190_v38  ;;  %v2360_v54 = vand.u32 2147483647, %v6794_v10  ;;  %v6939_v14 = vsub.f32 1.0, %v2346_v47 }
 0x3ba   : > { %2164 = vmatpush.bf16.msra.mxu1 %v4526_v55  ;;  %v2369_v51 = vmul.f32 %v6836_v27, %v2368_v39  ;;  %v2355_v53 = vadd.f32 %v6823_v22, %v2354_v42  ;;  %v2213_v55 = vand.u32 2147483648, %v6798_v11  ;;  %v2383_v24 = vsub.f32 1.0, %v2382_v52  ;;  %v4929_v39 = vld [vmem:[%s6594_s18 + $0x30] sm:$0xff]  ;;  %v4944_v52 = vld [vmem:[%s6594_s18 + $0x28] sm:$0xff] }
 0x3bb   : > { %v2206_v58 = vadd.f32 %v6825_v23, %v2205_v46  ;;  %v2195_v10 = vsel %vm6871_vm12, %v6816_v19, %v2191_v48  ;;  %vm6915_vm4 = vcmp.eq.f32.partialorder %v2360_v54, 8.507059e+37  ;;  %v4937_v42 = vld [vmem:[%s6594_s18 + $0x70] sm:$0xff]  ;;  %vm2223_vm8 = vweird.f32 %v6847_v35  ;;  %2648 = vmatpush.bf16.msra.mxu2 %v4929_v39 }
 0x3bc   : > { %2151 = vmatmul.bf16.vlgmr.msra.gmra.mxu0 %v4906_v56  ;;  %v2370_v19 = vadd.f32 %v6836_v27, %v2369_v51  ;;  %v2359_v11 = vsel %vm6883_vm15, %v6823_v22, %v2355_v53  ;;  %v2214_v38 = vor.u32 1.1754944e-38, %v2213_v55  ;;  %v2384_v44 = vmul.f32 %v6856_v41, %v2383_v24  ;;  %2662 = vmatpush.bf16.msra.mxu3 %v4937_v42  ;;  %vm6963_vm12 = vmor %vm2222_vm7, %vm2223_vm8  ;;  %v4928_v24 = vld [vmem:[%s6594_s18 + $0x28] sm:$0xff] }
 0x3bd   : > { %2165 = vmatmul.bf16.vlgmr.msra.gmra.mxu1 %v4906_v56  ;;  %v2219_v56 = vsub.f32 1.0, %v2218_v43  ;;  %v2210_v36 = vsel %vm6900_vm2, %v6825_v23, %v2206_v58  ;;  %v2378_v43 = vor.u32 1.1754944e-38, %v2377_v21  ;;  %vm2376_vm9 = vcmp.eq.f32.partialorder %v2375_v29, 8.507059e+37  ;;  %v4924_v58 = vld [vmem:[%s6594_s18 + $0x8] sm:$0xff] }
 0x3be   : > { %v2374_v23 = vsel %vm6923_vm5, %v6836_v27, %v2370_v19  ;;  %v2228_v46 = vand.u32 2147483648, %v6820_v20  ;;  %vm2387_vm11 = vweird.f32 %v6856_v41  ;;  %5304 = vrcp.f32 %v6939_v14 }
 0x3bf   : > { %v2220_v34 = vmul.f32 %v6847_v35, %v2219_v56  ;;  %v2200_v50 = vsel %vm6905_vm3, %v2199_v12, %v2195_v10  ;;  %v2364_v27 = vsel %vm6915_vm4, %v2363_v31, %v2359_v11  ;;  %v2215_v51 = vsel %vm6931_vm6, %v2214_v38, %v2210_v36  ;;  %vm6977_vm14 = vmor %vm2386_vm10, %vm2387_vm11  ;;  %2649 = vmatpush.bf16.msra.mxu2 %v4928_v24  ;;  %v4935_v31 = vld [vmem:[%s6594_s18 + $0x60] sm:$0xff]  ;;  %v4954_v36 = vld [vmem:[%s6594_s18 + $0x78] sm:$0xff] }
 0x3c0   : > { %v2392_v53 = vand.u32 2147483648, %v6831_v25  ;;  %v2379_v54 = vsel %vm2376_vm9, %v2378_v43, %v2374_v23  ;;  %v2385_v55 = vadd.f32 %v6856_v41, %v2384_v44  ;;  %v2390_v56 = vand.u32 2147483647, %v6831_v25  ;;  %2663 = vmatpush.bf16.msra.mxu3 %v4936_v28  ;;  %2825 = vmatpush.bf16.msrb.mxu1 %v4954_v36  ;;  %v4926_v23 = vld [vmem:[%s6594_s18 + $0x18] sm:$0xff]  ;;  %v4941_v43 = vld [vmem:[%s6594_s18 + $0x10] sm:$0xff] }
 0x3c1   : > { %v2221_v48 = vadd.f32 %v6847_v35, %v2220_v34  ;;  %v2233_v57 = vmul.f32 %v5303_v49, %v6854_v40  ;;  %vm6971_vm13 = vcmp.eq.f32.partialorder %v2226_v45, 8.507059e+37  ;;  %v2229_v20 = vor.u32 1.1754944e-38, %v2228_v46  ;;  %v4946_v34 = vld [vmem:[%s6594_s18 + $0x38] sm:$0xff] }
 0x3c2   : > { %vm2237_vm15 = vweird.f32 %v6854_v40  ;;  %vm2238_vm0 = vweird.f32 %v5303_v49  ;;  %v2241_v12 = vand.u32 2147483647, %v6854_v40  ;;  %v2201_v13 = vmul.f32 %v2200_v50, %v2179_v0  ;;  %2811 = vmatpush.bf16.msrb.mxu0 %v4946_v34  ;;  %v4925_v50 = vld [vmem:[%s6594_s18 + $0x10] sm:$0xff] }
 0x3c3   : > { %v2225_v4 = vsel %vm6963_vm12, %v6847_v35, %v2221_v48  ;;  %v2234_v10 = vsub.f32 1.0, %v2233_v57  ;;  %v2365_v25 = vmul.f32 %v2364_v27, %v2343_v1  ;;  %v2393_v21 = vor.u32 1.1754944e-38, %v2392_v53  ;;  %vm7004_vm2 = vmor %vm2237_vm15, %vm2238_vm0  ;;  %2650 = vmatpush.bf16.msra.mxu2 %v4927_v30  ;;  %v4933_v27 = vld [vmem:[%s6594_s18 + $0x50] sm:$0xff]  ;;  %v4952_v53 = vld [vmem:[%s6594_s18 + $0x68] sm:$0xff] }
 0x3c4   : > { %v5305_v19 = vpop.eup %5304  ;;  %v2216_v29 = vmul.f32 %v2215_v51, %v2180_v3  ;;  %v2389_v35 = vsel %vm6977_vm14, %v6856_v41, %v2385_v55  ;;  %vm2391_vm1 = vcmp.eq.f32.partialorder %v2390_v56, 8.507059e+37  ;;  %v2380_v60 = vmul.f32 %v2379_v54, %v2344_v5  ;;  %2664 = vmatpush.bf16.msra.mxu3 %v4935_v31  ;;  %v4781_v0 = vld [vmem:[%s6613_s4 + $0x70] sm:$0xf]  ;;  %v4970_v34 = vld [vmem:[%s6613_s4 + $0x74] sm:$0xf] }
 0x3c5   : > { %v2235_v11 = vmul.f32 %v5303_v49, %v2234_v10  ;;  %v2230_v61 = vsel %vm6971_vm13, %v2229_v20, %v2225_v4  ;;  %v2397_v1 = vmul.f32 %v5305_v19, %v6939_v14  ;;  %vm2242_vm3 = vcmp.eq.f32.partialorder %v2241_v12, 8.507059e+37  ;;  %v4932_v20 = vld [vmem:[%s6594_s18 + $0x48] sm:$0xff]  ;;  %v4943_v12 = vld [vmem:[%s6594_s18 + $0x20] sm:$0xff] }
 0x3c6   : > { %vm2401_vm4 = vweird.f32 %v6939_v14  ;;  %v2407_v3 = vand.u32 2147483648, %v6939_v14  ;;  %v2394_v5 = vsel %vm2391_vm1, %v2393_v21, %v2389_v35  ;;  %vm2402_vm5 = vweird.f32 %v5305_v19 }
 0x3c7   : > { %v2236_v2 = vadd.f32 %v5303_v49, %v2235_v11  ;;  %v2398_v41 = vsub.f32 1.0, %v2397_v1  ;;  %v2405_v40 = vand.u32 2147483647, %v6939_v14  ;;  %5306 = vlog2.f32 %v2201_v13  ;;  %vm7025_vm6 = vmor %vm2401_vm4, %vm2402_vm5  ;;  %v4953_v14 = vld [vmem:[%s6594_s18 + $0x70] sm:$0xff]  ;;  %2651 = vmatpush.bf16.msra.mxu2 %v4926_v23  ;;  %v4951_v13 = vld [vmem:[%s6594_s18 + $0x60] sm:$0xff] }
 0x3c8   : > { %5308 = vlog2.f32 %v2365_v25  ;;  %v2231_v22 = vmul.f32 %v2230_v61, %v2181_v17  ;;  %v2395_v42 = vmul.f32 %v2394_v5, %v2345_v18  ;;  %v2408_v15 = vor.u32 1.1754944e-38, %v2407_v3  ;;  %v4945_v18 = vld [vmem:[%s6594_s18 + $0x30] sm:$0xff]  ;;  %2665 = vmatpush.bf16.msra.mxu3 %v4934_v16  ;;  %2826 = vmatpush.bf16.msrb.mxu1 %v4953_v14  ;;  %v4931_v61 = vld [vmem:[%s6594_s18 + $0x40] sm:$0xff]  ;;  %v4942_v5 = vld [vmem:[%s6594_s18 + $0x18] sm:$0xff] }
 0x3c9   : > { %v2240_v32 = vsel %vm7004_vm2, %v5303_v49, %v2236_v2  ;;  %v2399_v39 = vmul.f32 %v5305_v19, %v2398_v41  ;;  %5310 = vlog2.f32 %v2216_v29  ;;  %vm2406_vm7 = vcmp.eq.f32.partialorder %v2405_v40, 8.507059e+37  ;;  %2812 = vmatpush.bf16.msrb.mxu0 %v4945_v18  ;;  %v4950_v41 = vld [vmem:[%s6594_s18 + $0x58] sm:$0xff]  ;;  %v4969_v23 = vld [vmem:[%s6613_s4 + $0x64] sm:$0xf0]  ;;  %v4968_v16 = vld [vmem:[%s6613_s4 + $0x64] sm:$0xf] }
 0x3ca   : > { %v2245_v38 = vsel %vm2242_vm3, %v2244_v62, %v2240_v32  ;;  %5312 = vlog2.f32 %v2380_v60  ;;  %v2053_v55 = vperm.slane %v7042_v26, 0  ;;  %v2054_v56 = vperm.slane %v7042_v26, 1  ;;  %v4923_v60 = vld [vmem:[%s6594_s18] sm:$0xff]  ;;  %v4971_v40 = vld [vmem:[%s6613_s4 + $0x74] sm:$0xf0] }
 0x3cb   : > { %v2246_v17 = vmul.f32 %v2245_v38, %v2182_v33  ;;  %v2400_v44 = vadd.f32 %v5305_v19, %v2399_v39  ;;  %5314 = vlog2.f32 %v2231_v22  ;;  %2652 = vmatpush.bf16.msra.mxu2 %v4925_v50  ;;  %v4782_v32 = vor.u32 %v4971_v40, %v4781_v0  ;;  %v4783_v38 = vld [vmem:[%s6613_s4 + $0x78] sm:$0xf0]  ;;  %v4775_v18 = vld [vmem:[%s6613_s4 + $0x68] sm:$0xf0]  ;;  %v4765_v50 = vld [vmem:[%s6613_s4 + $0x50] sm:$0xf] }
 0x3cc   : > { %5316 = vlog2.f32 %v2395_v42  ;;  %2666 = vmatpush.bf16.msra.mxu3 %v4933_v27  ;;  %2827 = vmatpush.bf16.msrb.mxu1 %v4952_v53  ;;  %v4786_v42 = vor.u32 %v4970_v34, %v4783_v38  ;;  %v4767_v53 = vld [vmem:[%s6613_s4 + $0x58] sm:$0xf0]  ;;  %vm2029_vm11 = vcmp.gt.f32.partialorder %v6644_v6, 0.5  ;;  %vm7610_vm14 = vcmp.gt.f32.partialorder %v6646_v7, 0.5 }
 0x3cd   : > { %v2404_v45 = vsel %vm7025_vm6, %v5305_v19, %v2400_v44  ;;  %v5307_v46 = vpop.eup %5306  ;;  %5318 = vlog2.f32 %v2246_v17  ;;  %2813 = vmatpush.bf16.msrb.mxu0 %v4944_v52  ;;  %v4773_v17 = vld [vmem:[%s6613_s4 + $0x60] sm:$0xf]  ;;  %v4966_v52 = vld [vmem:[%s6613_s4 + $0x54] sm:$0xf] }
 0x3ce   : > { %v2409_v33 = vsel %vm2406_vm7, %v2408_v15, %v2404_v45  ;;  %v5309_v48 = vpop.eup %5308  ;;  %v4949_v15 = vld [vmem:[%s6594_s18 + $0x50] sm:$0xff]  ;;  %v4770_v26 = vor.u32 %v4966_v52, %v4767_v53  ;;  %vm2031_vm7 = vcmp.gt.f32.partialorder %v6648_v8, 0.5 }
 0x3cf   : > { %v2410_v49 = vmul.f32 %v2409_v33, %v2346_v47  ;;  %v5311_v51 = vpop.eup %5310  ;;  %v2248_v47 = vmul.f32 0.6931472, %v5307_v46  ;;  %v2412_v57 = vmul.f32 0.6931472, %v5309_v48  ;;  %2653 = vmatpush.bf16.msra.mxu2 %v4924_v58  ;;  %v4774_v46 = vor.u32 %v4969_v23, %v4773_v17  ;;  %v4940_v48 = vld [vmem:[%s6594_s18 + $0x8] sm:$0xff] }
 0x3d0   : > { %v5313_v54 = vpop.eup %5312  ;;  %v2250_v4 = vmul.f32 0.6931472, %v5311_v51  ;;  %2667 = vmatpush.bf16.msra.mxu3 %v4932_v20  ;;  %2828 = vmatpush.bf16.msrb.mxu1 %v4951_v13  ;;  %v4778_v33 = vor.u32 %v4968_v16, %v4775_v18  ;;  %v4967_v51 = vld [vmem:[%s6613_s4 + $0x54] sm:$0xf0]  ;;  %v4964_v13 = vld [vmem:[%s6613_s4 + $0x44] sm:$0xf] }
 0x3d1   : > { %5320 = vlog2.f32 %v2410_v49  ;;  %v5315_v37 = vpop.eup %5314  ;;  %v2414_v10 = vmul.f32 0.6931472, %v5313_v54  ;;  %2814 = vmatpush.bf16.msrb.mxu0 %v4943_v12  ;;  %v4948_v49 = vld [vmem:[%s6594_s18 + $0x48] sm:$0xff]  ;;  %v4947_v12 = vld [vmem:[%s6594_s18 + $0x40] sm:$0xff]  ;;  %v2878_v23 = vsub.f32 1.0, %v6644_v6 }
 0x3d2   : > { %v5317_v59 = vpop.eup %5316  ;;  %v2252_v19 = vmul.f32 0.6931472, %v5315_v37 }
 0x3d3   : > { %v5319_v25 = vpop.eup %5318  ;;  %v2416_v11 = vmul.f32 0.6931472, %v5317_v59  ;;  %2654 = vmatpush.bf16.msra.mxu2 %v4923_v60 }
 0x3d4   : > { %v2254_v3 = vmul.f32 0.6931472, %v5319_v25  ;;  %2668 = vmatpush.bf16.msra.mxu3 %v4931_v61  ;;  %2829 = vmatpush.bf16.msrb.mxu1 %v4950_v41  ;;  %v4759_v25 = vld [vmem:[%s6613_s4 + $0x48] sm:$0xf0] }
 0x3d5   : > { %2815 = vmatpush.bf16.msrb.mxu0 %v4942_v5  ;;  %v4762_v61 = vor.u32 %v4964_v13, %v4759_v25 }
 0x3d7   : > { %v5321_v62 = vpop.eup %5320  ;;  %3026 = vmatpush.bf16.msrb.mxu2 %v4782_v32 }
 0x3d8   : > { %v2418_v39 = vmul.f32 0.6931472, %v5321_v62  ;;  %3040 = vmatpush.bf16.msrb.mxu3 %v4786_v42  ;;  %2830 = vmatpush.bf16.msrb.mxu1 %v4949_v15 }
 0x3d9   : > { %2816 = vmatpush.bf16.msrb.mxu0 %v4941_v43 }
 0x3db   : > { %3027 = vmatpush.bf16.msrb.mxu2 %v4774_v46 }
 0x3dc   : > { %3041 = vmatpush.bf16.msrb.mxu3 %v4778_v33  ;;  %2831 = vmatpush.bf16.msrb.mxu1 %v4948_v49 }
 0x3dd   : > { %2817 = vmatpush.bf16.msrb.mxu0 %v4940_v48 }
 0x3e0   : > { %3042 = vmatpush.bf16.msrb.mxu3 %v4770_v26  ;;  %2832 = vmatpush.bf16.msrb.mxu1 %v4947_v12 }
 0x3e4   : > { %3043 = vmatpush.bf16.msrb.mxu3 %v4762_v61 }
 0x439   : > { %v2152_v63 = vpop.f32.mrf.mxu0 }
 0x43a   : > { %v2153_v21 = vadd.f32 %v2152_v63, %v2053_v55  ;;  %v2166_v24 = vpop.f32.mrf.mxu1 }
 0x43b   : > { %v2167_v28 = vadd.f32 %v2166_v24, %v2054_v56 }
 0x43c   : > { %v2255_v29 = vadd.f32 %v2248_v47, %v2153_v21  ;;  %v2419_v35 = vadd.f32 %v2412_v57, %v2153_v21  ;;  %v4757_v47 = vld [vmem:[%s6613_s4 + $0x40] sm:$0xf]  ;;  %v4965_v57 = vld [vmem:[%s6613_s4 + $0x44] sm:$0xf0] }
 0x43d   : > { %v2256_v1 = vadd.f32 %v2250_v4, %v2167_v28  ;;  %v2420_v2 = vadd.f32 %v2414_v10, %v2167_v28  ;;  %v4758_v28 = vor.u32 %v4965_v57, %v4757_v47 }
 0x43e   : > { %v4583_v30 = vmul.f32 -1.442695, %v2255_v29  ;;  %v4587_v31 = vmul.f32 -1.442695, %v2419_v35 }
 0x43f   : > { %v4584_v36 = vmul.f32 -1.442695, %v2256_v1  ;;  %v4588_v22 = vmul.f32 -1.442695, %v2420_v2 }
 0x440   : > { %5322 = vpow2.f32 %v4583_v30 }
 0x441   : > { %5324 = vpow2.f32 %v4587_v31  ;;  %v2154_v44 = vpop.f32.mrf.mxu0 }
 0x442   : > { %5326 = vpow2.f32 %v4584_v36  ;;  %v2155_v14 = vadd.f32 %v2154_v44, %v2053_v55  ;;  %v2168_v45 = vpop.f32.mrf.mxu1  ;;  %v4766_v55 = vor.u32 %v4967_v51, %v4765_v50 }
 0x443   : > { %5328 = vpow2.f32 %v4588_v22  ;;  %v2169_v27 = vadd.f32 %v2168_v45, %v2054_v56  ;;  %v4939_v56 = vld [vmem:[%s6594_s18] sm:$0xff] }
 0x444   : > { %v2257_v54 = vadd.f32 %v2252_v19, %v2155_v14  ;;  %v2421_v37 = vadd.f32 %v2416_v11, %v2155_v14  ;;  %3028 = vmatpush.bf16.msrb.mxu2 %v4766_v55  ;;  %2818 = vmatpush.bf16.msrb.mxu0 %v4939_v56 }
 0x445   : > { %v2258_v59 = vadd.f32 %v2254_v3, %v2169_v27  ;;  %v2422_v10 = vadd.f32 %v2418_v39, %v2169_v27 }
 0x446   : > { %v5323_v58 = vpop.eup %5322  ;;  %v4585_v20 = vmul.f32 -1.442695, %v2257_v54  ;;  %v4589_v35 = vmul.f32 -1.442695, %v2421_v37 }
 0x447   : > { %v5325_v63 = vpop.eup %5324  ;;  %v7087_v4 = vadd.f32 1.0, %v5323_v58  ;;  %v4586_v60 = vmul.f32 -1.442695, %v2258_v59  ;;  %v4590_v0 = vmul.f32 -1.442695, %v2422_v10 }
 0x448   : > { %v5327_v21 = vpop.eup %5326  ;;  %v7092_v24 = vadd.f32 1.0, %v5325_v63  ;;  %5330 = vpow2.f32 %v4585_v20  ;;  %3029 = vmatpush.bf16.msrb.mxu2 %v4758_v28 }
 0x449   : > { %v5329_v19 = vpop.eup %5328  ;;  %5332 = vrcp.f32 %v7087_v4  ;;  %v7095_v29 = vadd.f32 1.0, %v5327_v21  ;;  %v2284_v62 = vand.u32 2147483647, %v7087_v4  ;;  %v2286_v1 = vand.u32 2147483648, %v7087_v4 }
 0x44a   : > { %5334 = vrcp.f32 %v7092_v24  ;;  %v7098_v11 = vadd.f32 1.0, %v5329_v19  ;;  %v2450_v41 = vand.u32 2147483648, %v7092_v24  ;;  %vm2280_vm8 = vweird.f32 %v7087_v4 }
 0x44b   : > { %5336 = vrcp.f32 %v7095_v29  ;;  %v2301_v2 = vand.u32 2147483648, %v7095_v29  ;;  %v2299_v5 = vand.u32 2147483647, %v7095_v29  ;;  %vm7113_vm9 = vcmp.eq.f32.partialorder %v2284_v62, 8.507059e+37 }
 0x44c   : > { %5338 = vrcp.f32 %v7098_v11  ;;  %v2287_v36 = vor.u32 1.1754944e-38, %v2286_v1  ;;  %vm2295_vm10 = vweird.f32 %v7095_v29  ;;  %v2448_v22 = vand.u32 2147483647, %v7092_v24 }
 0x44d   : > { %5340 = vpow2.f32 %v4589_v35  ;;  %v2302_v42 = vor.u32 1.1754944e-38, %v2301_v2  ;;  %v2463_v43 = vand.u32 2147483647, %v7098_v11  ;;  %vm7127_vm12 = vcmp.eq.f32.partialorder %v2299_v5, 8.507059e+37 }
 0x44e   : > { %v5331_v3 = vpop.eup %5330  ;;  %5342 = vpow2.f32 %v4586_v60  ;;  %vm2444_vm13 = vweird.f32 %v7092_v24  ;;  %v2451_v16 = vor.u32 1.1754944e-38, %v2450_v41  ;;  %v2465_v18 = vand.u32 2147483648, %v7098_v11 }
 0x44f   : > { %v5333_v40 = vpop.eup %5332  ;;  %v7107_v30 = vadd.f32 1.0, %v5331_v3  ;;  %5344 = vpow2.f32 %v4590_v0  ;;  %vm7142_vm0 = vcmp.eq.f32.partialorder %v2448_v22, 8.507059e+37 }
 0x450   : > { %v7110_v31 = vpop.eup %5334  ;;  %v2276_v32 = vmul.f32 %v5333_v40, %v7087_v4  ;;  %vm2281_vm15 = vweird.f32 %v5333_v40 }
 0x451   : > { %v5337_v38 = vpop.eup %5336  ;;  %v2440_v39 = vmul.f32 %v7110_v31, %v7092_v24  ;;  %5346 = vrcp.f32 %v7107_v30  ;;  %v2316_v46 = vand.u32 2147483648, %v7107_v30  ;;  %v2314_v51 = vand.u32 2147483647, %v7107_v30  ;;  %vm2282_vm4 = vmor %vm2280_vm8, %vm2281_vm15 }
 0x452   : > { %v7124_v15 = vpop.eup %5338  ;;  %v2277_v17 = vsub.f32 1.0, %v2276_v32  ;;  %v2291_v44 = vmul.f32 %v5337_v38, %v7095_v29  ;;  %vm2296_vm1 = vweird.f32 %v5337_v38  ;;  %vm2445_vm2 = vweird.f32 %v7110_v31  ;;  %v4733_v32 = vld [vmem:[%s6613_s4 + $0x10] sm:$0xf] }
 0x453   : > { %v5341_v14 = vpop.eup %5340  ;;  %v7135_v45 = vmul.f32 %v7124_v15, %v7098_v11  ;;  %v2441_v33 = vsub.f32 1.0, %v2440_v39  ;;  %vm2310_vm3 = vweird.f32 %v7107_v30  ;;  %v2317_v20 = vor.u32 1.1754944e-38, %v2316_v46  ;;  %vm2297_vm6 = vmor %vm2295_vm10, %vm2296_vm1 }
 0x454   : > { %v5343_v48 = vpop.eup %5342  ;;  %v2292_v49 = vsub.f32 1.0, %v2291_v44  ;;  %v7139_v50 = vadd.f32 1.0, %v5341_v14  ;;  %v2278_v27 = vmul.f32 %v5333_v40, %v2277_v17  ;;  %vm7162_vm5 = vcmp.eq.f32.partialorder %v2314_v51, 8.507059e+37 }
 0x455   : > { %v5345_v53 = vpop.eup %5344  ;;  %v7146_v54 = vadd.f32 1.0, %v5343_v48  ;;  %v2442_v55 = vmul.f32 %v7110_v31, %v2441_v33  ;;  %v2456_v26 = vsub.f32 1.0, %v7135_v45  ;;  %vm2460_vm15 = vweird.f32 %v7124_v15 }
 0x456   : > { %5348 = vrcp.f32 %v7139_v50  ;;  %v7151_v37 = vadd.f32 1.0, %v5345_v53  ;;  %v2279_v47 = vadd.f32 %v5333_v40, %v2278_v27  ;;  %v2293_v57 = vmul.f32 %v5337_v38, %v2292_v49  ;;  %v4727_v53 = vld [vmem:[%s6613_s4 + $0x8] sm:$0xf0] }
 0x457   : > { %v5347_v58 = vpop.eup %5346  ;;  %5350 = vrcp.f32 %v7146_v54  ;;  %v2331_v59 = vand.u32 2147483648, %v7146_v54  ;;  %v2329_v4 = vand.u32 2147483647, %v7146_v54  ;;  %v2443_v19 = vadd.f32 %v7110_v31, %v2442_v55 }
 0x458   : > { %v2306_v56 = vmul.f32 %v5347_v58, %v7107_v30  ;;  %5352 = vrcp.f32 %v7151_v37  ;;  %v2283_v63 = vsel %vm2282_vm4, %v5333_v40, %v2279_v47  ;;  %v2294_v10 = vadd.f32 %v5337_v38, %v2293_v57 }
 0x459   : > { %v2288_v13 = vsel %vm7113_vm9, %v2287_v36, %v2283_v63  ;;  %vm2311_vm8 = vweird.f32 %v5347_v58  ;;  %vm2459_vm4 = vweird.f32 %v7098_v11  ;;  %v7178_v60 = vor.u32 1.1754944e-38, %v2331_v59  ;;  %vm2446_vm9 = vmor %vm2444_vm13, %vm2445_vm2  ;;  %v4963_v59 = vld [vmem:[%s6613_s4 + $0x34] sm:$0xf0]  ;;  %v4751_v63 = vld [vmem:[%s6613_s4 + $0x38] sm:$0xf0] }
 0x45a   : > { %v2307_v25 = vsub.f32 1.0, %v2306_v56  ;;  %v2298_v21 = vsel %vm2297_vm6, %v5337_v38, %v2294_v10  ;;  %v2499_v28 = vsub.f32 1.0, %v2288_v13  ;;  %vm2474_vm10 = vweird.f32 %v7139_v50  ;;  %vm2312_vm2 = vmor %vm2310_vm3, %vm2311_vm8  ;;  %v4962_v56 = vld [vmem:[%s6613_s4 + $0x34] sm:$0xf] }
 0x45b   : > { %v2303_v35 = vsel %vm7127_vm12, %v2302_v42, %v2298_v21  ;;  %v2478_v29 = vand.u32 2147483647, %v7139_v50  ;;  %vm2325_vm12 = vweird.f32 %v7146_v54  ;;  %v2447_v2 = vsel %vm2446_vm9, %v7110_v31, %v2443_v19  ;;  %vm7239_vm3 = vmor %vm2459_vm4, %vm2460_vm15 }
 0x45c   : > { %v5349_v61 = vpop.eup %5348  ;;  %v2500_v0 = vsub.f32 1.0, %v2303_v35  ;;  %v7188_v62 = vsel %vm2029_vm11, %v2288_v13, %v2499_v28  ;;  %v2308_v1 = vmul.f32 %v5347_v58, %v2307_v25  ;;  %v2452_v41 = vsel %vm7142_vm0, %v2451_v16, %v2447_v2 }
 0x45d   : > { %v5351_v3 = vpop.eup %5350  ;;  %v2470_v5 = vmul.f32 %v5349_v61, %v7139_v50  ;;  %v2845_v24 = vmul.f32 %v7188_v62, %v7188_v62  ;;  %v2480_v40 = vand.u32 2147483648, %v7139_v50  ;;  %vm7200_vm13 = vcmp.eq.f32.partialorder %v2463_v43, 8.507059e+37 }
 0x45e   : > { %v7204_v34 = vpop.eup %5352  ;;  %v2321_v31 = vmul.f32 %v5351_v3, %v7146_v54  ;;  %v7209_v36 = vsel %vm7610_vm14, %v2303_v35, %v2500_v0  ;;  %v2309_v22 = vadd.f32 %v5347_v58, %v2308_v1  ;;  %vm7211_vm1 = vcmp.eq.f32.partialorder %v2329_v4, 8.507059e+37  ;;  %v4961_v0 = vld [vmem:[%s6613_s4 + $0x24] sm:$0xf0] }
 0x45f   : > { %vm2475_vm0 = vweird.f32 %v5349_v61  ;;  %v2485_v39 = vmul.f32 %v7204_v34, %v7151_v37  ;;  %v2846_v42 = vmul.f32 %v7209_v36, %v7209_v36  ;;  %vm2032_vm6 = vcmp.gt.f32.partialorder %v6650_v9, 0.5 }
 0x460   : > { %vm2326_vm9 = vweird.f32 %v5351_v3  ;;  %v2471_v43 = vsub.f32 1.0, %v2470_v5  ;;  %v2322_v17 = vsub.f32 1.0, %v2321_v31  ;;  %v2313_v44 = vsel %vm2312_vm2, %v5347_v58, %v2309_v22  ;;  %v4960_v5 = vld [vmem:[%s6613_s4 + $0x24] sm:$0xf] }
 0x461   : > { %vm7223_vm14 = vcmp.eq.f32.partialorder %v2478_v29, 8.507059e+37  ;;  %v2507_v16 = vsub.f32 1.0, %v2452_v41  ;;  %v2849_v14 = vadd.f32 %v2846_v42, %v2845_v24  ;;  %v2318_v45 = vsel %vm7162_vm5, %v2317_v20, %v2313_v44  ;;  %v4749_v20 = vld [vmem:[%s6613_s4 + $0x30] sm:$0xf]  ;;  %vm2327_vm15 = vmor %vm2325_vm12, %vm2326_vm9  ;;  %v4743_v24 = vld [vmem:[%s6613_s4 + $0x28] sm:$0xf0] }
 0x462   : > { %v2472_v46 = vmul.f32 %v5349_v61, %v2471_v43  ;;  %v2457_v33 = vmul.f32 %v7124_v15, %v2456_v26  ;;  %v2501_v30 = vsub.f32 1.0, %v2318_v45  ;;  %v2323_v48 = vmul.f32 %v5351_v3, %v2322_v17  ;;  %v4958_v42 = vld [vmem:[%s6613_s4 + $0x14] sm:$0xf]  ;;  %v4735_v43 = vld [vmem:[%s6613_s4 + $0x18] sm:$0xf0] }
 0x463   : > { %v2481_v49 = vor.u32 1.1754944e-38, %v2480_v40  ;;  %v7232_v27 = vsel %vm2029_vm11, %v2452_v41, %v2507_v16  ;;  %2850 = vadd.xlane.f32.xlu2 %v2849_v14  ;;  %v2466_v55 = vor.u32 1.1754944e-38, %v2465_v18  ;;  %v2486_v47 = vsub.f32 1.0, %v2485_v39  ;;  %vm2476_vm11 = vmor %vm2474_vm10, %vm2475_vm0  ;;  %v4959_v39 = vld [vmem:[%s6613_s4 + $0x14] sm:$0xf0] }
 0x464   : > { %v2473_v51 = vadd.f32 %v5349_v61, %v2472_v46  ;;  %v2458_v52 = vadd.f32 %v7124_v15, %v2457_v33  ;;  %v7247_v57 = vsel %vm2031_vm7, %v2318_v45, %v2501_v30  ;;  %v2324_v58 = vadd.f32 %v5351_v3, %v2323_v48  ;;  %v4725_v46 = vld [vmem:[%s6613_s4] sm:$0xf]  ;;  %v4957_v33 = vld [vmem:[%s6613_s4 + $0x4] sm:$0xf0] }
 0x465   : > { %vm2489_vm5 = vweird.f32 %v7151_v37  ;;  %vm2490_vm8 = vweird.f32 %v7204_v34  ;;  %v2517_v11 = vpack.c.bf16 %v7247_v57, %v7188_v62  ;;  %v2487_v50 = vmul.f32 %v7204_v34, %v2486_v47 }
 0x466   : > { %v2477_v18 = vsel %vm2476_vm11, %v5349_v61, %v2473_v51  ;;  %v2462_v26 = vsel %vm7239_vm3, %v7124_v15, %v2458_v52  ;;  %v2328_v10 = vsel %vm2327_vm15, %v5351_v3, %v2324_v58  ;;  %v2493_v54 = vand.u32 2147483647, %v7151_v37  ;;  %v4956_v52 = vld [vmem:[%s6613_s4 + $0x4] sm:$0xf] }
 0x467   : > { %v2482_v12 = vsel %vm7223_vm14, %v2481_v49, %v2477_v18  ;;  %v2467_v13 = vsel %vm7200_vm13, %v2466_v55, %v2462_v26  ;;  %2655 = vmatmul.bf16.vlgmr.msra.gmra.mxu2 %v2517_v11  ;;  %v2333_v15 = vsel %vm7211_vm1, %v7178_v60, %v2328_v10  ;;  %v2488_v25 = vadd.f32 %v7204_v34, %v2487_v50  ;;  %vm7281_vm14 = vmor %vm2489_vm5, %vm2490_vm8  ;;  %v4741_v60 = vld [vmem:[%s6613_s4 + $0x20] sm:$0xf] }
 0x468   : > { %v2509_v4 = vsub.f32 1.0, %v2482_v12  ;;  %v2495_v21 = vand.u32 2147483648, %v7151_v37  ;;  %v2502_v28 = vsub.f32 1.0, %v2333_v15  ;;  %v2508_v35 = vsub.f32 1.0, %v2467_v13 }
 0x469   : > { %v4750_v29 = vor.u32 %v4963_v59, %v4749_v20  ;;  %v4754_v61 = vor.u32 %v4962_v56, %v4751_v63  ;;  %v2492_v2 = vsel %vm7281_vm14, %v7204_v34, %v2488_v25  ;;  %v2847_v3 = vmul.f32 %v7247_v57, %v7247_v57 }
 0x46a   : > { %v2513_v1 = vsel %vm2031_vm7, %v2482_v12, %v2509_v4  ;;  %v2496_v37 = vor.u32 1.1754944e-38, %v2495_v21  ;;  %v2506_v41 = vsel %vm2032_vm6, %v2333_v15, %v2502_v28  ;;  %vm2494_vm4 = vcmp.eq.f32.partialorder %v2493_v54, 8.507059e+37  ;;  %v4955_v21 = vld [vmem:[#allocation6] sm:$0xff] }
 0x46b   : > { %v2681_v40 = vpack.c.bf16 %v2513_v1, %v7232_v27  ;;  %3030 = vmatpush.bf16.msrb.mxu2 %v4750_v29  ;;  %3044 = vmatpush.bf16.msrb.mxu3 %v4754_v61  ;;  %v2518_v34 = vpack.c.bf16 %v2506_v41, %v7209_v36  ;;  %v2848_v22 = vmul.f32 %v2506_v41, %v2506_v41  ;;  %vm7768_vm7 = vcmp.gt.f32.partialorder %v6646_v7, 0.5 }
 0x46c   : > { %v2497_v31 = vsel %vm2494_vm4, %v2496_v37, %v2492_v2  ;;  %v4742_v38 = vor.u32 %v4961_v0, %v4741_v60  ;;  %v4746_v44 = vor.u32 %v4960_v5, %v4743_v24  ;;  %v2512_v16 = vsel %vm7768_vm7, %v2467_v13, %v2508_v35  ;;  %v2843_v60 = vld [vmem:[#allocation11] sm:$0xff] }
 0x46d   : > { %2819 = vmatmul.bf16.vlgmr.msrb.gmra.mxu0 %v2681_v40  ;;  %v2510_v17 = vsub.f32 1.0, %v2497_v31  ;;  %2669 = vmatmul.bf16.vlgmr.msra.gmra.mxu3 %v2518_v34  ;;  %v2852_v14 = vadd.f32 %v2848_v22, %v2847_v3  ;;  %v2879_v45 = vsub.f32 1.0, %v6646_v7  ;;  %v4734_v48 = vor.u32 %v4959_v39, %v4733_v32  ;;  %v2876_v3 = vld [vmem:[#allocation13] sm:$0xff]  ;;  %v2679_v32 = vld [vmem:[#allocation10 + $0x8] sm:$0xff]  ;;  %v2896_v39 = vld [vmem:[#allocation14] sm:$0xff] }
 0x46e   : > { %v4738_v49 = vor.u32 %v4958_v42, %v4735_v43  ;;  %v2862_v55 = vmul.f32 %v7232_v27, %v7232_v27  ;;  %v2882_v47 = vmul.f32 %v2878_v23, %v7188_v62  ;;  %v4726_v58 = vor.u32 %v4957_v33, %v4725_v46  ;;  %v2515_v22 = vld [vmem:[#allocation9] sm:$0xff] }
 0x46f   : > { %v2514_v30 = vsel %vm2032_vm6, %v2497_v31, %v2510_v17  ;;  %3031 = vmatpush.bf16.msrb.mxu2 %v4742_v38  ;;  %3045 = vmatpush.bf16.msrb.mxu3 %v4746_v44  ;;  %v2863_v20 = vmul.f32 %v2512_v16, %v2512_v16  ;;  %v2880_v59 = vsub.f32 1.0, %v6648_v8  ;;  %v2883_v11 = vmul.f32 %v2879_v45, %v7209_v36  ;;  %v2680_v45 = vld [vmem:[#allocation10] sm:$0xff] }
 0x470   : > { %v2682_v51 = vpack.c.bf16 %v2514_v30, %v2512_v16  ;;  %2853 = vadd.xlane.f32.xlu2 %v2852_v14  ;;  %v2881_v18 = vsub.f32 1.0, %v6650_v9  ;;  %v2900_v26 = vsub.f32 1.0, %v7247_v57  ;;  %v2901_v50 = vsub.f32 1.0, %v2506_v41 }
 0x471   : > { %v4730_v56 = vor.u32 %v4956_v52, %v4727_v53  ;;  %v7321_v63 = vadd.f32 %v2863_v20, %v2862_v55  ;;  %v2884_v27 = vmul.f32 %v2880_v59, %v7247_v57  ;;  %v2864_v54 = vmul.f32 %v2513_v1, %v2513_v1  ;;  %v2844_v1 = vld [vmem:[#allocation11 + $0x8] sm:$0xff] }
 0x472   : > { %2833 = vmatmul.bf16.vlgmr.msrb.gmra.mxu1 %v2682_v51  ;;  %v2885_v10 = vmul.f32 %v2881_v18, %v2506_v41  ;;  %v2904_v12 = vmul.f32 %v2900_v26, %v6648_v8  ;;  %v2905_v13 = vmul.f32 %v2901_v50, %v6650_v9  ;;  %v2898_v15 = vsub.f32 1.0, %v7188_v62 }
 0x473   : > { %3032 = vmatpush.bf16.msrb.mxu2 %v4734_v48  ;;  %3046 = vmatpush.bf16.msrb.mxu3 %v4738_v49  ;;  %v2865_v4 = vmul.f32 %v2514_v30, %v2514_v30  ;;  %v2886_v25 = vadd.f32 %v2883_v11, %v2882_v47  ;;  %v2899_v28 = vsub.f32 1.0, %v7209_v36  ;;  %vm2857_vm10 = vcmask 7168   ;;  %v2516_v30 = vld [vmem:[#allocation9 + $0x8] sm:$0xff]  ;;  %v2934_v49 = vld [vmem:[%s1141_s11] sm:$0x3] }
 0x474   : > { %v7328_v19 = vadd.f32 %v2885_v10, %v2884_v27  ;;  %v7330_v35 = vadd.f32 %v2905_v13, %v2904_v12  ;;  %v2902_v29 = vmul.f32 %v2898_v15, %v6644_v6  ;;  %v2936_v55 = vperm.slane %v2934_v49, 0  ;;  %v3054_v13 = vld [vmem:[#allocation15] sm:$0xff] }
 0x475   : > { %v7332_v57 = vadd.f32 %v2865_v4, %v2864_v54  ;;  %v2903_v61 = vmul.f32 %v2899_v28, %v6646_v7  ;;  %v6077_v12 = vmov 0  }
 0x476   : > { %5288 = vset.pattern.permute.xlu1 %v6077_v12  ;;  %5289 = vset.pattern.permute.xlu0 %v6077_v12 }
 0x477   : > { %3033 = vmatpush.bf16.msrb.mxu2 %v4726_v58  ;;  %3047 = vmatpush.bf16.msrb.mxu3 %v4730_v56  ;;  %v2906_v62 = vadd.f32 %v2903_v61, %v2902_v29  ;;  %v2937_v58 = vperm.slane %v2934_v49, 1  ;;  %v2877_v61 = vld [vmem:[#allocation13 + $0x8] sm:$0xff]  ;;  %v3064_v49 = vld [vmem:[#allocation16] sm:$0xff] }
 0x478   : > { %2887 = vadd.xlane.f32.xlu2 %v2886_v25  ;;  %v3055_v25 = vld [vmem:[#allocation15 + $0x8] sm:$0xff] }
 0x47a   : > { %3034 = vmatmul.bf16.vlgmr.msrb.gmra.mxu2 %v4955_v21 }
 0x47d   : > { %3048 = vmatmul.bf16.vlgmr.msrb.gmra.mxu3 %v4955_v21 }
 0x480   : > { %2907 = vadd.xlane.f32.xlu2 %v2906_v62 }
 0x4d6   : > { %v2851_v36 = vpop.xlane.xlu2 %2850 }
 0x4d7   : > { %v2855_v0 = vadd.f32 %v2851_v36, %v2843_v60  ;;  %v2897_v36 = vld [vmem:[#allocation14 + $0x8] sm:$0xff] }
 0x4d9   : > { %2858 = vst.msk [vmem:[#allocation11] sm:$0xff] %vm2857_vm10, %v2855_v0 }
 0x4e3   : > { %v2854_v2 = vpop.xlane.xlu2 %2853 }
 0x4e4   : > { %v2856_v37 = vadd.f32 %v2854_v2, %v2844_v1 }
 0x4e6   : > { %2859 = vst.msk [vmem:[#allocation11 + $0x8] sm:$0xff] %vm2857_vm10, %v2856_v37 }
 0x4ea   : > { %v2820_v5 = vpop.f32.mrf.mxu0  ;;  %v2656_v41 = vpop.f32.mrf.mxu2 }
 0x4eb   : > { %v2888_v24 = vpop.xlane.xlu2 %2887 }
 0x4ec   : > { %v2892_v40 = vadd.f32 %v2888_v24, %v2876_v3 }
 0x4ee   : > { %2894 = vst.msk [vmem:[#allocation13] sm:$0xff] %vm2857_vm10, %v2892_v40 }
 0x4ef   : > { %v2834_v34 = vpop.f32.mrf.mxu1 }
 0x4f0   : > { %v2835_v31 = vadd.f32 %v2834_v34, %v2820_v5  ;;  %v2670_v38 = vpop.f32.mrf.mxu3 }
 0x4f1   : > { %v2671_v43 = vadd.f32 %v2670_v38, %v2656_v41 }
 0x4f2   : > { %v2839_v42 = vadd.f32 %v2835_v31, %v2679_v32  ;;  %v2658_v44 = vpop.f32.mrf.mxu2  ;;  %v2822_v14 = vpop.f32.mrf.mxu0 }
 0x4f3   : > { %v2908_v17 = vpop.xlane.xlu2 %2907  ;;  %v2675_v23 = vadd.f32 %v2671_v43, %v2515_v22 }
 0x4f4   : > { %2841 = vst [vmem:[#allocation10 + $0x8] sm:$0xff] %v2839_v42  ;;  %v2912_v16 = vadd.f32 %v2908_v17, %v2896_v39 }
 0x4f5   : > { %2677 = vst [vmem:[#allocation9] sm:$0xff] %v2675_v23 }
 0x4f6   : > { %2914 = vst.msk [vmem:[#allocation14] sm:$0xff] %vm2857_vm10, %v2912_v16 }
 0x4f7   : > { %v2836_v46 = vpop.f32.mrf.mxu1 }
 0x4f8   : > { %v2837_v33 = vadd.f32 %v2836_v46, %v2822_v14  ;;  %v2672_v48 = vpop.f32.mrf.mxu3  ;;  %v2861_v46 = vld [vmem:[#allocation12 + $0x8] sm:$0xff] }
 0x4f9   : > { %v2673_v52 = vadd.f32 %v2672_v48, %v2658_v44 }
 0x4fa   : > { %v2840_v51 = vadd.f32 %v2837_v33, %v2680_v45 }
 0x4fb   : > { %v2676_v53 = vadd.f32 %v2673_v52, %v2516_v30 }
 0x4fc   : > { %2842 = vst [vmem:[#allocation10] sm:$0xff] %v2840_v51 }
 0x4fd   : > { %v3035_v47 = vpop.f32.mrf.mxu2  ;;  %2678 = vst [vmem:[#allocation9 + $0x8] sm:$0xff] %v2676_v53 }
 0x4fe   : > { %v3036_v20 = vadd.f32 %v3035_v47, %v2936_v55 }
 0x500   : > { %v3049_v59 = vpop.f32.mrf.mxu3 }
 0x501   : > { %v3050_v11 = vadd.f32 %v3049_v59, %v2937_v58 }
 0x503   : > { %v3056_v18 = vmax.f32 %v3036_v20, %v3050_v11  ;;  %v3111_v42 = vmul.f32 %v3050_v11, %v6646_v7 }
 0x505   : > { %v3037_v26 = vpop.f32.mrf.mxu2  ;;  %3057 = vmax.xlane.f32.xlu0 %v3056_v18  ;;  %v3109_v18 = vld [vmem:[#allocation17 + $0x8] sm:$0xff] }
 0x506   : > { %v3038_v50 = vadd.f32 %v3037_v26, %v2936_v55  ;;  %v3108_v55 = vld [vmem:[#allocation17] sm:$0xff] }
 0x508   : > { %v3051_v56 = vpop.f32.mrf.mxu3  ;;  %v3112_v16 = vmul.f32 %v3038_v50, %v6648_v8 }
 0x509   : > { %v3052_v27 = vadd.f32 %v3051_v56, %v2937_v58 }
 0x50b   : > { %v3059_v10 = vmax.f32 %v3038_v50, %v3052_v27  ;;  %v3113_v14 = vmul.f32 %v3052_v27, %v6650_v9  ;;  %v3065_v9 = vld [vmem:[#allocation16 + $0x8] sm:$0xff] }
 0x50d   : > { %3060 = vmax.xlane.f32.xlu0 %v3059_v10  ;;  %v3117_v45 = vadd.f32 %v3113_v14, %v3112_v16 }
 0x515   : > { %2867 = vadd.xlane.f32.xlu0 %v7321_v63  ;;  %v2860_v63 = vld [vmem:[#allocation12] sm:$0xff] }
 0x51d   : > { %2890 = vadd.xlane.f32.xlu0 %v7328_v19 }
 0x525   : > { %2910 = vadd.xlane.f32.xlu0 %v7330_v35 }
 0x578   : > { %v3058_v54 = vpop.xlane.xlu0 %3057 }
 0x579   : > { %v3062_v15 = vmax.f32 %v3054_v13, %v3058_v54 }
 0x57b   : > { %v3066_v4 = vsub.f32 %v3054_v13, %v3062_v15  ;;  %3106 = vst.msk [vmem:[#allocation15] sm:$0xff] %vm2857_vm10, %v3062_v15  ;;  %3076 = vperm.xlu1 %5288, %v3062_v15  }
 0x580   : > { %v3061_v21 = vpop.xlane.xlu0 %3060 }
 0x581   : > { %v3063_v28 = vmax.f32 %v3055_v25, %v3061_v21 }
 0x583   : > { %v3067_v29 = vsub.f32 %v3055_v25, %v3063_v28  ;;  %3107 = vst.msk [vmem:[#allocation15 + $0x8] sm:$0xff] %vm2857_vm10, %v3063_v28  ;;  %3081 = vperm.xlu1 %5288, %v3063_v28  }
 0x585   : > { %v3070_v7 = vmul.f32 1.442695, %v3067_v29 }
 0x588   : > { %v2868_v19 = vpop.xlane.xlu0 %2867 }
 0x589   : > { %v2872_v35 = vadd.f32 %v2868_v19, %v2860_v63 }
 0x58b   : > { %2874 = vst.msk [vmem:[#allocation12] sm:$0xff] %vm2857_vm10, %v2872_v35 }
 0x590   : > { %v2891_v62 = vpop.xlane.xlu0 %2890 }
 0x591   : > { %v2893_v60 = vadd.f32 %v2891_v62, %v2877_v61 }
 0x593   : > { %2895 = vst.msk [vmem:[#allocation13 + $0x8] sm:$0xff] %vm2857_vm10, %v2893_v60 }
 0x598   : > { %v2911_v0 = vpop.xlane.xlu0 %2910 }
 0x599   : > { %v2913_v1 = vadd.f32 %v2911_v0, %v2897_v36 }
 0x59b   : > { %2915 = vst.msk [vmem:[#allocation14 + $0x8] sm:$0xff] %vm2857_vm10, %v2913_v1 }
 0x5ad   : > { %2870 = vadd.xlane.f32.xlu1 %v7332_v57  ;;  %v3110_v57 = vmul.f32 %v3036_v20, %v6644_v6  ;;  %v3068_v6 = vmul.f32 1.442695, %v3066_v4 }
 0x5af   : > { %v3114_v44 = vadd.f32 %v3111_v42, %v3110_v57 }
 0x5ed   : > { %v3077_v2 = vpop.permute.xlu1 %3076 }
 0x5ee   : > { %v3084_v37 = vsub.f32 %v3036_v20, %v3077_v2  ;;  %v3085_v3 = vsub.f32 %v3050_v11, %v3077_v2 }
 0x5f0   : > { %v3088_v5 = vmul.f32 1.442695, %v3084_v37  ;;  %v3090_v24 = vmul.f32 1.442695, %v3085_v3 }
 0x5f2   : > { %5354 = vpow2.f32 %v3088_v5 }
 0x5f3   : > { %5356 = vpow2.f32 %v3090_v24 }
 0x5f5   : > { %v3082_v41 = vpop.permute.xlu1 %3081 }
 0x5f6   : > { %v3086_v40 = vsub.f32 %v3038_v50, %v3082_v41  ;;  %v3087_v32 = vsub.f32 %v3052_v27, %v3082_v41 }
 0x5f8   : > { %v5355_v34 = vpop.eup %5354  ;;  %v3092_v31 = vmul.f32 1.442695, %v3086_v40  ;;  %v3094_v22 = vmul.f32 1.442695, %v3087_v32 }
 0x5f9   : > { %v5357_v38 = vpop.eup %5356 }
 0x5fa   : > { %5358 = vpow2.f32 %v3092_v31  ;;  %v3096_v39 = vadd.f32 %v5357_v38, %v5355_v34 }
 0x5fb   : > { %5360 = vpow2.f32 %v3094_v22 }
 0x5fc   : > { %3097 = vadd.xlane.f32.xlu2 %v3096_v39  ;;  %5362 = vpow2.f32 %v3068_v6 }
 0x5fd   : > { %5364 = vpow2.f32 %v3070_v7 }
 0x600   : > { %v5359_v43 = vpop.eup %5358 }
 0x601   : > { %v5361_v17 = vpop.eup %5360 }
 0x602   : > { %v3099_v23 = vadd.f32 %v5361_v17, %v5359_v43  ;;  %v5363_v48 = vpop.eup %5362 }
 0x603   : > { %v3072_v51 = vmul.f32 %v5363_v48, %v3064_v49  ;;  %v5365_v8 = vpop.eup %5364 }
 0x604   : > { %3115 = vadd.xlane.f32.xlu2 %v3114_v44  ;;  %3100 = vadd.xlane.f32.xlu0 %v3099_v23  ;;  %v3073_v47 = vmul.f32 %v5365_v8, %v3065_v9 }
 0x60c   : > { %3118 = vadd.xlane.f32.xlu0 %v3117_v45 }
 0x620   : > { %v2871_v33 = vpop.xlane.xlu1 %2870 }
 0x621   : > { %v2873_v30 = vadd.f32 %v2871_v33, %v2861_v46 }
 0x623   : > { %2875 = vst.msk [vmem:[#allocation12 + $0x8] sm:$0xff] %vm2857_vm10, %v2873_v30 }
 0x66f   : > { %v3098_v52 = vpop.xlane.xlu2 %3097 }
 0x670   : > { %v3102_v53 = vadd.f32 %v3098_v52, %v3072_v51 }
 0x672   : > { %3104 = vst.msk [vmem:[#allocation16] sm:$0xff] %vm2857_vm10, %v3102_v53 }
 0x677   : > { %v3116_v58 = vpop.xlane.xlu2 %3115  ;;  %v3101_v20 = vpop.xlane.xlu0 %3100 }
 0x678   : > { %v3120_v59 = vadd.f32 %v3116_v58, %v3108_v55  ;;  %v3103_v11 = vadd.f32 %v3101_v20, %v3073_v47 }
 0x67a   : > { %3122 = vst.msk [vmem:[#allocation17] sm:$0xff] %vm2857_vm10, %v3120_v59 }
 0x67b   : > { %3105 = vst.msk [vmem:[#allocation16 + $0x8] sm:$0xff] %vm2857_vm10, %v3103_v11 }
 0x67f   : > { %v3119_v26 = vpop.xlane.xlu0 %3118 }
 0x680   : > { %v3121_v50 = vadd.f32 %v3119_v26, %v3109_v18 }
 0x682   : > { %3123 = vst.msk [vmem:[#allocation17 + $0x8] sm:$0xff] %vm2857_vm10, %v3121_v50 }
 0x683 PF: > { %s7770_s8 = sld [smem:[#allocation62_spill]] }
 0x689   : > { %p3124_p5 = scmp.eq.s32.totalorder %s7770_s8, 1 }
 0x68b   : > { %p3125_p7 = pnand %p3124_p5, %p1533_p9 }
 0x68c   : > { %s7772_s12 = sld [smem:[#allocation89_spill]] (!%p3125_p7)  ;;  %s6081_s13 = smov (!%p3125_p7), 1.0  }
 0x68d   : > { %3128 = sbr.rel (%p3125_p7) target bundleno = 2754 (0xac2), region = 180  ;;  %s7773_s2 = sld [smem:[#allocation91_spill]] (!%p3125_p7) }
 0x692   : > { %v3258_v56 = vld [vmem:[#allocation12] sm:$0xff]  ;;  %v3130_v27 = vld [vmem:[#allocation11] sm:$0xff]  ;;  %v3259_v10 = vld [vmem:[#allocation12 + $0x8] sm:$0xff]  ;;  %v6078_v12 = vmov 0  }
 0x693   : > { %5367 = vset.pattern.permute.xlu1 %v6078_v12  ;;  %5366 = vset.pattern.permute.xlu0 %v6078_v12  ;;  %v3260_v13 = vadd.f32 1e-12, %v3258_v56  ;;  %v3132_v54 = vadd.f32 1e-12, %v3130_v27  ;;  %v3261_v15 = vadd.f32 1e-12, %v3259_v10 }
 0x694   : > { %v3131_v4 = vld [vmem:[#allocation11 + $0x8] sm:$0xff]  ;;  %v4977_v29 = vld [vmem:[#allocation36 + $0x28] sm:$0xff]  ;;  %v4976_v16 = vld [vmem:[#allocation36 + $0x20] sm:$0xff] }
 0x695   : > { %v4979_v25 = vld [vmem:[#allocation36 + $0x38] sm:$0xff]  ;;  %5370 = vrsqrt.f32 %v3260_v13  ;;  %v3133_v21 = vadd.f32 1e-12, %v3131_v4  ;;  %v4978_v28 = vld [vmem:[#allocation36 + $0x30] sm:$0xff]  ;;  %vm3268_vm12 = vweird.f32 %v3260_v13  ;;  %vm3140_vm1 = vweird.f32 %v3132_v54  ;;  %v4973_v46 = vld [vmem:[#allocation36 + $0x8] sm:$0xff] }
 0x696   : > { %5372 = vrsqrt.f32 %v3132_v54  ;;  %3244 = vmatpush.bf16.msra.mxu0 %v4979_v25  ;;  %3301 = vmatpush.bf16.msra.mxu1 %v4979_v25  ;;  %vm3278_vm9 = vweird.f32 %v3261_v15  ;;  %v4975_v14 = vld [vmem:[#allocation36 + $0x18] sm:$0xff]  ;;  %v4974_v45 = vld [vmem:[#allocation36 + $0x10] sm:$0xff]  ;;  %v4972_v33 = vld [vmem:[#allocation36] sm:$0xff] }
 0x697   : > { %5374 = vrsqrt.f32 %v3261_v15  ;;  %vm3150_vm11 = vweird.f32 %v3133_v21  ;;  %v3282_v30 = vld [vmem:[#allocation10 + $0x8] sm:$0xff]  ;;  %v3154_v7 = vld [vmem:[#allocation9] sm:$0xff]  ;;  %v3283_v53 = vld [vmem:[#allocation10] sm:$0xff] }
 0x698   : > { %5376 = vrsqrt.f32 %v3133_v21  ;;  %v5368_v51 = vld [vmem:[%s7772_s12] ss:$0 sm:$0xff]  ;;  %v3155_v9 = vld [vmem:[#allocation9 + $0x8] sm:$0xff] }
 0x69a   : > { %3245 = vmatpush.bf16.msra.mxu0 %v4978_v28  ;;  %3302 = vmatpush.bf16.msra.mxu1 %v4978_v28 }
 0x69b   : > { %v5371_v63 = vpop.eup %5370 }
 0x69c   : > { %v5373_v19 = vpop.eup %5372  ;;  %v3263_v35 = vmul.f32 %v5371_v63, %v3260_v13  ;;  %vm3269_vm13 = vweird.f32 %v5371_v63  ;;  %v5369_v13 = vld [vmem:[%s7773_s2] ss:$0 sm:$0xff] }
 0x69d   : > { %v5375_v61 = vpop.eup %5374  ;;  %v3135_v62 = vmul.f32 %v5373_v19, %v3132_v54  ;;  %vm3141_vm0 = vweird.f32 %v5373_v19  ;;  %vm3270_vm2 = vmor %vm3268_vm12, %vm3269_vm13 }
 0x69e   : > { %v5377_v60 = vpop.eup %5376  ;;  %v3264_v36 = vmul.f32 %v5371_v63, %v3263_v35  ;;  %v3273_v0 = vmul.f32 %v5375_v61, %v3261_v15  ;;  %3246 = vmatpush.bf16.msra.mxu0 %v4977_v29  ;;  %3303 = vmatpush.bf16.msra.mxu1 %v4977_v29  ;;  %vm3142_vm6 = vmor %vm3140_vm1, %vm3141_vm0  ;;  %vm3279_vm3 = vweird.f32 %v5375_v61 }
 0x69f   : > { %v3136_v1 = vmul.f32 %v5373_v19, %v3135_v62  ;;  %v3145_v2 = vmul.f32 %v5377_v60, %v3133_v21  ;;  %vm3151_vm5 = vweird.f32 %v5377_v60  ;;  %vm3280_vm8 = vmor %vm3278_vm9, %vm3279_vm3 }
 0x6a0   : > { %v3265_v37 = vmul.f32 0.5, %v3264_v36  ;;  %v3274_v3 = vmul.f32 %v5375_v61, %v3273_v0  ;;  %vm3152_vm15 = vmor %vm3150_vm11, %vm3151_vm5  ;;  %v7395_v0 = vld [vmem:[#allocation7] sm:$0xff] }
 0x6a1   : > { %v3137_v5 = vmul.f32 0.5, %v3136_v1  ;;  %v3146_v24 = vmul.f32 %v5377_v60, %v3145_v2  ;;  %v7399_v1 = vmul.f32 %v7395_v0, %v7395_v0 }
 0x6a2   : > { %v3266_v41 = vsub.f32 1.5, %v3265_v37  ;;  %v3275_v40 = vmul.f32 0.5, %v3274_v3  ;;  %3247 = vmatpush.bf16.msra.mxu0 %v4976_v16  ;;  %3304 = vmatpush.bf16.msra.mxu1 %v4976_v16 }
 0x6a3   : > { %v3138_v32 = vsub.f32 1.5, %v3137_v5  ;;  %v3147_v34 = vmul.f32 0.5, %v3146_v24 }
 0x6a4   : > { %v3267_v31 = vmul.f32 %v5371_v63, %v3266_v41  ;;  %v3276_v22 = vsub.f32 1.5, %v3275_v40 }
 0x6a5   : > { %v3139_v38 = vmul.f32 %v5373_v19, %v3138_v32  ;;  %v3148_v39 = vsub.f32 1.5, %v3147_v34 }
 0x6a6   : > { %v3271_v57 = vsel %vm3270_vm2, %v5371_v63, %v3267_v31  ;;  %v3277_v43 = vmul.f32 %v5375_v61, %v3276_v22  ;;  %3248 = vmatpush.bf16.msra.mxu0 %v4975_v14  ;;  %3305 = vmatpush.bf16.msra.mxu1 %v4975_v14 }
 0x6a7   : > { %3286 = vperm.xlu1 %5367, %v3271_v57   ;;  %v3143_v42 = vsel %vm3142_vm6, %v5373_v19, %v3139_v38  ;;  %v3149_v17 = vmul.f32 %v5377_v60, %v3148_v39 }
 0x6a8   : > { %3158 = vperm.xlu0 %5366, %v3143_v42   ;;  %v3281_v44 = vsel %vm3280_vm8, %v5375_v61, %v3277_v43 }
 0x6a9   : > { %v3153_v23 = vsel %vm3152_vm15, %v5377_v60, %v3149_v17  ;;  %v7388_v60 = vld [vmem:[#allocation7 + $0x8] sm:$0xff] }
 0x6aa   : > { %3249 = vmatpush.bf16.msra.mxu0 %v4974_v45  ;;  %3306 = vmatpush.bf16.msra.mxu1 %v4974_v45  ;;  %v7392_v36 = vmul.f32 %v7388_v60, %v7388_v60 }
 0x6ae   : > { %3250 = vmatpush.bf16.msra.mxu0 %v4973_v46  ;;  %3307 = vmatpush.bf16.msra.mxu1 %v4973_v46 }
 0x6af   : > { %3291 = vperm.xlu1 %5367, %v3281_v44  }
 0x6b0   : > { %3163 = vperm.xlu0 %5366, %v3153_v23  }
 0x6b2   : > { %3251 = vmatpush.bf16.msra.mxu0 %v4972_v33  ;;  %3308 = vmatpush.bf16.msra.mxu1 %v4972_v33 }
 0x719   : > { %v3287_v6 = vpop.permute.xlu1 %3286 }
 0x71a   : > { %v3159_v48 = vpop.permute.xlu0 %3158  ;;  %v3294_v49 = vmul.f32 %v3287_v6, %v3282_v30 }
 0x71b   : > { %v3166_v52 = vmul.f32 %v3159_v48, %v3154_v7 }
 0x71c   : > { %v3296_v8 = vadd.f32 %v5368_v51, %v3294_v49 }
 0x71d   : > { %v3171_v55 = vadd.f32 %v5368_v51, %v3166_v52 }
 0x71e   : > { %5378 = vtanh.f32 %v3296_v8 }
 0x71f   : > { %5380 = vtanh.f32 %v3171_v55 }
 0x721   : > { %v3292_v47 = vpop.permute.xlu1 %3291 }
 0x722   : > { %v3295_v58 = vmul.f32 %v3292_v47, %v3283_v53  ;;  %v3164_v20 = vpop.permute.xlu0 %3163 }
 0x723   : > { %v3167_v59 = vmul.f32 %v3164_v20, %v3155_v9 }
 0x724   : > { %v3297_v11 = vadd.f32 %v5368_v51, %v3295_v58  ;;  %v5379_v26 = vpop.eup %5378 }
 0x725   : > { %v3172_v18 = vadd.f32 %v5368_v51, %v3167_v59  ;;  %v5381_v50 = vpop.eup %5380 }
 0x726   : > { %5382 = vtanh.f32 %v3297_v11 }
 0x727   : > { %5384 = vtanh.f32 %v3172_v18 }
 0x72c   : > { %v5383_v56 = vpop.eup %5382 }
 0x72d   : > { %v5385_v27 = vpop.eup %5384  ;;  %v3300_v10 = vpack.c.bf16 %v5383_v56, %v5379_v26 }
 0x72e   : > { %v3175_v12 = vpack.c.bf16 %v5385_v27, %v5381_v50 }
 0x72f   : > { %3309 = vmatmul.bf16.vlgmr.msra.gmra.mxu1 %v3300_v10 }
 0x730   : > { %3252 = vmatmul.bf16.vlgmr.msra.gmra.mxu0 %v3175_v12 }
 0x7ac   : > { %v3310_v54 = vpop.f32.mrf.mxu1 }
 0x7ad   : > { %v3253_v15 = vpop.f32.mrf.mxu0  ;;  %v7372_v4 = vadd.f32 %v5369_v13, %v3310_v54 }
 0x7ae   : > { %v7374_v25 = vadd.f32 %v5369_v13, %v3253_v15 }
 0x7af   : > { %v3535_v21 = vmul.f32 %v7372_v4, %v7372_v4 }
 0x7b0   : > { %v3362_v28 = vmul.f32 %v7374_v25, %v7374_v25 }
 0x7b1   : > { %3537 = vadd.xlane.f32.xlu0 %v3535_v21 }
 0x7b2   : > { %3364 = vadd.xlane.f32.xlu2 %v3362_v28 }
 0x7b4   : > { %v3312_v29 = vpop.f32.mrf.mxu1 }
 0x7b5   : > { %v3255_v63 = vpop.f32.mrf.mxu0  ;;  %v7380_v19 = vadd.f32 %v5369_v13, %v3312_v29 }
 0x7b6   : > { %v7382_v35 = vadd.f32 %v5369_v13, %v3255_v63 }
 0x7b7   : > { %v3536_v61 = vmul.f32 %v7380_v19, %v7380_v19 }
 0x7b8   : > { %v3363_v62 = vmul.f32 %v7382_v35, %v7382_v35 }
 0x7b9   : > { %3539 = vadd.xlane.f32.xlu1 %v3536_v61 }
 0x7ba   : > { %3366 = vadd.xlane.f32.xlu2 %v3363_v62 }
 0x7c2   : > { %3332 = vadd.xlane.f32.xlu2 %v7392_v36 }
 0x7ca   : > { %3334 = vadd.xlane.f32.xlu2 %v7399_v1 }
 0x824   : > { %v3538_v2 = vpop.xlane.xlu0 %3537 }
 0x825   : > { %v3541_v37 = vadd.f32 1e-12, %v3538_v2  ;;  %v3365_v3 = vpop.xlane.xlu2 %3364 }
 0x826   : > { %v3368_v5 = vadd.f32 1e-12, %v3365_v3 }
 0x827   : > { %5386 = vrsqrt.f32 %v3541_v37  ;;  %vm3549_vm14 = vweird.f32 %v3541_v37 }
 0x828   : > { %5388 = vrsqrt.f32 %v3368_v5  ;;  %vm3376_vm12 = vweird.f32 %v3368_v5 }
 0x82c   : > { %v3540_v24 = vpop.xlane.xlu1 %3539 }
 0x82d   : > { %v5387_v41 = vpop.eup %5386  ;;  %v3542_v40 = vadd.f32 1e-12, %v3540_v24  ;;  %v3367_v32 = vpop.xlane.xlu2 %3366 }
 0x82e   : > { %v5389_v34 = vpop.eup %5388  ;;  %v3544_v31 = vmul.f32 %v5387_v41, %v3541_v37  ;;  %v3369_v22 = vadd.f32 1e-12, %v3367_v32  ;;  %vm3550_vm4 = vweird.f32 %v5387_v41 }
 0x82f   : > { %v3371_v38 = vmul.f32 %v5389_v34, %v3368_v5  ;;  %5390 = vrsqrt.f32 %v3542_v40  ;;  %vm3377_vm7 = vweird.f32 %v5389_v34  ;;  %vm3551_vm10 = vmor %vm3549_vm14, %vm3550_vm4  ;;  %vm3559_vm2 = vweird.f32 %v3542_v40 }
 0x830   : > { %v3545_v39 = vmul.f32 %v5387_v41, %v3544_v31  ;;  %5392 = vrsqrt.f32 %v3369_v22  ;;  %vm3378_vm13 = vmor %vm3376_vm12, %vm3377_vm7  ;;  %vm3386_vm9 = vweird.f32 %v3369_v22 }
 0x831   : > { %v3372_v57 = vmul.f32 %v5389_v34, %v3371_v38 }
 0x832   : > { %v3546_v42 = vmul.f32 0.5, %v3545_v39 }
 0x833   : > { %v3373_v43 = vmul.f32 0.5, %v3372_v57 }
 0x834   : > { %v3547_v17 = vsub.f32 1.5, %v3546_v42 }
 0x835   : > { %v5391_v44 = vpop.eup %5390  ;;  %v3374_v23 = vsub.f32 1.5, %v3373_v43  ;;  %v3333_v16 = vpop.xlane.xlu2 %3332 }
 0x836   : > { %v5393_v14 = vpop.eup %5392  ;;  %v3554_v45 = vmul.f32 %v5391_v44, %v3542_v40  ;;  %v3336_v46 = vadd.f32 1e-12, %v3333_v16  ;;  %v3548_v33 = vmul.f32 %v5387_v41, %v3547_v17  ;;  %vm3560_vm1 = vweird.f32 %v5391_v44 }
 0x837   : > { %v3381_v30 = vmul.f32 %v5393_v14, %v3369_v22  ;;  %v3375_v6 = vmul.f32 %v5389_v34, %v3374_v23  ;;  %vm3387_vm0 = vweird.f32 %v5393_v14  ;;  %vm3561_vm6 = vmor %vm3559_vm2, %vm3560_vm1  ;;  %vm3482_vm1 = vcmask 122880  }
 0x838   : > { %v3555_v7 = vmul.f32 %v5391_v44, %v3554_v45  ;;  %5394 = vrsqrt.f32 %v3336_v46  ;;  %v3552_v51 = vsel %vm3551_vm10, %v5387_v41, %v3548_v33  ;;  %vm3388_vm3 = vmor %vm3386_vm9, %vm3387_vm0  ;;  %vm3344_vm5 = vweird.f32 %v3336_v46 }
 0x839   : > { %v3382_v48 = vmul.f32 %v5393_v14, %v3381_v30  ;;  %v3379_v53 = vsel %vm3378_vm13, %v5389_v34, %v3375_v6  ;;  %v3563_v47 = vmul.f32 %v3552_v51, %v7372_v4  ;;  %vm3470_vm10 = vcmask 130048  }
 0x83a   : > { %v3556_v49 = vmul.f32 0.5, %v3555_v7  ;;  %v3390_v59 = vmul.f32 %v3379_v53, %v7374_v25  ;;  %vm3448_vm13 = vcmask 7168  }
 0x83b   : > { %v3383_v52 = vmul.f32 0.5, %v3382_v48  ;;  %v3565_v12 = vpack.c.bf16 %v3563_v47, %v3563_v47 }
 0x83c   : > { %v3557_v8 = vsub.f32 1.5, %v3556_v49  ;;  %v3392_v54 = vpack.c.bf16 %v3390_v59, %v3390_v59 }
 0x83d   : > { %v3384_v9 = vsub.f32 1.5, %v3383_v52  ;;  %v3335_v55 = vpop.xlane.xlu2 %3334  ;;  %v3569_v28 = vunpack.c.l.b16 %v3565_v12  ;;  %v3593_v43 = vunpack.c.l.bf16 %v3565_v12  ;;  %v3319_v52 = vlaneseq }
 0x83e   : > { %v5395_v58 = vpop.eup %5394  ;;  %v3337_v20 = vadd.f32 1e-12, %v3335_v55  ;;  %v3558_v11 = vmul.f32 %v5391_v44, %v3557_v8  ;;  %v3402_v61 = vunpack.c.l.b16 %v3392_v54  ;;  %v3428_v31 = vunpack.c.l.bf16 %v3392_v54 }
 0x83f   : > { %v3339_v18 = vmul.f32 %v5395_v58, %v3336_v46  ;;  %v3385_v26 = vmul.f32 %v5393_v14, %v3384_v9  ;;  %vm3345_vm11 = vweird.f32 %v5395_v58  ;;  %v6079_v54 = vmov 0.0  }
 0x840   : > { %5396 = vrsqrt.f32 %v3337_v20  ;;  %v3562_v50 = vsel %vm3561_vm6, %v5391_v44, %v3558_v11  ;;  %vm3346_vm8 = vmor %vm3344_vm5, %vm3345_vm11  ;;  %vm3354_vm14 = vweird.f32 %v3337_v20 }
 0x841   : > { %v3340_v56 = vmul.f32 %v5395_v58, %v3339_v18  ;;  %v3389_v27 = vsel %vm3388_vm3, %v5393_v14, %v3385_v26  ;;  %v3564_v10 = vmul.f32 %v3562_v50, %v7380_v19 }
 0x842   : > { %v3391_v13 = vmul.f32 %v3389_v27, %v7382_v35 }
 0x843   : > { %v3341_v15 = vmul.f32 0.5, %v3340_v56  ;;  %v3566_v4 = vpack.c.bf16 %v3564_v10, %v3564_v10 }
 0x844   : > { %v3393_v21 = vpack.c.bf16 %v3391_v13, %v3391_v13 }
 0x845   : > { %v3342_v25 = vsub.f32 1.5, %v3341_v15  ;;  %v3570_v29 = vunpack.c.l.b16 %v3566_v4  ;;  %v3594_v46 = vunpack.c.l.bf16 %v3566_v4 }
 0x846   : > { %v5397_v63 = vpop.eup %5396  ;;  %v3403_v62 = vunpack.c.l.b16 %v3393_v21  ;;  %v3429_v14 = vunpack.c.l.bf16 %v3393_v21 }
 0x847   : > { %v3343_v2 = vmul.f32 %v5395_v58, %v3342_v25  ;;  %v3349_v37 = vmul.f32 %v5397_v63, %v3337_v20  ;;  %v3571_v3 = vpack.c.b16 %v3570_v29, %v3569_v28  ;;  %vm3355_vm15 = vweird.f32 %v5397_v63 }
 0x848   : > { %v3404_v19 = vpack.c.b16 %v3403_v62, %v3402_v61  ;;  %vm3356_vm4 = vmor %vm3354_vm14, %vm3355_vm15  ;;  %v7408_v20 = vand.u32 127, %v3319_v52 }
 0x849   : > { %v3350_v5 = vmul.f32 %v5397_v63, %v3349_v37  ;;  %3580 = vmatpush.bf16.xpose.msra.mxu3 %v3571_v3  ;;  %v3347_v35 = vsel %vm3346_vm8, %v5395_v58, %v3343_v2  ;;  %v3320_v58 = vshrl.u32 %v3319_v52, 7 }
 0x84a   : > { %3413 = vmatpush.bf16.xpose.msra.mxu2 %v3404_v19  ;;  %v3358_v24 = vmul.f32 %v3347_v35, %v7388_v60  ;;  %vm3858_vm14 = vcmp.eq.s32.totalorder %v7408_v20, 0 }
 0x84b   : > { %v3351_v41 = vmul.f32 0.5, %v3350_v5  ;;  %vm3324_vm7 = vcmp.ne.s32.totalorder %v3320_v58, %v7408_v20  ;;  %v3321_v25 = vadd.s32 8, %v3320_v58 }
 0x84c   : > { %v3360_v40 = vpack.c.bf16 %v3358_v24, %v3358_v24  ;;  %v4819_v15 = vsel %vm3324_vm7, 1.0, %v6079_v54  ;;  %vm3864_vm7 = vcmp.eq.s32.totalorder %v7408_v20, 2 }
 0x84d   : > { %v3352_v32 = vsub.f32 1.5, %v3351_v41  ;;  %vm3325_vm12 = vcmp.ne.s32.totalorder %v3321_v25, %v7408_v20  ;;  %v6080_v25 = vmov 16.0  }
 0x84e   : > { %v3426_v34 = vunpack.c.l.bf16 %v3360_v40  ;;  %v3396_v17 = vunpack.c.l.b16 %v3360_v40  ;;  %v4820_v35 = vsel %vm3325_vm12, 1.0, %v6079_v54  ;;  %vm3870_vm12 = vcmp.eq.s32.totalorder %v7408_v20, 4 }
 0x84f   : > { %v3353_v22 = vmul.f32 %v5397_v63, %v3352_v32 }
 0x850   : > { %v3430_v38 = vmul.f32 %v3428_v31, %v3426_v34  ;;  %v3595_v23 = vmul.f32 %v3593_v43, %v3426_v34 }
 0x851   : > { %v3357_v39 = vsel %vm3356_vm4, %v5397_v63, %v3353_v22  ;;  %vm3861_vm4 = vcmp.eq.s32.totalorder %v7408_v20, 1 }
 0x852   : > { %3432 = vadd.xlane.f32.xlu2 %v3430_v38  ;;  %v3359_v57 = vmul.f32 %v3357_v39, %v7395_v0 }
 0x854   : > { %v3361_v42 = vpack.c.bf16 %v3359_v57, %v3359_v57 }
 0x856   : > { %v3397_v44 = vunpack.c.l.b16 %v3361_v42  ;;  %v3427_v16 = vunpack.c.l.bf16 %v3361_v42 }
 0x858   : > { %v3398_v60 = vpack.c.b16 %v3397_v44, %v3396_v17  ;;  %v3431_v45 = vmul.f32 %v3429_v14, %v3427_v16  ;;  %v3596_v33 = vmul.f32 %v3594_v46, %v3427_v16 }
 0x85a   : > { %3597 = vadd.xlane.f32.xlu2 %v3595_v23  ;;  %3414 = vmatmul.bf16.vlgmr.msra.gmra.mxu2 %v3398_v60 }
 0x85b   : > { %3581 = vmatmul.bf16.vlgmr.msra.gmra.mxu3 %v3398_v60 }
 0x862   : > { %3434 = vadd.xlane.f32.xlu2 %v3431_v45 }
 0x86a   : > { %3599 = vadd.xlane.f32.xlu2 %v3596_v33 }
 0x8c5   : > { %v3433_v30 = vpop.xlane.xlu2 %3432 }
 0x8c6   : > { %v3436_v0 = vmul.f32 5.0, %v3433_v30 }
 0x8c8   : > { %v3438_v49 = vmul.f32 1.442695, %v3436_v0 }
 0x8ca   : > { %5398 = vpow2.f32 %v3438_v49 }
 0x8cd   : > { %v3598_v6 = vpop.xlane.xlu2 %3597 }
 0x8ce   : > { %v3601_v26 = vmul.f32 5.0, %v3598_v6 }
 0x8d0   : > { %v5399_v50 = vpop.eup %5398  ;;  %v3603_v4 = vmul.f32 1.442695, %v3601_v26 }
 0x8d5   : > { %v3435_v7 = vpop.xlane.xlu2 %3434 }
 0x8d6   : > { %v3437_v48 = vmul.f32 5.0, %v3435_v7 }
 0x8d8   : > { %v3440_v51 = vmul.f32 1.442695, %v3437_v48 }
 0x8da   : > { %5400 = vpow2.f32 %v3440_v51 }
 0x8dd   : > { %v3415_v53 = vpop.f32.mrf.mxu2  ;;  %v3600_v55 = vpop.xlane.xlu2 %3599 }
 0x8de   : > { %v3420_v8 = vmul.f32 5.0, %v3415_v53  ;;  %v3582_v9 = vpop.f32.mrf.mxu3  ;;  %v3602_v18 = vmul.f32 5.0, %v3600_v55 }
 0x8df   : > { %v3587_v47 = vmul.f32 5.0, %v3582_v9 }
 0x8e0   : > { %v3422_v59 = vmul.f32 1.442695, %v3420_v8  ;;  %v5401_v56 = vpop.eup %5400  ;;  %v3605_v27 = vmul.f32 1.442695, %v3602_v18 }
 0x8e1   : > { %v3589_v11 = vmul.f32 1.442695, %v3587_v47 }
 0x8e2   : > { %5402 = vpow2.f32 %v3422_v59 }
 0x8e3   : > { %5404 = vpow2.f32 %v3589_v11 }
 0x8e4   : > { %5406 = vlog2.f32 %v5399_v50 }
 0x8e5   : > { %v3417_v10 = vpop.f32.mrf.mxu2  ;;  %5408 = vlog2.f32 %v5401_v56  ;;  %v7420_v56 = vld [vmem:[#allocation2] sm:$0xff] }
 0x8e6   : > { %v3421_v12 = vmul.f32 5.0, %v3417_v10  ;;  %v3584_v13 = vpop.f32.mrf.mxu3  ;;  %5410 = vpow2.f32 %v3605_v27  ;;  %v7422_v27 = vld [vmem:[#allocation2 + $0x8] sm:$0xff]  ;;  %v3317_v10 = vld [vmem:[#allocation8] sm:$0xff] }
 0x8e7   : > { %v3588_v21 = vmul.f32 5.0, %v3584_v13  ;;  %v3700_v13 = vsel %vm3448_vm13, %v7422_v27, 0.0  ;;  %v3819_v54 = vmul.f32 1.442695, %v3317_v10 }
 0x8e8   : > { %v5403_v28 = vpop.eup %5402  ;;  %v3424_v29 = vmul.f32 1.442695, %v3421_v12  ;;  %v3699_v12 = vsel %vm3448_vm13, %v7420_v56, 0.0 }
 0x8e9   : > { %v5405_v63 = vpop.eup %5404  ;;  %v3591_v61 = vmul.f32 1.442695, %v3588_v21  ;;  %v3442_v62 = vmul.f32 %v5403_v28, %v4819_v15  ;;  %v3815_v21 = vadd.f32 1.0, %v3317_v10  ;;  %v3778_v10 = vld [vmem:[#allocation15 + $0x8] sm:$0xff] }
 0x8ea   : > { %5412 = vpow2.f32 %v3424_v29  ;;  %v3607_v2 = vmul.f32 %v5405_v63, %v4819_v15  ;;  %v5407_v19 = vpop.eup %5406  ;;  %v3701_v15 = vadd.f32 %v3700_v13, %v3699_v12 }
 0x8eb   : > { %5414 = vpow2.f32 %v3603_v4  ;;  %v3471_v37 = vsel %vm3470_vm10, %v3442_v62, 0.0  ;;  %v5409_v5 = vpop.eup %5408  ;;  %v3445_v42 = vmul.f32 0.6931472, %v5407_v19  ;;  %v3817_v28 = vsub.f32 %v3815_v21, %v7392_v36  ;;  %v3788_v21 = vld [vmem:[#allocation17 + $0x8] sm:$0xff] }
 0x8ec   : > { %5416 = vpow2.f32 %v3591_v61  ;;  %v3634_v3 = vsel %vm3470_vm10, %v3607_v2, 0.0  ;;  %3503 = vadd.xlane.f32.xlu0 %v3471_v37  ;;  %v5411_v24 = vpop.eup %5410  ;;  %v3447_v38 = vmul.f32 0.6931472, %v5409_v5 }
 0x8ed   : > { %3665 = vadd.xlane.f32.xlu2 %v3634_v3  ;;  %5418 = vlog2.f32 %v5411_v24  ;;  %v3449_v14 = vsel %vm3448_vm13, %v3445_v42, 0.0 }
 0x8ee   : > { %v3450_v44 = vsel %vm3448_vm13, %v3447_v38, 0.0 }
 0x8ef   : > { %v3451_v30 = vadd.f32 %v3450_v44, %v3449_v14 }
 0x8f0   : > { %v5413_v41 = vpop.eup %5412 }
 0x8f1   : > { %v5415_v40 = vpop.eup %5414  ;;  %v3443_v32 = vmul.f32 %v5413_v41, %v4820_v35 }
 0x8f2   : > { %v5417_v34 = vpop.eup %5416  ;;  %5420 = vlog2.f32 %v5415_v40 }
 0x8f3   : > { %v3608_v31 = vmul.f32 %v5417_v34, %v4820_v35  ;;  %v3472_v22 = vsel %vm3470_vm10, %v3443_v32, 0.0  ;;  %v5419_v23 = vpop.eup %5418  ;;  %v3318_v34 = vld [vmem:[#allocation8 + $0x8] sm:$0xff] }
 0x8f4   : > { %3505 = vadd.xlane.f32.xlu1 %v3472_v22  ;;  %v3473_v39 = vadd.f32 %v3472_v22, %v3471_v37  ;;  %v3612_v6 = vmul.f32 0.6931472, %v5419_v23 }
 0x8f5   : > { %v3635_v57 = vsel %vm3470_vm10, %v3608_v31, 0.0  ;;  %vm3867_vm10 = vcmp.eq.s32.totalorder %v7408_v20, 3 }
 0x8f6   : > { %v3636_v43 = vadd.f32 %v3635_v57, %v3634_v3  ;;  %3667 = vadd.xlane.f32.xlu0 %v3635_v57  ;;  %v3474_v17 = vrot.slane %v3473_v39, 4  ;;  %v3614_v52 = vsel %vm3448_vm13, %v3612_v6, 0.0 }
 0x8f8   : > { %v3637_v60 = vrot.slane %v3636_v43, 4  ;;  %v3475_v16 = vadd.f32 %v3474_v17, %v3473_v39  ;;  %v5421_v45 = vpop.eup %5420  ;;  %v3821_v17 = vmul.f32 1.442695, %v3318_v34 }
 0x8f9   : > { %v3610_v48 = vmul.f32 0.6931472, %v5421_v45 }
 0x8fa   : > { %v3638_v46 = vadd.f32 %v3637_v60, %v3636_v43  ;;  %v3476_v33 = vrot.slane %v3475_v16, 2 }
 0x8fb   : > { %v3613_v9 = vsel %vm3448_vm13, %v3610_v48, 0.0 }
 0x8fc   : > { %v3639_v7 = vrot.slane %v3638_v46, 2  ;;  %v3477_v0 = vadd.f32 %v3476_v33, %v3475_v16  ;;  %3452 = vadd.xlane.f32.xlu1 %v3451_v30  ;;  %v3615_v55 = vadd.f32 %v3614_v52, %v3613_v9 }
 0x8fe   : > { %v3640_v49 = vadd.f32 %v3639_v7, %v3638_v46  ;;  %v3478_v51 = vrot.slane %v3477_v0, 1  ;;  %v3816_v46 = vadd.f32 1.0, %v3318_v34 }
 0x900   : > { %v3479_v53 = vadd.f32 %v3478_v51, %v3477_v0  ;;  %v3641_v8 = vrot.slane %v3640_v49, 1  ;;  %v3818_v0 = vsub.f32 %v3816_v46, %v7399_v1 }
 0x902   : > { %5422 = vlog2.f32 %v3479_v53  ;;  %v3642_v47 = vadd.f32 %v3641_v8, %v3640_v49 }
 0x904   : > { %3616 = vadd.xlane.f32.xlu1 %v3615_v55  ;;  %5424 = vlog2.f32 %v3642_v47  ;;  %v3779_v55 = vld [vmem:[#allocation16] sm:$0xff]  ;;  %v3780_v47 = vld [vmem:[#allocation16 + $0x8] sm:$0xff] }
 0x905   : > { %5426 = vpow2.f32 %v3819_v54 }
 0x906   : > { %5428 = vrcp.f32 %v6080_v25  ;;  %v3745_v25 = vld [vmem:[#allocation14] sm:$0xff] }
 0x908   : > { %v5423_v58 = vpop.eup %5422 }
 0x909   : > { %v3481_v59 = vmul.f32 0.6931472, %v5423_v58 }
 0x90a   : > { %v5425_v18 = vpop.eup %5424 }
 0x90b   : > { %v3483_v11 = vsel %vm3482_vm1, %v3481_v59, 0.0  ;;  %v3644_v26 = vmul.f32 0.6931472, %v5425_v18  ;;  %v5427_v29 = vpop.eup %5426 }
 0x90c   : > { %3484 = vadd.xlane.f32.xlu2 %v3483_v11  ;;  %3702 = vadd.xlane.f32.xlu1 %v3701_v15  ;;  %v3823_v63 = vsub.f32 %v3817_v28, %v5427_v29  ;;  %v5429_v61 = vpop.eup %5428  ;;  %v3746_v28 = vld [vmem:[#allocation14 + $0x8] sm:$0xff]  ;;  %v3714_v29 = vld [vmem:[#allocation13] sm:$0xff] }
 0x90d   : > { %v3645_v50 = vsel %vm3482_vm1, %v3644_v26, 0.0  ;;  %v3462_v19 = vmul.f32 16.0, %v5429_v61  ;;  %vm3466_vm0 = vweird.f32 %v5429_v61  ;;  %vm3876_vm1 = vcmp.eq.s32.totalorder %v7408_v20, 6 }
 0x90f   : > { %v3463_v24 = vsub.f32 1.0, %v3462_v19 }
 0x911   : > { %v3464_v42 = vmul.f32 %v5429_v61, %v3463_v24 }
 0x913   : > { %v3465_v16 = vadd.f32 %v5429_v61, %v3464_v42 }
 0x914   : > { %3646 = vadd.xlane.f32.xlu2 %v3645_v50  ;;  %v3777_v50 = vld [vmem:[#allocation15] sm:$0xff] }
 0x915   : > { %v3467_v6 = vsel %vm3466_vm0, %v5429_v61, %v3465_v16  ;;  %vm3879_vm0 = vcmp.eq.s32.totalorder %v7408_v20, 7 }
 0x91c   : > { %3825 = vadd.xlane.f32.xlu2 %v3823_v63 }
 0x95f   : > { %v3504_v4 = vpop.xlane.xlu0 %3503 }
 0x960   : > { %5430 = vlog2.f32 %v3504_v4  ;;  %v3666_v2 = vpop.xlane.xlu2 %3665  ;;  %v3787_v4 = vld [vmem:[#allocation17] sm:$0xff] }
 0x966   : > { %v5431_v3 = vpop.eup %5430 }
 0x967   : > { %v3506_v62 = vpop.xlane.xlu1 %3505  ;;  %v3508_v5 = vmul.f32 0.6931472, %v5431_v3  ;;  %v3716_v3 = vsel %vm3448_vm13, %v3714_v29, 0.0 }
 0x968   : > { %5432 = vlog2.f32 %v3506_v62  ;;  %v3747_v62 = vsel %vm3448_vm13, %v3745_v25, 0.0 }
 0x969   : > { %v3668_v37 = vpop.xlane.xlu0 %3667  ;;  %v3511_v31 = vsel %vm3448_vm13, %v3508_v5, 0.0 }
 0x96a   : > { %5434 = vlog2.f32 %v3668_v37  ;;  %v3715_v37 = vld [vmem:[#allocation13 + $0x8] sm:$0xff] }
 0x96b   : > { %5436 = vlog2.f32 %v3666_v2  ;;  %v3748_v2 = vsel %vm3448_vm13, %v3746_v28, 0.0  ;;  %v3717_v5 = vsel %vm3448_vm13, %v3715_v37, 0.0 }
 0x96c   : > { %5438 = vpow2.f32 %v3821_v17  ;;  %v3749_v19 = vadd.f32 %v3748_v2, %v3747_v62 }
 0x96d   : > { %5440 = vlog2.f32 %v3779_v55 }
 0x96e   : > { %v5433_v35 = vpop.eup %5432  ;;  %5442 = vlog2.f32 %v3780_v47  ;;  %3750 = vadd.xlane.f32.xlu2 %v3749_v19 }
 0x96f   : > { %v3510_v41 = vmul.f32 0.6931472, %v5433_v35  ;;  %v3453_v40 = vpop.xlane.xlu1 %3452  ;;  %v3718_v35 = vadd.f32 %v3717_v5, %v3716_v3 }
 0x970   : > { %v5435_v32 = vpop.eup %5434  ;;  %v3454_v36 = vrot.slane %v3453_v40, 4 }
 0x971   : > { %v3512_v22 = vsel %vm3448_vm13, %v3510_v41, 0.0  ;;  %v5437_v38 = vpop.eup %5436  ;;  %v3672_v43 = vmul.f32 0.6931472, %v5435_v32  ;;  %3719 = vadd.xlane.f32.xlu1 %v3718_v35 }
 0x972   : > { %v3455_v39 = vadd.f32 %v3454_v36, %v3453_v40  ;;  %v3513_v57 = vadd.f32 %v3512_v22, %v3511_v31  ;;  %v3670_v23 = vmul.f32 0.6931472, %v5437_v38  ;;  %v5439_v48 = vpop.eup %5438 }
 0x973   : > { %v3674_v14 = vsel %vm3448_vm13, %v3672_v43, 0.0  ;;  %v3824_v52 = vsub.f32 %v3818_v0, %v5439_v48  ;;  %v5441_v11 = vpop.eup %5440 }
 0x974   : > { %v3456_v44 = vrot.slane %v3455_v39, 2  ;;  %3514 = vadd.xlane.f32.xlu0 %v3513_v57  ;;  %v3673_v33 = vsel %vm3448_vm13, %v3670_v23, 0.0  ;;  %v5443_v18 = vpop.eup %5442  ;;  %v3782_v26 = vmul.f32 0.6931472, %v5441_v11 }
 0x975   : > { %v3675_v7 = vadd.f32 %v3674_v14, %v3673_v33  ;;  %v3784_v1 = vmul.f32 0.6931472, %v5443_v18 }
 0x976   : > { %v3457_v60 = vadd.f32 %v3456_v44, %v3455_v39  ;;  %v3785_v12 = vadd.f32 %v3782_v26, %v3777_v50 }
 0x977   : > { %v3786_v13 = vadd.f32 %v3784_v1, %v3778_v10  ;;  %v3617_v41 = vpop.xlane.xlu1 %3616 }
 0x978   : > { %v3458_v45 = vrot.slane %v3457_v60, 1  ;;  %v3789_v54 = vmul.f32 %v3785_v12, %v7420_v56  ;;  %v3618_v32 = vrot.slane %v3617_v41, 4 }
 0x979   : > { %v3790_v15 = vmul.f32 %v3786_v13, %v7422_v27 }
 0x97a   : > { %v3459_v30 = vadd.f32 %v3458_v45, %v3457_v60  ;;  %v3791_v63 = vsub.f32 %v3787_v4, %v3789_v54  ;;  %v3619_v31 = vadd.f32 %v3618_v32, %v3617_v41 }
 0x97b   : > { %v3792_v61 = vsub.f32 %v3788_v21, %v3790_v15 }
 0x97c   : > { %4990 = vpush %v3459_v30  ;;  %3676 = vadd.xlane.f32.xlu0 %v3675_v7  ;;  %v3793_v56 = vsel %vm3448_vm13, %v3791_v63, 0.0  ;;  %v3620_v39 = vrot.slane %v3619_v31, 2 }
 0x97d   : > { %4992 = vpush %v3467_v6  ;;  %v3794_v27 = vsel %vm3448_vm13, %v3792_v61, 0.0 }
 0x97e   : > { %v3795_v24 = vadd.f32 %v3794_v27, %v3793_v56  ;;  %v3621_v23 = vadd.f32 %v3620_v39, %v3619_v31 }
 0x97f   : > { %v3485_v49 = vpop.xlane.xlu2 %3484  ;;  %v3703_v34 = vpop.xlane.xlu1 %3702 }
 0x980   : > { %v3486_v51 = vrot.slane %v3485_v49, 4  ;;  %v3704_v38 = vrot.slane %v3703_v34, 4  ;;  %v3622_v33 = vrot.slane %v3621_v23, 1 }
 0x982   : > { %v3487_v53 = vadd.f32 %v3486_v51, %v3485_v49  ;;  %v3705_v17 = vadd.f32 %v3704_v38, %v3703_v34  ;;  %v3623_v51 = vadd.f32 %v3622_v33, %v3621_v23 }
 0x984   : > { %v3488_v8 = vrot.slane %v3487_v53, 2  ;;  %3827 = vadd.xlane.f32.xlu0 %v3824_v52  ;;  %v3706_v14 = vrot.slane %v3705_v17, 2 }
 0x986   : > { %v3489_v9 = vadd.f32 %v3488_v8, %v3487_v53  ;;  %v3707_v0 = vadd.f32 %v3706_v14, %v3705_v17 }
 0x987   : > { %v3647_v40 = vpop.xlane.xlu2 %3646 }
 0x988   : > { %v3490_v58 = vrot.slane %v3489_v9, 1  ;;  %v3648_v36 = vrot.slane %v3647_v40, 4 }
 0x98a   : > { %v3491_v59 = vadd.f32 %v3490_v58, %v3489_v9  ;;  %v3649_v22 = vadd.f32 %v3648_v36, %v3647_v40  ;;  %v3708_v9 = vrot.slane %v3707_v0, 1 }
 0x98c   : > { %4994 = vpush %v3491_v59  ;;  %3796 = vadd.xlane.f32.xlu0 %v3795_v24  ;;  %v3650_v42 = vrot.slane %v3649_v22, 2  ;;  %v3709_v26 = vadd.f32 %v3708_v9, %v3707_v0 }
 0x98e   : > { %v3651_v16 = vadd.f32 %v3650_v42, %v3649_v22 }
 0x98f   : > { %v3826_v52 = vpop.xlane.xlu2 %3825 }
 0x990   : > { %v3652_v7 = vrot.slane %v3651_v16, 1  ;;  %v3829_v55 = vsel %vm3448_vm13, %v3826_v52, 0.0 }
 0x992   : > { %v3653_v8 = vadd.f32 %v3652_v7, %v3651_v16 }
 0x9ad   : > { %s4991_s6 = spop %4990 }
 0x9ae   : > { %s7444_s1 = spop %4992 }
 0x9af   : > { %s3469_s5 = smul.f32 %s7444_s1, %s4991_s6 }
 0x9bd   : > { %s4995_s7 = spop %4994 }
 0x9be   : > { %s3501_s24 = smul.f32 %s4995_s7, %s7444_s1 }
 0x9c0   : > { %s7448_s19 = ssub.f32 %s3469_s5, %s3501_s24 }
 0x9e1   : > { %v3751_v25 = vpop.xlane.xlu2 %3750 }
 0x9e2   : > { %v3752_v29 = vrot.slane %v3751_v25, 4 }
 0x9e4   : > { %v3720_v50 = vpop.xlane.xlu1 %3719  ;;  %v3753_v62 = vadd.f32 %v3752_v29, %v3751_v25 }
 0x9e5   : > { %v3721_v10 = vrot.slane %v3720_v50, 4 }
 0x9e6   : > { %v3754_v3 = vrot.slane %v3753_v62, 2 }
 0x9e7   : > { %v3515_v57 = vpop.xlane.xlu0 %3514  ;;  %v3722_v12 = vadd.f32 %v3721_v10, %v3720_v50 }
 0x9e8   : > { %v3516_v43 = vrot.slane %v3515_v57, 4  ;;  %v3755_v35 = vadd.f32 %v3754_v3, %v3753_v62 }
 0x9e9   : > { %v3723_v13 = vrot.slane %v3722_v12, 2 }
 0x9ea   : > { %v3517_v44 = vadd.f32 %v3516_v43, %v3515_v57  ;;  %v3756_v38 = vrot.slane %v3755_v35, 1 }
 0x9eb   : > { %v3724_v54 = vadd.f32 %v3723_v13, %v3722_v12 }
 0x9ec   : > { %v3518_v60 = vrot.slane %v3517_v44, 2 }
 0x9ed   : > { %v3725_v15 = vrot.slane %v3724_v54, 1 }
 0x9ee   : > { %v3519_v45 = vadd.f32 %v3518_v60, %v3517_v44  ;;  %v3757_v60 = vadd.f32 %v3756_v38, %v3755_v35 }
 0x9ef   : > { %v3677_v46 = vpop.xlane.xlu0 %3676  ;;  %v3726_v4 = vadd.f32 %v3725_v15, %v3724_v54 }
 0x9f0   : > { %v3678_v30 = vrot.slane %v3677_v46, 4  ;;  %v3520_v6 = vrot.slane %v3519_v45, 1 }
 0x9f2   : > { %v3679_v48 = vadd.f32 %v3678_v30, %v3677_v46  ;;  %v3521_v49 = vadd.f32 %v3520_v6, %v3519_v45 }
 0x9f4   : > { %v3680_v53 = vrot.slane %v3679_v48, 2  ;;  %4996 = vpush %v3521_v49 }
 0x9f5   : > { %4998 = vpush %v3623_v51 }
 0x9f6   : > { %5000 = vpush %v3653_v8  ;;  %v3681_v47 = vadd.f32 %v3680_v53, %v3679_v48 }
 0x9f7   : > { %v3828_v58 = vpop.xlane.xlu0 %3827 }
 0x9f8   : > { %v3830_v59 = vsel %vm3448_vm13, %v3828_v58, 0.0  ;;  %v3682_v11 = vrot.slane %v3681_v47, 1  ;;  %vm3873_vm13 = vcmp.eq.s32.totalorder %v7408_v20, 5 }
 0x9f9   : > { %v3831_v18 = vadd.f32 %v3830_v59, %v3829_v55 }
 0x9fa   : > { %v3683_v1 = vadd.f32 %v3682_v11, %v3681_v47 }
 0x9fb   : > { %3832 = vadd.xlane.f32.xlu1 %v3831_v18 }
 0x9fc   : > { %5002 = vpush %v3683_v1 }
 0x9fd   : > { %5004 = vpush %v3709_v26 }
 0x9fe   : > { %5006 = vpush %v3726_v4 }
 0x9ff   : > { %v3797_v21 = vpop.xlane.xlu0 %3796 }
 0xa00   : > { %v3798_v28 = vrot.slane %v3797_v21, 4 }
 0xa02   : > { %v3799_v61 = vadd.f32 %v3798_v28, %v3797_v21 }
 0xa04   : > { %v3800_v37 = vrot.slane %v3799_v61, 2 }
 0xa06   : > { %v3801_v27 = vadd.f32 %v3800_v37, %v3799_v61 }
 0xa08   : > { %v3802_v17 = vrot.slane %v3801_v27, 1 }
 0xa0a   : > { %v3803_v46 = vadd.f32 %v3802_v17, %v3801_v27 }
 0xa25   : > { %s4997_s9 = spop %4996 }
 0xa26   : > { %s3531_s14 = smul.f32 %s4997_s9, %s7444_s1  ;;  %s4999_s25 = spop %4998 }
 0xa27   : > { %s3633_s21 = smul.f32 %s4999_s25, %s7444_s1  ;;  %s5001_s15 = spop %5000 }
 0xa28   : > { %s7452_s26 = ssub.f32 %s3469_s5, %s3531_s14  ;;  %s3663_s20 = smul.f32 %s5001_s15, %s7444_s1 }
 0xa29   : > { %s3851_s9 = sld [smem:[#allocation19]] }
 0xa2a   : > { %s3533_s3 = sadd.f32 %s7452_s26, %s7448_s19 }
 0xa2b   : > { %s7457_s30 = ssub.f32 %s3633_s21, %s3663_s20 }
 0xa2d   : > { %s5003_s16 = spop %5002 }
 0xa2e   : > { %s3693_s18 = smul.f32 %s5003_s16, %s7444_s1  ;;  %s5005_s4 = spop %5004 }
 0xa2f   : > { %s3711_s8 = smax.f32 %s6081_s13, %s5005_s4  ;;  %s3712_s11 = ssub.f32 8192.0, %s5005_s4 }
 0xa30   : > { %s7460_s17 = ssub.f32 %s3633_s21, %s3693_s18  ;;  %v3759_v63 = vstv %s3711_s8  ;;  %s5007_s22 = spop %5006 }
 0xa31   : > { %s3713_s10 = smax.f32 %s6081_s13, %s3712_s11  ;;  %5444 = vrcp.f32 %v3759_v63  ;;  %vm3765_vm2 = vweird.f32 %v3759_v63  ;;  %v3769_v32 = vand.u32 2147483647, %v3759_v63  ;;  %v3771_v36 = vand.u32 2147483648, %v3759_v63  ;;  %s3534_s8 = smul.f32 0.5, %s3533_s3 }
 0xa32   : > { %s3695_s12 = sadd.f32 %s7460_s17, %s7457_s30  ;;  %v3728_v2 = vstv %s3713_s10 }
 0xa33   : > { %5446 = vrcp.f32 %v3728_v2  ;;  %vm3734_vm9 = vweird.f32 %v3728_v2  ;;  %v3740_v40 = vand.u32 2147483648, %v3728_v2  ;;  %v3738_v31 = vand.u32 2147483647, %v3728_v2 }
 0xa34   : > { %v3772_v43 = vor.u32 1.1754944e-38, %v3771_v36  ;;  %vm3770_vm15 = vcmp.eq.f32.partialorder %v3769_v32, 8.507059e+37  ;;  %s3696_s20 = smul.f32 0.5, %s3695_s12  ;;  %v3868_v55 = vstv %s3534_s8 }
 0xa35   : > { %v3741_v42 = vor.u32 1.1754944e-38, %v3740_v40  ;;  %vm3739_vm8 = vcmp.eq.f32.partialorder %v3738_v31, 8.507059e+37 }
 0xa36   : > { %s3856_s11 = smul.f32 0.1, %s3696_s20  ;;  %v3865_v8 = vstv %s3696_s20 }
 0xa37   : > { %v5445_v19 = vpop.eup %5444 }
 0xa38   : > { %v3761_v5 = vmul.f32 %v5445_v19, %v3759_v63  ;;  %vm3766_vm6 = vweird.f32 %v5445_v19 }
 0xa39   : > { %v5447_v56 = vpop.eup %5446  ;;  %vm3767_vm11 = vmor %vm3765_vm2, %vm3766_vm6  ;;  %vm3882_vm2 = vcmp.eq.s32.totalorder %v7408_v20, 8 }
 0xa3a   : > { %v3730_v24 = vmul.f32 %v5447_v56, %v3728_v2  ;;  %v3762_v41 = vsub.f32 1.0, %v3761_v5  ;;  %vm3735_vm3 = vweird.f32 %v5447_v56 }
 0xa3b   : > { %vm3736_vm5 = vmor %vm3734_vm9, %vm3735_vm3 }
 0xa3c   : > { %v3731_v34 = vsub.f32 1.0, %v3730_v24  ;;  %v3763_v22 = vmul.f32 %v5445_v19, %v3762_v41 }
 0xa3e   : > { %v3732_v39 = vmul.f32 %v5447_v56, %v3731_v34  ;;  %v3764_v57 = vadd.f32 %v5445_v19, %v3763_v22 }
 0xa40   : > { %v3733_v44 = vadd.f32 %v5447_v56, %v3732_v39  ;;  %v3768_v23 = vsel %vm3767_vm11, %v5445_v19, %v3764_v57 }
 0xa41   : > { %v3773_v45 = vsel %vm3770_vm15, %v3772_v43, %v3768_v23 }
 0xa42   : > { %v3737_v16 = vsel %vm3736_vm5, %v5447_v56, %v3733_v44 }
 0xa43   : > { %v3742_v14 = vsel %vm3739_vm8, %v3741_v42, %v3737_v16 }
 0xa44   : > { %5008 = vpush %v3742_v14 }
 0xa45   : > { %5010 = vpush %v3757_v60 }
 0xa46   : > { %5012 = vpush %v3773_v45 }
 0xa47   : > { %5014 = vpush %v3803_v46 }
 0xa6e   : > { %v3833_v33 = vpop.xlane.xlu1 %3832 }
 0xa6f   : > { %v3834_v30 = vrot.slane %v3833_v33, 4 }
 0xa71   : > { %v3835_v6 = vadd.f32 %v3834_v30, %v3833_v33 }
 0xa73   : > { %v3836_v7 = vrot.slane %v3835_v6, 2 }
 0xa75   : > { %v3837_v0 = vadd.f32 %v3836_v7, %v3835_v6  ;;  %s5009_s0 = spop %5008 }
 0xa76   : > { %s5011_s2 = spop %5010  ;;  %s7464_s7 = smul.f32 %s5009_s0, %s5007_s22 }
 0xa77   : > { %v3838_v48 = vrot.slane %v3837_v0, 1  ;;  %s5013_s6 = spop %5012 }
 0xa78   : > { %s7466_s24 = smul.f32 %s5013_s6, %s5011_s2  ;;  %s5015_s5 = spop %5014  ;;  %v3883_v12 = vstv %s7464_s7 }
 0xa79   : > { %v3839_v49 = vadd.f32 %v3838_v48, %v3837_v0  ;;  %s3813_s14 = smul.f32 %s5015_s5, %s7444_s1 }
 0xa7a   : > { %s7471_s25 = sadd.f32 %s7466_s24, %s7464_s7  ;;  %v3880_v50 = vstv %s7466_s24 }
 0xa7b   : > { %5016 = vpush %v3839_v49  ;;  %s3814_s4 = ssub.f32 0.0, %s3813_s14 }
 0xa7c   : > { %s3852_s18 = smul.f32 0.5, %s7471_s25  ;;  %v3877_v26 = vstv %s7471_s25 }
 0xa7d   : > { %v3871_v58 = vstv %s3814_s4 }
 0xa7e   : > { %s3853_s22 = sadd.f32 %s3852_s18, %s3534_s8 }
 0xa80   : > { %v3862_v52 = vstv %s3853_s22 }
 0xaac   : > { %s5017_s21 = spop %5016 }
 0xaad   : > { %s3849_s15 = smul.f32 %s5017_s21, %s7444_s1 }
 0xaaf   : > { %s3850_s16 = smul.f32 -0.5, %s3849_s15 }
 0xab1   : > { %s3854_s13 = smul.f32 %s3851_s9, %s3850_s16  ;;  %v3874_v18 = vstv %s3850_s16 }
 0xab3   : > { %s3855_s10 = sadd.f32 %s3854_s13, %s3814_s4 }
 0xab5   : > { %s3857_s0 = ssub.f32 %s3855_s10, %s3856_s11 }
 0xab7   : > { %v3859_v51 = vstv %s3857_s0 }
 0xab8   : > { %v3860_v53 = vsel %vm3858_vm14, %v3859_v51, 0.0 }
 0xab9   : > { %v3863_v9 = vsel %vm3861_vm4, %v3862_v52, %v3860_v53 }
 0xaba   : > { %v3866_v47 = vsel %vm3864_vm7, %v3865_v8, %v3863_v9 }
 0xabb   : > { %v3869_v59 = vsel %vm3867_vm10, %v3868_v55, %v3866_v47 }
 0xabc   : > { %v3872_v11 = vsel %vm3870_vm12, %v3871_v58, %v3869_v59 }
 0xabd   : > { %v3875_v1 = vsel %vm3873_vm13, %v3874_v18, %v3872_v11 }
 0xabe   : > { %v3878_v10 = vsel %vm3876_vm1, %v3877_v26, %v3875_v1 }
 0xabf   : > { %v3881_v13 = vsel %vm3879_vm0, %v3880_v50, %v3878_v10 }
 0xac0   : > { %v3884_v54 = vsel %vm3882_vm2, %v3883_v12, %v3881_v13 }
 0xac1   : > { %3885 = vst [vmem:[#allocation41] sm:$0x1] %v3884_v54 }
 0xac2 PF: > { %p5123_p6 = scmp.eq.s32.totalorder %s6272_s29, 3  ;;  %s7774_s26 = sld [smem:[#allocation98_spill]] }
 0xac3   : > { %s6082_s30 = smov [#allocation41]  }
 0xac4   : > { %s3892_s17 = sshll.u32 %s6082_s30, 4  ;;  %s3893_s17 = int_to_ptr.vmem [resolvable:$true] %s3892_s17 }
 0xac8   : > { %s3894_s3 = sshll.u32 %s7774_s26, 4  ;;  %s3895_s3 = int_to_ptr.hbm [resolvable:$true] %s3894_s3 }
 0xac9   : > { %5061 = dma.vmem_to_hbm [thread:$0]  (%p5123_p6), %s3893_s17, 16, %s3895_s3, [#allocation22]  }
 0xaca   : > { %6001 = dma.done.wait (%p5123_p6), [#allocation22], 16  }
 0xacb   : > { %6003 = vsyncadd (%p5123_p6), [#allocation22], 4294967280 }
 0xacc PF: > { %s48_s28 = sadd.s32 1, %s6058_s28   ;;  %s7776_s30 = sld [smem:[#allocation56_spill]] }
 0xacd   : > { %p7498_p0 = scmp.ge.s32.totalorder %s48_s28, 6   ;;  %s7777_s4 = sld [smem:[#allocation57_spill]] }
 0xace   : > { %s7778_s29 = sld [smem:[#allocation58_spill]]  ;;  %s7787_s0 = smov %s7800_s23 }
 0xacf   : > { %s7779_s1 = sld [smem:[#allocation59_spill]]  ;;  %s7789_s26 = smov %s6050_s27 }
 0xad0   : > { %s7780_s5 = sld [smem:[#allocation75_spill]] }
 0xad1   : > { %s7781_s24 = sld [smem:[#allocation60_spill]] }
 0xad2   : > { %s7782_s6 = sld [smem:[#allocation61_spill]] }
 0xad3   : > { %s7783_s25 = sld [smem:[#allocation72_spill]] }
 0xad4   : > { %s7784_s2 = sld [smem:[#allocation64_spill]]  ;;  %s7788_s23 = smov %s7778_s29 }
 0xad5   : > { %s7785_s7 = sld [smem:[#allocation70_spill]] }
 0xad6   : > { %s7786_s3 = sld [smem:[#allocation74_spill]] }
 0xad7   :  { %47 = sbr.rel (!%p7498_p0) target bundleno = 48 (0x30), region = 267 }
 0xadb   : > { %s7790_s27 = smov %s7785_s7 }
 0xadc   :  { %3908 = vsyncpa [#allocation21], 1 }
 0xadd   :  { %3910 = vsyncpa [#allocation21 + $0x1], 1 }
 0xade   :  { %3911 = vsyncpa [#allocation24], 1 }
 0xadf   :  { %3913 = vsyncpa [#allocation24 + $0x1], 1 }
 0xae0   :  { %3914 = vsyncpa [#allocation27], 1 }
 0xae1   :  { %3916 = vsyncpa [#allocation27 + $0x1], 1 }
 0xae2   :  { %3917 = vsyncpa [#allocation30], 1 }
 0xae3   :  { %3918 = vsyncpa [#allocation33], 1 }
 0xae4   :  { %3919 = vsyncpa [#allocation40], 1 }
 0xae5   :  { %3921 = vsyncpa [#allocation40 + $0x1], 1 }
 0xae6   :  { %3922 = vsyncpa [#allocation22], 1 }
 0xae7   :  { %3924 = vsyncpa [#allocation22 + $0x1], 1 }

</bundles_post_ra>
